<compile_context>
chip_gen: v7x
topology: tpu7x:2x2x1
jax: 0.10.0
libtpu: 0.0.40
codegen_flags: <defaults>
</compile_context>

<pallas_src>
import functools

import numpy as np
import jax
import jax.numpy as jnp
from jax.experimental import pallas as pl
from jax.experimental.pallas import tpu as pltpu

# ---- model hyper-parameters (match the PyTorch module) ---------------------
HIDDEN = 128          # hidden_dim
NUM_HEADS = 8         # nhead of TransformerEncoderLayer
FFN = HIDDEN * 4      # dim_feedforward
N_LAYERS = 3          # nn.TransformerEncoder(encoder_layer, 3)
LN_EPS = 1e-5


def _ln(x, g, b, eps=LN_EPS):
    # One-pass LayerNorm: mean and mean-of-squares are independent reductions,
    # so the two XLU reduces can pipeline.
    mu = jnp.mean(x, axis=-1, keepdims=True)
    ms = jnp.mean(x * x, axis=-1, keepdims=True)
    var = jnp.maximum(ms - mu * mu, 0.0)
    return (x - mu) * jax.lax.rsqrt(var + eps) * g + b


# ============================================================================
# Fused kernel: config_branch -> token substitution -> 3 encoder layers -> head
# Everything operates on the flattened [B*N, H] slab held as VMEM values.
# ============================================================================
def fused_counter_kernel(step_ref, configs_ref, bias_ref, maskv_ref,
                         cw_ref, cvec_ref, rows_ref,
                         wqkv_ref, wo_ref, wf1_ref, wf2_ref, lvec_ref,
                         hw_ref, hb_ref,
                         out_ref,
                         *, batch, num_cam, num_heads, num_layers):
    H = HIDDEN
    nh = num_heads
    BN = batch * num_cam
    scale = 1.0 / float(H // nh) ** 0.5
    bf16 = jnp.bfloat16
    f32 = jnp.float32

    # Head block-diagonal mask: row r = (head h', key token j), col g = (head h, dim d)
    mask_v = maskv_ref[...]                      # [nh*BN, H] f32 of 0/1
    mask_v_bf = mask_v.astype(bf16)              # doubles as "ones" for denominators
    bias = bias_ref[...]                         # [BN, nh*BN] additive cross-batch mask
    cvec = cvec_ref[...]                         # [8, H] packed config-branch vectors

    # ---- config branch: Linear-ReLU-Linear-ReLU-Linear-LayerNorm -----------
    h = jnp.dot(configs_ref[...], cw_ref[0], preferred_element_type=f32) + cvec[0:1, :]
    h = jnp.maximum(h, 0.0)
    h = jnp.dot(h.astype(bf16), cw_ref[1], preferred_element_type=f32) + cvec[1:2, :]
    h = jnp.maximum(h, 0.0)
    h = jnp.dot(h.astype(bf16), cw_ref[2], preferred_element_type=f32) + cvec[2:3, :]
    h = _ln(h, cvec[3:4, :], cvec[4:5, :])                               # [BN, H] f32

    # ---- padding-token / state-token substitution + positional embedding ---
    row_ids = jax.lax.broadcasted_iota(jnp.int32, (BN, 1), 0)
    step_rows = jnp.zeros((BN, 1), jnp.int32)
    pos_ids = jnp.zeros((BN, 1), jnp.int32)
    for b in range(batch):                       # batch is tiny and static
        in_b = jnp.logical_and(row_ids >= b * num_cam, row_ids < (b + 1) * num_cam)
        step_rows = jnp.where(in_b, step_ref[b], step_rows)
        pos_ids = jnp.where(in_b, row_ids - b * num_cam, pos_ids)
    pad_mask = pos_ids > step_rows
    tok_mask = pos_ids == step_rows
    h = jnp.where(pad_mask, cvec[5:6, :], h)     # padding_token
    h = jnp.where(tok_mask, rows_ref[0], h)      # state_token[pos] == state_token[step] here
    h = h + rows_ref[1]                          # positional embedding

    # ---- transformer encoder layers (post-norm, ReLU, eval-mode dropout) ---
    for l in range(num_layers):
        lv = lvec_ref[l]                         # [8, 4H] packed per-layer vectors
        qkv = (jnp.dot(h.astype(bf16), wqkv_ref[l], preferred_element_type=f32)
               + lv[0:1, :3 * H])                # [BN, 3H]
        q = qkv[:, 0 * H:1 * H]
        k = qkv[:, 1 * H:2 * H]
        v = qkv[:, 2 * H:3 * H]

        # Replicate K/V once per head along sublanes, mask to block-diagonal:
        #   ke[(h', j), f] = k[j, f] if feature f belongs to head h' else 0
        ke = (jnp.concatenate([k] * nh, axis=0) * mask_v).astype(bf16)   # [nh*BN, H]
        ve = (jnp.concatenate([v] * nh, axis=0) * mask_v).astype(bf16)   # [nh*BN, H]

        # All heads' score tiles in one lane-dense [BN, nh*BN] slab.
        s = jax.lax.dot_general(q.astype(bf16), ke, (((1,), (1,)), ((), ())),
                                preferred_element_type=f32) * scale + bias
        # Row-global max is a valid shift for every per-head softmax block.
        e = jnp.exp(s - jnp.max(s, axis=-1, keepdims=True))
        e_bf = e.astype(bf16)
        num = jnp.dot(e_bf, ve, preferred_element_type=f32)              # [BN, H]
        den = jnp.dot(e_bf, mask_v_bf, preferred_element_type=f32)       # per-head sums,
        attn_heads = num * pl.reciprocal(jnp.maximum(den, 1e-20),        # head-major cols
                                         approx=True)

        attn = (jnp.dot(attn_heads.astype(bf16), wo_ref[l],
                        preferred_element_type=f32) + lv[1:2, :H])
        y = _ln(h + attn, lv[2:3, :H], lv[3:4, :H])                      # norm1
        f = (jnp.dot(y.astype(bf16), wf1_ref[l], preferred_element_type=f32)
             + lv[4:5, :])
        f = jnp.maximum(f, 0.0)
        f = (jnp.dot(f.astype(bf16), wf2_ref[l], preferred_element_type=f32)
             + lv[5:6, :H])
        h = _ln(y + f, lv[6:7, :H], lv[7:8, :H])                         # norm2

    # ---- gather x[token_location] (one row per batch) + output head --------
    gathered = jnp.where(tok_mask, h, 0.0)
    xt = jnp.sum(gathered.reshape(batch, num_cam, H), axis=1)            # [B, H]
    out_ref[...] = (jnp.dot(xt.astype(bf16), hw_ref[...],
                            preferred_element_type=f32) + hb_ref[...])


# ============================================================================
# One-time prepare step: weight packing + step-independent constants.
# ============================================================================
def prepare_params(params, num_cam, config_dim, batch):
    H, nh = HIDDEN, NUM_HEADS
    N, B = num_cam, batch
    BN = B * N
    dh = H // nh
    OUT_PAD = ((max(num_cam, 128) + 127) // 128) * 128   # lane-dense head output
    bf = lambda a: a.astype(jnp.bfloat16)
    cb = params["cb"]

    cw1_pad = jnp.zeros((H, H), jnp.float32).at[:config_dim, :].set(cb["w1"])
    cw_all = bf(jnp.stack([cw1_pad, cb["w2"], cb["w3"]]))                 # [3,H,H]

    cvecs = jnp.zeros((8, H), jnp.float32)
    for i, name in enumerate(["b1", "b2", "b3", "lng", "lnb"]):
        cvecs = cvecs.at[i].set(cb[name])
    cvecs = cvecs.at[5].set(params["pad_tok"])

    xtra_rows = jnp.stack([jnp.tile(params["state_tok"], (B, 1)),
                           jnp.tile(params["pos_emb"], (B, 1))])          # [2,BN,H]

    L = params["layers"]
    wqkv = bf(jnp.stack([jnp.concatenate([lp["wq"], lp["wk"], lp["wv"]], axis=1)
                         for lp in L]))                                   # [L,H,3H]
    wo = bf(jnp.stack([lp["wo"] for lp in L]))                            # [L,H,H]
    wf1 = bf(jnp.stack([lp["wf1"] for lp in L]))                          # [L,H,4H]
    wf2 = bf(jnp.stack([lp["wf2"] for lp in L]))                          # [L,4H,H]

    lvec = jnp.zeros((len(L), 8, 4 * H), jnp.float32)                     # biases + LN
    for i, lp in enumerate(L):
        lvec = lvec.at[i, 0, :3 * H].set(jnp.concatenate([lp["bq"], lp["bk"], lp["bv"]]))
        lvec = lvec.at[i, 1, :H].set(lp["bo"])
        lvec = lvec.at[i, 2, :H].set(lp["ln1g"])
        lvec = lvec.at[i, 3, :H].set(lp["ln1b"])
        lvec = lvec.at[i, 4, :].set(lp["bf1"])
        lvec = lvec.at[i, 5, :H].set(lp["bf2"])
        lvec = lvec.at[i, 6, :H].set(lp["ln2g"])
        lvec = lvec.at[i, 7, :H].set(lp["ln2b"])

    head_w = bf(jnp.zeros((H, OUT_PAD), jnp.float32).at[:, :num_cam].set(params["head_w"]))
    head_b = jnp.zeros((1, OUT_PAD), jnp.float32).at[0, :num_cam].set(params["head_b"])

    # Additive cross-batch attention mask, packed across heads along lanes.
    tok_batch = jnp.arange(BN, dtype=jnp.int32) // N
    col_batch = jnp.tile(tok_batch, nh)
    attn_bias = jnp.where(tok_batch[:, None] == col_batch[None, :],
                          0.0, -1e30).astype(jnp.float32)                 # [BN, nh*BN]

    # Head block-diagonal 0/1 mask used for packed K/V, and as denominator "ones".
    r_head = jnp.arange(nh * BN, dtype=jnp.int32) // BN
    c_head = jnp.arange(H, dtype=jnp.int32) // dh
    mask_v = (r_head[:, None] == c_head[None, :]).astype(jnp.float32)     # [nh*BN, H]

    return dict(cw_all=cw_all, cvecs=cvecs, xtra_rows=xtra_rows,
                wqkv=wqkv, wo=wo, wf1=wf1, wf2=wf2, lvec=lvec,
                head_w=head_w, head_b=head_b,
                attn_bias=attn_bias, mask_v=mask_v)


# ============================================================================
# Per-call wrapper: pad/flatten configs, cast step, launch the fused kernel.
# ============================================================================
def counter_forward(prepared, configs, step):
    B, N, C = configs.shape
    BN = B * N
    H = HIDDEN
    num_layers = prepared["wqkv"].shape[0]
    out_pad = prepared["head_w"].shape[1]

    configs_pad = jnp.zeros((BN, H), jnp.bfloat16).at[:, :C].set(
        configs.reshape(BN, C).astype(jnp.bfloat16))
    step32 = step.astype(jnp.int32)

    kern = functools.partial(fused_counter_kernel, batch=B, num_cam=N,
                             num_heads=NUM_HEADS, num_layers=num_layers)
    smem = pl.BlockSpec(memory_space=pltpu.MemorySpace.SMEM)
    vmem = pl.BlockSpec(memory_space=pltpu.MemorySpace.VMEM)
    out = pl.pallas_call(
        kern,
        out_shape=jax.ShapeDtypeStruct((B, out_pad), jnp.float32),
        in_specs=[smem] + [vmem] * 13,
        out_specs=vmem,
    )(step32, configs_pad, prepared["attn_bias"], prepared["mask_v"],
      prepared["cw_all"], prepared["cvecs"], prepared["xtra_rows"],
      prepared["wqkv"], prepared["wo"], prepared["wf1"], prepared["wf2"],
      prepared["lvec"], prepared["head_w"], prepared["head_b"])
    return out[:, :N]


# ============================================================================
# Deterministic parameter initialization (synthetic, matches module shapes)
# ============================================================================
def create_pos_embedding(length, hidden_dim):
    position = jnp.arange(length, dtype=jnp.float32)[:, None]
    div_term = jnp.exp(jnp.arange(0, hidden_dim, 2, dtype=jnp.float32)
                       * (-jnp.log(10000.0) / hidden_dim))
    pe = jnp.zeros((length, hidden_dim), jnp.float32)
    pe = pe.at[:, 0::2].set(jnp.sin(position * div_term))
    pe = pe.at[:, 1::2].set(jnp.cos(position * div_term))
    return pe


def init_params(key, num_cam, config_dim):
    keys = iter(jax.random.split(key, 128))

    def lin(fin, fout):
        w = jax.random.normal(next(keys), (fin, fout), jnp.float32) / jnp.sqrt(fin)
        b = 0.1 * jax.random.normal(next(keys), (fout,), jnp.float32)
        return w, b

    def ln_params(dim):
        g = 1.0 + 0.1 * jax.random.normal(next(keys), (dim,), jnp.float32)
        b = 0.1 * jax.random.normal(next(keys), (dim,), jnp.float32)
        return g, b

    cb = {}
    cb["w1"], cb["b1"] = lin(config_dim, HIDDEN)
    cb["w2"], cb["b2"] = lin(HIDDEN, HIDDEN)
    cb["w3"], cb["b3"] = lin(HIDDEN, HIDDEN)
    cb["lng"], cb["lnb"] = ln_params(HIDDEN)

    layers = []
    for _ in range(N_LAYERS):
        lp = {}
        lp["wq"], lp["bq"] = lin(HIDDEN, HIDDEN)
        lp["wk"], lp["bk"] = lin(HIDDEN, HIDDEN)
        lp["wv"], lp["bv"] = lin(HIDDEN, HIDDEN)
        lp["wo"], lp["bo"] = lin(HIDDEN, HIDDEN)
        lp["ln1g"], lp["ln1b"] = ln_params(HIDDEN)
        lp["wf1"], lp["bf1"] = lin(HIDDEN, FFN)
        lp["wf2"], lp["bf2"] = lin(FFN, HIDDEN)
        lp["ln2g"], lp["ln2b"] = ln_params(HIDDEN)
        layers.append(lp)

    head_w, head_b = lin(HIDDEN, num_cam)
    return {
        "cb": cb,
        "pad_tok": jax.random.normal(next(keys), (HIDDEN,), jnp.float32),
        "state_tok": jax.random.normal(next(keys), (num_cam, HIDDEN), jnp.float32),
        "pos_emb": create_pos_embedding(num_cam, HIDDEN),
        "layers": layers,
        "head_w": head_w,
        "head_b": head_b,
    }


# ============================================================================
# Pure-JAX f32 reference (mirrors the PyTorch forward) for a correctness check
# ============================================================================
def reference_forward(params, configs, step):
    B, N, C = configs.shape
    H, nh = HIDDEN, NUM_HEADS
    dh = H // nh
    cb = params["cb"]
    h = configs.reshape(B * N, C)
    h = jax.nn.relu(h @ cb["w1"] + cb["b1"])
    h = jax.nn.relu(h @ cb["w2"] + cb["b2"])
    h = h @ cb["w3"] + cb["b3"]
    h = _ln(h, cb["lng"], cb["lnb"]).reshape(B, N, H)

    pos = jnp.arange(N)
    pad = pos[None, :] > step[:, None]
    tok = pos[None, :] == step[:, None]
    h = jnp.where(pad[..., None], params["pad_tok"], h)
    h = jnp.where(tok[..., None], params["state_tok"][step][:, None, :], h)
    h = h + params["pos_emb"][None]

    for lp in params["layers"]:
        q = (h @ lp["wq"] + lp["bq"]).reshape(B, N, nh, dh)
        k = (h @ lp["wk"] + lp["bk"]).reshape(B, N, nh, dh)
        v = (h @ lp["wv"] + lp["bv"]).reshape(B, N, nh, dh)
        s = jnp.einsum("bqhd,bkhd->bhqk", q, k) / jnp.sqrt(dh)
        p = jax.nn.softmax(s, axis=-1)
        o = jnp.einsum("bhqk,bkhd->bqhd", p, v).reshape(B, N, H)
        attn = o @ lp["wo"] + lp["bo"]
        y = _ln(h + attn, lp["ln1g"], lp["ln1b"])
        f = jax.nn.relu(y @ lp["wf1"] + lp["bf1"]) @ lp["wf2"] + lp["bf2"]
        h = _ln(y + f, lp["ln2g"], lp["ln2b"])

    xt = jnp.take_along_axis(h, step[:, None, None], axis=1)[:, 0]
    return xt @ params["head_w"] + params["head_b"]


# ============================================================================
if __name__ == "__main__":
    B, NUM_CAM, CONFIG_DIM = 2, 8, 32

    key = jax.random.PRNGKey(0)
    kp, kc, ks = jax.random.split(key, 3)
    params = init_params(kp, NUM_CAM, CONFIG_DIM)
    configs = jax.random.normal(kc, (B, NUM_CAM, CONFIG_DIM), jnp.float32)
    step = jax.random.randint(ks, (B,), 0, NUM_CAM).astype(jnp.int32)

    # One-time packing (hoisted out of the per-call path).
    prepared = prepare_params(params, NUM_CAM, CONFIG_DIM, B)

    fwd = jax.jit(counter_forward)
    out = jax.block_until_ready(fwd(prepared, configs, step))
    assert out.shape == (B, NUM_CAM)

    with jax.default_matmul_precision("highest"):
        ref = reference_forward(params, configs, step)
    # NOTE: kernel runs matmuls with bf16 operands (f32 accumulation), so a
    # loose 5e-2 tolerance against the f32 reference is expected and intended.
    np.testing.assert_allclose(np.asarray(out), np.asarray(ref), rtol=5e-2, atol=5e-2)

    print("KERNEL_OK")
</pallas_src>

<mosaic_0001>
module attributes {stable_mosaic.version = 11 : i64} {
  func.func @fused_counter_kernel(%arg0: memref<2xi32, #tpu.memory_space<smem>>, %arg1: memref<16x128xbf16, #tpu.memory_space<vmem>>, %arg2: memref<16x128xf32, #tpu.memory_space<vmem>>, %arg3: memref<128x128xf32, #tpu.memory_space<vmem>>, %arg4: memref<3x128x128xbf16, #tpu.memory_space<vmem>>, %arg5: memref<8x128xf32, #tpu.memory_space<vmem>>, %arg6: memref<2x16x128xf32, #tpu.memory_space<vmem>>, %arg7: memref<3x128x384xbf16, #tpu.memory_space<vmem>>, %arg8: memref<3x128x128xbf16, #tpu.memory_space<vmem>>, %arg9: memref<3x128x512xbf16, #tpu.memory_space<vmem>>, %arg10: memref<3x512x128xbf16, #tpu.memory_space<vmem>>, %arg11: memref<3x8x512xf32, #tpu.memory_space<vmem>>, %arg12: memref<128x128xbf16, #tpu.memory_space<vmem>>, %arg13: memref<1x128xf32, #tpu.memory_space<vmem>>, %arg14: memref<2x128xf32, #tpu.memory_space<vmem>>) attributes {dimension_semantics = [], scalar_prefetch = 0 : i64, scratch_operands = 0 : i64, tpu.core_type = #tpu.core_type<tc>} {
    %c0 = arith.constant 0 : index
    %c0_0 = arith.constant 0 : index
    %0 = vector.load %arg3[%c0, %c0_0] : memref<128x128xf32, #tpu.memory_space<vmem>>, vector<128x128xf32>
    %1 = arith.truncf %0 : vector<128x128xf32> to vector<128x128xbf16>
    %c0_1 = arith.constant 0 : index
    %c0_2 = arith.constant 0 : index
    %2 = vector.load %arg2[%c0_1, %c0_2] : memref<16x128xf32, #tpu.memory_space<vmem>>, vector<16x128xf32>
    %c0_3 = arith.constant 0 : index
    %c0_4 = arith.constant 0 : index
    %3 = vector.load %arg5[%c0_3, %c0_4] : memref<8x128xf32, #tpu.memory_space<vmem>>, vector<8x128xf32>
    %c0_5 = arith.constant 0 : index
    %c0_6 = arith.constant 0 : index
    %4 = vector.load %arg1[%c0_5, %c0_6] : memref<16x128xbf16, #tpu.memory_space<vmem>>, vector<16x128xbf16>
    %c0_7 = arith.constant 0 : index
    %c0_8 = arith.constant 0 : index
    %c0_9 = arith.constant 0 : index
    %5 = vector.load %arg4[%c0_7, %c0_8, %c0_9] : memref<3x128x128xbf16, #tpu.memory_space<vmem>>, vector<1x128x128xbf16>
    %6 = vector.shape_cast %5 : vector<1x128x128xbf16> to vector<128x128xbf16>
    %cst = arith.constant dense<0.000000e+00> : vector<16x128xf32>
    %7 = tpu.matmul %4, %6, %cst {dimension_numbers = #tpu.dot_dimension_numbers<[1], [0], [0], [1], [0, 0, 1, 1], [], []>} : vector<16x128xbf16>, vector<128x128xbf16>, vector<16x128xf32> -> vector<16x128xf32>
    %8 = vector.extract_strided_slice %3 {offsets = [0, 0], sizes = [1, 128], strides = [1, 1]} : vector<8x128xf32> to vector<1x128xf32>
    %9 = vector.broadcast %8 : vector<1x128xf32> to vector<16x128xf32>
    %10 = arith.addf %7, %9 : vector<16x128xf32>
    %cst_10 = arith.constant 0.000000e+00 : f32
    %11 = vector.broadcast %cst_10 : f32 to vector<16x128xf32>
    %12 = arith.maximumf %10, %11 : vector<16x128xf32>
    %13 = arith.truncf %12 : vector<16x128xf32> to vector<16x128xbf16>
    %c1 = arith.constant 1 : index
    %c0_11 = arith.constant 0 : index
    %c0_12 = arith.constant 0 : index
    %14 = vector.load %arg4[%c1, %c0_11, %c0_12] : memref<3x128x128xbf16, #tpu.memory_space<vmem>>, vector<1x128x128xbf16>
    %15 = vector.shape_cast %14 : vector<1x128x128xbf16> to vector<128x128xbf16>
    %cst_13 = arith.constant dense<0.000000e+00> : vector<16x128xf32>
    %16 = tpu.matmul %13, %15, %cst_13 {dimension_numbers = #tpu.dot_dimension_numbers<[1], [0], [0], [1], [0, 0, 1, 1], [], []>} : vector<16x128xbf16>, vector<128x128xbf16>, vector<16x128xf32> -> vector<16x128xf32>
    %17 = vector.extract_strided_slice %3 {offsets = [1, 0], sizes = [1, 128], strides = [1, 1]} : vector<8x128xf32> to vector<1x128xf32>
    %18 = vector.broadcast %17 : vector<1x128xf32> to vector<16x128xf32>
    %19 = arith.addf %16, %18 : vector<16x128xf32>
    %cst_14 = arith.constant 0.000000e+00 : f32
    %20 = vector.broadcast %cst_14 : f32 to vector<16x128xf32>
    %21 = arith.maximumf %19, %20 : vector<16x128xf32>
    %22 = arith.truncf %21 : vector<16x128xf32> to vector<16x128xbf16>
    %c2 = arith.constant 2 : index
    %c0_15 = arith.constant 0 : index
    %c0_16 = arith.constant 0 : index
    %23 = vector.load %arg4[%c2, %c0_15, %c0_16] : memref<3x128x128xbf16, #tpu.memory_space<vmem>>, vector<1x128x128xbf16>
    %24 = vector.shape_cast %23 : vector<1x128x128xbf16> to vector<128x128xbf16>
    %cst_17 = arith.constant dense<0.000000e+00> : vector<16x128xf32>
    %25 = tpu.matmul %22, %24, %cst_17 {dimension_numbers = #tpu.dot_dimension_numbers<[1], [0], [0], [1], [0, 0, 1, 1], [], []>} : vector<16x128xbf16>, vector<128x128xbf16>, vector<16x128xf32> -> vector<16x128xf32>
    %26 = vector.extract_strided_slice %3 {offsets = [2, 0], sizes = [1, 128], strides = [1, 1]} : vector<8x128xf32> to vector<1x128xf32>
    %27 = vector.broadcast %26 : vector<1x128xf32> to vector<16x128xf32>
    %28 = arith.addf %25, %27 : vector<16x128xf32>
    %29 = vector.extract_strided_slice %3 {offsets = [3, 0], sizes = [1, 128], strides = [1, 1]} : vector<8x128xf32> to vector<1x128xf32>
    %30 = vector.extract_strided_slice %3 {offsets = [4, 0], sizes = [1, 128], strides = [1, 1]} : vector<8x128xf32> to vector<1x128xf32>
    %cst_18 = arith.constant dense<0.000000e+00> : vector<16xf32>
    %31 = vector.multi_reduction <add>, %28, %cst_18 [1] : vector<16x128xf32> to vector<16xf32>
    %32 = vector.shape_cast %31 : vector<16xf32> to vector<16x1xf32>
    %cst_19 = arith.constant 1.280000e+02 : f32
    %33 = vector.broadcast %cst_19 : f32 to vector<16x1xf32>
    %34 = arith.divf %32, %33 : vector<16x1xf32>
    %35 = arith.mulf %28, %28 : vector<16x128xf32>
    %cst_20 = arith.constant dense<0.000000e+00> : vector<16xf32>
    %36 = vector.multi_reduction <add>, %35, %cst_20 [1] : vector<16x128xf32> to vector<16xf32>
    %37 = vector.shape_cast %36 : vector<16xf32> to vector<16x1xf32>
    %cst_21 = arith.constant 1.280000e+02 : f32
    %38 = vector.broadcast %cst_21 : f32 to vector<16x1xf32>
    %39 = arith.divf %37, %38 : vector<16x1xf32>
    %40 = arith.mulf %34, %34 : vector<16x1xf32>
    %41 = arith.subf %39, %40 : vector<16x1xf32>
    %cst_22 = arith.constant 0.000000e+00 : f32
    %42 = vector.broadcast %cst_22 : f32 to vector<16x1xf32>
    %43 = arith.maximumf %41, %42 : vector<16x1xf32>
    %44 = vector.broadcast %34 : vector<16x1xf32> to vector<16x128xf32>
    %45 = arith.subf %28, %44 : vector<16x128xf32>
    %cst_23 = arith.constant 9.99999974E-6 : f32
    %46 = vector.broadcast %cst_23 : f32 to vector<16x1xf32>
    %47 = arith.addf %43, %46 : vector<16x1xf32>
    %48 = math.rsqrt %47 : vector<16x1xf32>
    %49 = vector.broadcast %48 : vector<16x1xf32> to vector<16x128xf32>
    %50 = arith.mulf %45, %49 : vector<16x128xf32>
    %51 = vector.broadcast %29 : vector<1x128xf32> to vector<16x128xf32>
    %52 = arith.mulf %50, %51 : vector<16x128xf32>
    %53 = vector.broadcast %30 : vector<1x128xf32> to vector<16x128xf32>
    %54 = arith.addf %52, %53 : vector<16x128xf32>
    %55 = tpu.iota {dimensions = array<i32: 0>} : vector<16x1xi32>
    %c0_i32 = arith.constant 0 : i32
    %56 = vector.broadcast %c0_i32 : i32 to vector<16x1xi32>
    %c0_i32_24 = arith.constant 0 : i32
    %57 = vector.broadcast %c0_i32_24 : i32 to vector<16x1xi32>
    %c0_i32_25 = arith.constant 0 : i32
    %58 = vector.broadcast %c0_i32_25 : i32 to vector<16x1xi32>
    %59 = arith.cmpi sge, %55, %58 : vector<16x1xi32>
    %c8_i32 = arith.constant 8 : i32
    %60 = vector.broadcast %c8_i32 : i32 to vector<16x1xi32>
    %61 = arith.cmpi slt, %55, %60 : vector<16x1xi32>
    %62 = arith.andi %59, %61 : vector<16x1xi1>
    %c0_26 = arith.constant 0 : index
    %63 = memref.load %arg0[%c0_26] : memref<2xi32, #tpu.memory_space<smem>>
    %64 = vector.broadcast %63 : i32 to vector<16x1xi32>
    %65 = arith.select %62, %64, %56 : vector<16x1xi1>, vector<16x1xi32>
    %c0_i32_27 = arith.constant 0 : i32
    %66 = vector.broadcast %c0_i32_27 : i32 to vector<16x1xi32>
    %67 = arith.subi %55, %66 : vector<16x1xi32>
    %68 = arith.select %62, %67, %57 : vector<16x1xi1>, vector<16x1xi32>
    %c8_i32_28 = arith.constant 8 : i32
    %69 = vector.broadcast %c8_i32_28 : i32 to vector<16x1xi32>
    %70 = arith.cmpi sge, %55, %69 : vector<16x1xi32>
    %c16_i32 = arith.constant 16 : i32
    %71 = vector.broadcast %c16_i32 : i32 to vector<16x1xi32>
    %72 = arith.cmpi slt, %55, %71 : vector<16x1xi32>
    %73 = arith.andi %70, %72 : vector<16x1xi1>
    %c1_29 = arith.constant 1 : index
    %74 = memref.load %arg0[%c1_29] : memref<2xi32, #tpu.memory_space<smem>>
    %75 = vector.broadcast %74 : i32 to vector<16x1xi32>
    %76 = arith.select %73, %75, %65 : vector<16x1xi1>, vector<16x1xi32>
    %c8_i32_30 = arith.constant 8 : i32
    %77 = vector.broadcast %c8_i32_30 : i32 to vector<16x1xi32>
    %78 = arith.subi %55, %77 : vector<16x1xi32>
    %79 = arith.select %73, %78, %68 : vector<16x1xi1>, vector<16x1xi32>
    %80 = arith.cmpi sgt, %79, %76 : vector<16x1xi32>
    %81 = arith.cmpi eq, %79, %76 : vector<16x1xi32>
    %82 = vector.extract_strided_slice %3 {offsets = [5, 0], sizes = [1, 128], strides = [1, 1]} : vector<8x128xf32> to vector<1x128xf32>
    %83 = vector.shape_cast %80 : vector<16x1xi1> to vector<16x1xi1>
    %84 = vector.broadcast %83 : vector<16x1xi1> to vector<16x128xi1>
    %85 = vector.shape_cast %82 : vector<1x128xf32> to vector<1x128xf32>
    %86 = vector.broadcast %85 : vector<1x128xf32> to vector<16x128xf32>
    %87 = arith.select %84, %86, %54 : vector<16x128xi1>, vector<16x128xf32>
    %c0_31 = arith.constant 0 : index
    %c0_32 = arith.constant 0 : index
    %c0_33 = arith.constant 0 : index
    %88 = vector.load %arg6[%c0_31, %c0_32, %c0_33] : memref<2x16x128xf32, #tpu.memory_space<vmem>>, vector<1x16x128xf32>
    %89 = vector.shape_cast %88 : vector<1x16x128xf32> to vector<16x128xf32>
    %90 = vector.shape_cast %81 : vector<16x1xi1> to vector<16x1xi1>
    %91 = vector.broadcast %90 : vector<16x1xi1> to vector<16x128xi1>
    %92 = arith.select %91, %89, %87 : vector<16x128xi1>, vector<16x128xf32>
    %c1_34 = arith.constant 1 : index
    %c0_35 = arith.constant 0 : index
    %c0_36 = arith.constant 0 : index
    %93 = vector.load %arg6[%c1_34, %c0_35, %c0_36] : memref<2x16x128xf32, #tpu.memory_space<vmem>>, vector<1x16x128xf32>
    %94 = vector.shape_cast %93 : vector<1x16x128xf32> to vector<16x128xf32>
    %95 = arith.addf %92, %94 : vector<16x128xf32>
    %c0_37 = arith.constant 0 : index
    %c0_38 = arith.constant 0 : index
    %c0_39 = arith.constant 0 : index
    %96 = vector.load %arg11[%c0_37, %c0_38, %c0_39] : memref<3x8x512xf32, #tpu.memory_space<vmem>>, vector<1x8x512xf32>
    %97 = vector.shape_cast %96 : vector<1x8x512xf32> to vector<8x512xf32>
    %98 = arith.truncf %95 : vector<16x128xf32> to vector<16x128xbf16>
    %c0_40 = arith.constant 0 : index
    %c0_41 = arith.constant 0 : index
    %c0_42 = arith.constant 0 : index
    %99 = vector.load %arg7[%c0_40, %c0_41, %c0_42] : memref<3x128x384xbf16, #tpu.memory_space<vmem>>, vector<1x128x384xbf16>
    %100 = vector.shape_cast %99 : vector<1x128x384xbf16> to vector<128x384xbf16>
    %cst_43 = arith.constant dense<0.000000e+00> : vector<16x384xf32>
    %101 = tpu.matmul %98, %100, %cst_43 {dimension_numbers = #tpu.dot_dimension_numbers<[1], [0], [0], [1], [0, 0, 1, 1], [], []>} : vector<16x128xbf16>, vector<128x384xbf16>, vector<16x384xf32> -> vector<16x384xf32>
    %102 = vector.extract_strided_slice %97 {offsets = [0, 0], sizes = [1, 384], strides = [1, 1]} : vector<8x512xf32> to vector<1x384xf32>
    %103 = vector.broadcast %102 : vector<1x384xf32> to vector<16x384xf32>
    %104 = arith.addf %101, %103 : vector<16x384xf32>
    %105 = vector.extract_strided_slice %104 {offsets = [0, 0], sizes = [16, 128], strides = [1, 1]} : vector<16x384xf32> to vector<16x128xf32>
    %106 = vector.extract_strided_slice %104 {offsets = [0, 128], sizes = [16, 128], strides = [1, 1]} : vector<16x384xf32> to vector<16x128xf32>
    %107 = vector.extract_strided_slice %104 {offsets = [0, 256], sizes = [16, 128], strides = [1, 1]} : vector<16x384xf32> to vector<16x128xf32>
    %108 = tpu.concatenate %106, %106, %106, %106, %106, %106, %106, %106 in 0 : vector<16x128xf32>, vector<16x128xf32>, vector<16x128xf32>, vector<16x128xf32>, vector<16x128xf32>, vector<16x128xf32>, vector<16x128xf32>, vector<16x128xf32> -> vector<128x128xf32>
    %109 = arith.mulf %108, %0 : vector<128x128xf32>
    %110 = arith.truncf %109 : vector<128x128xf32> to vector<128x128xbf16>
    %111 = tpu.concatenate %107, %107, %107, %107, %107, %107, %107, %107 in 0 : vector<16x128xf32>, vector<16x128xf32>, vector<16x128xf32>, vector<16x128xf32>, vector<16x128xf32>, vector<16x128xf32>, vector<16x128xf32>, vector<16x128xf32> -> vector<128x128xf32>
    %112 = arith.mulf %111, %0 : vector<128x128xf32>
    %113 = arith.truncf %112 : vector<128x128xf32> to vector<128x128xbf16>
    %114 = arith.truncf %105 : vector<16x128xf32> to vector<16x128xbf16>
    %cst_44 = arith.constant dense<0.000000e+00> : vector<16x128xf32>
    %115 = tpu.matmul %114, %110, %cst_44 {dimension_numbers = #tpu.dot_dimension_numbers<[1], [1], [0], [0], [0, 0, 1, 0], [], []>} : vector<16x128xbf16>, vector<128x128xbf16>, vector<16x128xf32> -> vector<16x128xf32>
    %cst_45 = arith.constant 2.500000e-01 : f32
    %116 = vector.broadcast %cst_45 : f32 to vector<16x128xf32>
    %117 = arith.mulf %115, %116 : vector<16x128xf32>
    %118 = arith.addf %117, %2 : vector<16x128xf32>
    %cst_46 = arith.constant dense<0xFF800000> : vector<16xf32>
    %119 = vector.multi_reduction <maximumf>, %118, %cst_46 [1] : vector<16x128xf32> to vector<16xf32>
    %120 = vector.shape_cast %119 : vector<16xf32> to vector<16x1xf32>
    %121 = vector.broadcast %120 : vector<16x1xf32> to vector<16x128xf32>
    %122 = arith.subf %118, %121 : vector<16x128xf32>
    %123 = math.exp %122 : vector<16x128xf32>
    %124 = arith.truncf %123 : vector<16x128xf32> to vector<16x128xbf16>
    %cst_47 = arith.constant dense<0.000000e+00> : vector<16x128xf32>
    %125 = tpu.matmul %124, %113, %cst_47 {dimension_numbers = #tpu.dot_dimension_numbers<[1], [0], [0], [1], [0, 0, 1, 1], [], []>} : vector<16x128xbf16>, vector<128x128xbf16>, vector<16x128xf32> -> vector<16x128xf32>
    %cst_48 = arith.constant dense<0.000000e+00> : vector<16x128xf32>
    %126 = tpu.matmul %124, %1, %cst_48 {dimension_numbers = #tpu.dot_dimension_numbers<[1], [0], [0], [1], [0, 0, 1, 1], [], []>} : vector<16x128xbf16>, vector<128x128xbf16>, vector<16x128xf32> -> vector<16x128xf32>
    %cst_49 = arith.constant 9.99999968E-21 : f32
    %127 = vector.broadcast %cst_49 : f32 to vector<16x128xf32>
    %128 = arith.maximumf %126, %127 : vector<16x128xf32>
    %129 = tpu.reciprocal %128 {approx = true} : vector<16x128xf32> -> vector<16x128xf32>
    %130 = arith.mulf %125, %129 : vector<16x128xf32>
    %131 = arith.truncf %130 : vector<16x128xf32> to vector<16x128xbf16>
    %c0_50 = arith.constant 0 : index
    %c0_51 = arith.constant 0 : index
    %c0_52 = arith.constant 0 : index
    %132 = vector.load %arg8[%c0_50, %c0_51, %c0_52] : memref<3x128x128xbf16, #tpu.memory_space<vmem>>, vector<1x128x128xbf16>
    %133 = vector.shape_cast %132 : vector<1x128x128xbf16> to vector<128x128xbf16>
    %cst_53 = arith.constant dense<0.000000e+00> : vector<16x128xf32>
    %134 = tpu.matmul %131, %133, %cst_53 {dimension_numbers = #tpu.dot_dimension_numbers<[1], [0], [0], [1], [0, 0, 1, 1], [], []>} : vector<16x128xbf16>, vector<128x128xbf16>, vector<16x128xf32> -> vector<16x128xf32>
    %135 = vector.extract_strided_slice %97 {offsets = [1, 0], sizes = [1, 128], strides = [1, 1]} : vector<8x512xf32> to vector<1x128xf32>
    %136 = vector.broadcast %135 : vector<1x128xf32> to vector<16x128xf32>
    %137 = arith.addf %134, %136 : vector<16x128xf32>
    %138 = arith.addf %95, %137 : vector<16x128xf32>
    %139 = vector.extract_strided_slice %97 {offsets = [2, 0], sizes = [1, 128], strides = [1, 1]} : vector<8x512xf32> to vector<1x128xf32>
    %140 = vector.extract_strided_slice %97 {offsets = [3, 0], sizes = [1, 128], strides = [1, 1]} : vector<8x512xf32> to vector<1x128xf32>
    %cst_54 = arith.constant dense<0.000000e+00> : vector<16xf32>
    %141 = vector.multi_reduction <add>, %138, %cst_54 [1] : vector<16x128xf32> to vector<16xf32>
    %142 = vector.shape_cast %141 : vector<16xf32> to vector<16x1xf32>
    %cst_55 = arith.constant 1.280000e+02 : f32
    %143 = vector.broadcast %cst_55 : f32 to vector<16x1xf32>
    %144 = arith.divf %142, %143 : vector<16x1xf32>
    %145 = arith.mulf %138, %138 : vector<16x128xf32>
    %cst_56 = arith.constant dense<0.000000e+00> : vector<16xf32>
    %146 = vector.multi_reduction <add>, %145, %cst_56 [1] : vector<16x128xf32> to vector<16xf32>
    %147 = vector.shape_cast %146 : vector<16xf32> to vector<16x1xf32>
    %cst_57 = arith.constant 1.280000e+02 : f32
    %148 = vector.broadcast %cst_57 : f32 to vector<16x1xf32>
    %149 = arith.divf %147, %148 : vector<16x1xf32>
    %150 = arith.mulf %144, %144 : vector<16x1xf32>
    %151 = arith.subf %149, %150 : vector<16x1xf32>
    %cst_58 = arith.constant 0.000000e+00 : f32
    %152 = vector.broadcast %cst_58 : f32 to vector<16x1xf32>
    %153 = arith.maximumf %151, %152 : vector<16x1xf32>
    %154 = vector.broadcast %144 : vector<16x1xf32> to vector<16x128xf32>
    %155 = arith.subf %138, %154 : vector<16x128xf32>
    %cst_59 = arith.constant 9.99999974E-6 : f32
    %156 = vector.broadcast %cst_59 : f32 to vector<16x1xf32>
    %157 = arith.addf %153, %156 : vector<16x1xf32>
    %158 = math.rsqrt %157 : vector<16x1xf32>
    %159 = vector.broadcast %158 : vector<16x1xf32> to vector<16x128xf32>
    %160 = arith.mulf %155, %159 : vector<16x128xf32>
    %161 = vector.broadcast %139 : vector<1x128xf32> to vector<16x128xf32>
    %162 = arith.mulf %160, %161 : vector<16x128xf32>
    %163 = vector.broadcast %140 : vector<1x128xf32> to vector<16x128xf32>
    %164 = arith.addf %162, %163 : vector<16x128xf32>
    %165 = arith.truncf %164 : vector<16x128xf32> to vector<16x128xbf16>
    %c0_60 = arith.constant 0 : index
    %c0_61 = arith.constant 0 : index
    %c0_62 = arith.constant 0 : index
    %166 = vector.load %arg9[%c0_60, %c0_61, %c0_62] : memref<3x128x512xbf16, #tpu.memory_space<vmem>>, vector<1x128x512xbf16>
    %167 = vector.shape_cast %166 : vector<1x128x512xbf16> to vector<128x512xbf16>
    %cst_63 = arith.constant dense<0.000000e+00> : vector<16x512xf32>
    %168 = tpu.matmul %165, %167, %cst_63 {dimension_numbers = #tpu.dot_dimension_numbers<[1], [0], [0], [1], [0, 0, 1, 1], [], []>} : vector<16x128xbf16>, vector<128x512xbf16>, vector<16x512xf32> -> vector<16x512xf32>
    %169 = vector.extract_strided_slice %97 {offsets = [4, 0], sizes = [1, 512], strides = [1, 1]} : vector<8x512xf32> to vector<1x512xf32>
    %170 = vector.broadcast %169 : vector<1x512xf32> to vector<16x512xf32>
    %171 = arith.addf %168, %170 : vector<16x512xf32>
    %cst_64 = arith.constant 0.000000e+00 : f32
    %172 = vector.broadcast %cst_64 : f32 to vector<16x512xf32>
    %173 = arith.maximumf %171, %172 : vector<16x512xf32>
    %174 = arith.truncf %173 : vector<16x512xf32> to vector<16x512xbf16>
    %c0_65 = arith.constant 0 : index
    %c0_66 = arith.constant 0 : index
    %c0_67 = arith.constant 0 : index
    %175 = vector.load %arg10[%c0_65, %c0_66, %c0_67] : memref<3x512x128xbf16, #tpu.memory_space<vmem>>, vector<1x512x128xbf16>
    %176 = vector.shape_cast %175 : vector<1x512x128xbf16> to vector<512x128xbf16>
    %cst_68 = arith.constant dense<0.000000e+00> : vector<16x128xf32>
    %177 = tpu.matmul %174, %176, %cst_68 {dimension_numbers = #tpu.dot_dimension_numbers<[1], [0], [0], [1], [0, 0, 1, 1], [], []>} : vector<16x512xbf16>, vector<512x128xbf16>, vector<16x128xf32> -> vector<16x128xf32>
    %178 = vector.extract_strided_slice %97 {offsets = [5, 0], sizes = [1, 128], strides = [1, 1]} : vector<8x512xf32> to vector<1x128xf32>
    %179 = vector.broadcast %178 : vector<1x128xf32> to vector<16x128xf32>
    %180 = arith.addf %177, %179 : vector<16x128xf32>
    %181 = arith.addf %164, %180 : vector<16x128xf32>
    %182 = vector.extract_strided_slice %97 {offsets = [6, 0], sizes = [1, 128], strides = [1, 1]} : vector<8x512xf32> to vector<1x128xf32>
    %183 = vector.extract_strided_slice %97 {offsets = [7, 0], sizes = [1, 128], strides = [1, 1]} : vector<8x512xf32> to vector<1x128xf32>
    %cst_69 = arith.constant dense<0.000000e+00> : vector<16xf32>
    %184 = vector.multi_reduction <add>, %181, %cst_69 [1] : vector<16x128xf32> to vector<16xf32>
    %185 = vector.shape_cast %184 : vector<16xf32> to vector<16x1xf32>
    %cst_70 = arith.constant 1.280000e+02 : f32
    %186 = vector.broadcast %cst_70 : f32 to vector<16x1xf32>
    %187 = arith.divf %185, %186 : vector<16x1xf32>
    %188 = arith.mulf %181, %181 : vector<16x128xf32>
    %cst_71 = arith.constant dense<0.000000e+00> : vector<16xf32>
    %189 = vector.multi_reduction <add>, %188, %cst_71 [1] : vector<16x128xf32> to vector<16xf32>
    %190 = vector.shape_cast %189 : vector<16xf32> to vector<16x1xf32>
    %cst_72 = arith.constant 1.280000e+02 : f32
    %191 = vector.broadcast %cst_72 : f32 to vector<16x1xf32>
    %192 = arith.divf %190, %191 : vector<16x1xf32>
    %193 = arith.mulf %187, %187 : vector<16x1xf32>
    %194 = arith.subf %192, %193 : vector<16x1xf32>
    %cst_73 = arith.constant 0.000000e+00 : f32
    %195 = vector.broadcast %cst_73 : f32 to vector<16x1xf32>
    %196 = arith.maximumf %194, %195 : vector<16x1xf32>
    %197 = vector.broadcast %187 : vector<16x1xf32> to vector<16x128xf32>
    %198 = arith.subf %181, %197 : vector<16x128xf32>
    %cst_74 = arith.constant 9.99999974E-6 : f32
    %199 = vector.broadcast %cst_74 : f32 to vector<16x1xf32>
    %200 = arith.addf %196, %199 : vector<16x1xf32>
    %201 = math.rsqrt %200 : vector<16x1xf32>
    %202 = vector.broadcast %201 : vector<16x1xf32> to vector<16x128xf32>
    %203 = arith.mulf %198, %202 : vector<16x128xf32>
    %204 = vector.broadcast %182 : vector<1x128xf32> to vector<16x128xf32>
    %205 = arith.mulf %203, %204 : vector<16x128xf32>
    %206 = vector.broadcast %183 : vector<1x128xf32> to vector<16x128xf32>
    %207 = arith.addf %205, %206 : vector<16x128xf32>
    %c1_75 = arith.constant 1 : index
    %c0_76 = arith.constant 0 : index
    %c0_77 = arith.constant 0 : index
    %208 = vector.load %arg11[%c1_75, %c0_76, %c0_77] : memref<3x8x512xf32, #tpu.memory_space<vmem>>, vector<1x8x512xf32>
    %209 = vector.shape_cast %208 : vector<1x8x512xf32> to vector<8x512xf32>
    %210 = arith.truncf %207 : vector<16x128xf32> to vector<16x128xbf16>
    %c1_78 = arith.constant 1 : index
    %c0_79 = arith.constant 0 : index
    %c0_80 = arith.constant 0 : index
    %211 = vector.load %arg7[%c1_78, %c0_79, %c0_80] : memref<3x128x384xbf16, #tpu.memory_space<vmem>>, vector<1x128x384xbf16>
    %212 = vector.shape_cast %211 : vector<1x128x384xbf16> to vector<128x384xbf16>
    %cst_81 = arith.constant dense<0.000000e+00> : vector<16x384xf32>
    %213 = tpu.matmul %210, %212, %cst_81 {dimension_numbers = #tpu.dot_dimension_numbers<[1], [0], [0], [1], [0, 0, 1, 1], [], []>} : vector<16x128xbf16>, vector<128x384xbf16>, vector<16x384xf32> -> vector<16x384xf32>
    %214 = vector.extract_strided_slice %209 {offsets = [0, 0], sizes = [1, 384], strides = [1, 1]} : vector<8x512xf32> to vector<1x384xf32>
    %215 = vector.broadcast %214 : vector<1x384xf32> to vector<16x384xf32>
    %216 = arith.addf %213, %215 : vector<16x384xf32>
    %217 = vector.extract_strided_slice %216 {offsets = [0, 0], sizes = [16, 128], strides = [1, 1]} : vector<16x384xf32> to vector<16x128xf32>
    %218 = vector.extract_strided_slice %216 {offsets = [0, 128], sizes = [16, 128], strides = [1, 1]} : vector<16x384xf32> to vector<16x128xf32>
    %219 = vector.extract_strided_slice %216 {offsets = [0, 256], sizes = [16, 128], strides = [1, 1]} : vector<16x384xf32> to vector<16x128xf32>
    %220 = tpu.concatenate %218, %218, %218, %218, %218, %218, %218, %218 in 0 : vector<16x128xf32>, vector<16x128xf32>, vector<16x128xf32>, vector<16x128xf32>, vector<16x128xf32>, vector<16x128xf32>, vector<16x128xf32>, vector<16x128xf32> -> vector<128x128xf32>
    %221 = arith.mulf %220, %0 : vector<128x128xf32>
    %222 = arith.truncf %221 : vector<128x128xf32> to vector<128x128xbf16>
    %223 = tpu.concatenate %219, %219, %219, %219, %219, %219, %219, %219 in 0 : vector<16x128xf32>, vector<16x128xf32>, vector<16x128xf32>, vector<16x128xf32>, vector<16x128xf32>, vector<16x128xf32>, vector<16x128xf32>, vector<16x128xf32> -> vector<128x128xf32>
    %224 = arith.mulf %223, %0 : vector<128x128xf32>
    %225 = arith.truncf %224 : vector<128x128xf32> to vector<128x128xbf16>
    %226 = arith.truncf %217 : vector<16x128xf32> to vector<16x128xbf16>
    %cst_82 = arith.constant dense<0.000000e+00> : vector<16x128xf32>
    %227 = tpu.matmul %226, %222, %cst_82 {dimension_numbers = #tpu.dot_dimension_numbers<[1], [1], [0], [0], [0, 0, 1, 0], [], []>} : vector<16x128xbf16>, vector<128x128xbf16>, vector<16x128xf32> -> vector<16x128xf32>
    %cst_83 = arith.constant 2.500000e-01 : f32
    %228 = vector.broadcast %cst_83 : f32 to vector<16x128xf32>
    %229 = arith.mulf %227, %228 : vector<16x128xf32>
    %230 = arith.addf %229, %2 : vector<16x128xf32>
    %cst_84 = arith.constant dense<0xFF800000> : vector<16xf32>
    %231 = vector.multi_reduction <maximumf>, %230, %cst_84 [1] : vector<16x128xf32> to vector<16xf32>
    %232 = vector.shape_cast %231 : vector<16xf32> to vector<16x1xf32>
    %233 = vector.broadcast %232 : vector<16x1xf32> to vector<16x128xf32>
    %234 = arith.subf %230, %233 : vector<16x128xf32>
    %235 = math.exp %234 : vector<16x128xf32>
    %236 = arith.truncf %235 : vector<16x128xf32> to vector<16x128xbf16>
    %cst_85 = arith.constant dense<0.000000e+00> : vector<16x128xf32>
    %237 = tpu.matmul %236, %225, %cst_85 {dimension_numbers = #tpu.dot_dimension_numbers<[1], [0], [0], [1], [0, 0, 1, 1], [], []>} : vector<16x128xbf16>, vector<128x128xbf16>, vector<16x128xf32> -> vector<16x128xf32>
    %cst_86 = arith.constant dense<0.000000e+00> : vector<16x128xf32>
    %238 = tpu.matmul %236, %1, %cst_86 {dimension_numbers = #tpu.dot_dimension_numbers<[1], [0], [0], [1], [0, 0, 1, 1], [], []>} : vector<16x128xbf16>, vector<128x128xbf16>, vector<16x128xf32> -> vector<16x128xf32>
    %cst_87 = arith.constant 9.99999968E-21 : f32
    %239 = vector.broadcast %cst_87 : f32 to vector<16x128xf32>
    %240 = arith.maximumf %238, %239 : vector<16x128xf32>
    %241 = tpu.reciprocal %240 {approx = true} : vector<16x128xf32> -> vector<16x128xf32>
    %242 = arith.mulf %237, %241 : vector<16x128xf32>
    %243 = arith.truncf %242 : vector<16x128xf32> to vector<16x128xbf16>
    %c1_88 = arith.constant 1 : index
    %c0_89 = arith.constant 0 : index
    %c0_90 = arith.constant 0 : index
    %244 = vector.load %arg8[%c1_88, %c0_89, %c0_90] : memref<3x128x128xbf16, #tpu.memory_space<vmem>>, vector<1x128x128xbf16>
    %245 = vector.shape_cast %244 : vector<1x128x128xbf16> to vector<128x128xbf16>
    %cst_91 = arith.constant dense<0.000000e+00> : vector<16x128xf32>
    %246 = tpu.matmul %243, %245, %cst_91 {dimension_numbers = #tpu.dot_dimension_numbers<[1], [0], [0], [1], [0, 0, 1, 1], [], []>} : vector<16x128xbf16>, vector<128x128xbf16>, vector<16x128xf32> -> vector<16x128xf32>
    %247 = vector.extract_strided_slice %209 {offsets = [1, 0], sizes = [1, 128], strides = [1, 1]} : vector<8x512xf32> to vector<1x128xf32>
    %248 = vector.broadcast %247 : vector<1x128xf32> to vector<16x128xf32>
    %249 = arith.addf %246, %248 : vector<16x128xf32>
    %250 = arith.addf %207, %249 : vector<16x128xf32>
    %251 = vector.extract_strided_slice %209 {offsets = [2, 0], sizes = [1, 128], strides = [1, 1]} : vector<8x512xf32> to vector<1x128xf32>
    %252 = vector.extract_strided_slice %209 {offsets = [3, 0], sizes = [1, 128], strides = [1, 1]} : vector<8x512xf32> to vector<1x128xf32>
    %cst_92 = arith.constant dense<0.000000e+00> : vector<16xf32>
    %253 = vector.multi_reduction <add>, %250, %cst_92 [1] : vector<16x128xf32> to vector<16xf32>
    %254 = vector.shape_cast %253 : vector<16xf32> to vector<16x1xf32>
    %cst_93 = arith.constant 1.280000e+02 : f32
    %255 = vector.broadcast %cst_93 : f32 to vector<16x1xf32>
    %256 = arith.divf %254, %255 : vector<16x1xf32>
    %257 = arith.mulf %250, %250 : vector<16x128xf32>
    %cst_94 = arith.constant dense<0.000000e+00> : vector<16xf32>
    %258 = vector.multi_reduction <add>, %257, %cst_94 [1] : vector<16x128xf32> to vector<16xf32>
    %259 = vector.shape_cast %258 : vector<16xf32> to vector<16x1xf32>
    %cst_95 = arith.constant 1.280000e+02 : f32
    %260 = vector.broadcast %cst_95 : f32 to vector<16x1xf32>
    %261 = arith.divf %259, %260 : vector<16x1xf32>
    %262 = arith.mulf %256, %256 : vector<16x1xf32>
    %263 = arith.subf %261, %262 : vector<16x1xf32>
    %cst_96 = arith.constant 0.000000e+00 : f32
    %264 = vector.broadcast %cst_96 : f32 to vector<16x1xf32>
    %265 = arith.maximumf %263, %264 : vector<16x1xf32>
    %266 = vector.broadcast %256 : vector<16x1xf32> to vector<16x128xf32>
    %267 = arith.subf %250, %266 : vector<16x128xf32>
    %cst_97 = arith.constant 9.99999974E-6 : f32
    %268 = vector.broadcast %cst_97 : f32 to vector<16x1xf32>
    %269 = arith.addf %265, %268 : vector<16x1xf32>
    %270 = math.rsqrt %269 : vector<16x1xf32>
    %271 = vector.broadcast %270 : vector<16x1xf32> to vector<16x128xf32>
    %272 = arith.mulf %267, %271 : vector<16x128xf32>
    %273 = vector.broadcast %251 : vector<1x128xf32> to vector<16x128xf32>
    %274 = arith.mulf %272, %273 : vector<16x128xf32>
    %275 = vector.broadcast %252 : vector<1x128xf32> to vector<16x128xf32>
    %276 = arith.addf %274, %275 : vector<16x128xf32>
    %277 = arith.truncf %276 : vector<16x128xf32> to vector<16x128xbf16>
    %c1_98 = arith.constant 1 : index
    %c0_99 = arith.constant 0 : index
    %c0_100 = arith.constant 0 : index
    %278 = vector.load %arg9[%c1_98, %c0_99, %c0_100] : memref<3x128x512xbf16, #tpu.memory_space<vmem>>, vector<1x128x512xbf16>
    %279 = vector.shape_cast %278 : vector<1x128x512xbf16> to vector<128x512xbf16>
    %cst_101 = arith.constant dense<0.000000e+00> : vector<16x512xf32>
    %280 = tpu.matmul %277, %279, %cst_101 {dimension_numbers = #tpu.dot_dimension_numbers<[1], [0], [0], [1], [0, 0, 1, 1], [], []>} : vector<16x128xbf16>, vector<128x512xbf16>, vector<16x512xf32> -> vector<16x512xf32>
    %281 = vector.extract_strided_slice %209 {offsets = [4, 0], sizes = [1, 512], strides = [1, 1]} : vector<8x512xf32> to vector<1x512xf32>
    %282 = vector.broadcast %281 : vector<1x512xf32> to vector<16x512xf32>
    %283 = arith.addf %280, %282 : vector<16x512xf32>
    %cst_102 = arith.constant 0.000000e+00 : f32
    %284 = vector.broadcast %cst_102 : f32 to vector<16x512xf32>
    %285 = arith.maximumf %283, %284 : vector<16x512xf32>
    %286 = arith.truncf %285 : vector<16x512xf32> to vector<16x512xbf16>
    %c1_103 = arith.constant 1 : index
    %c0_104 = arith.constant 0 : index
    %c0_105 = arith.constant 0 : index
    %287 = vector.load %arg10[%c1_103, %c0_104, %c0_105] : memref<3x512x128xbf16, #tpu.memory_space<vmem>>, vector<1x512x128xbf16>
    %288 = vector.shape_cast %287 : vector<1x512x128xbf16> to vector<512x128xbf16>
    %cst_106 = arith.constant dense<0.000000e+00> : vector<16x128xf32>
    %289 = tpu.matmul %286, %288, %cst_106 {dimension_numbers = #tpu.dot_dimension_numbers<[1], [0], [0], [1], [0, 0, 1, 1], [], []>} : vector<16x512xbf16>, vector<512x128xbf16>, vector<16x128xf32> -> vector<16x128xf32>
    %290 = vector.extract_strided_slice %209 {offsets = [5, 0], sizes = [1, 128], strides = [1, 1]} : vector<8x512xf32> to vector<1x128xf32>
    %291 = vector.broadcast %290 : vector<1x128xf32> to vector<16x128xf32>
    %292 = arith.addf %289, %291 : vector<16x128xf32>
    %293 = arith.addf %276, %292 : vector<16x128xf32>
    %294 = vector.extract_strided_slice %209 {offsets = [6, 0], sizes = [1, 128], strides = [1, 1]} : vector<8x512xf32> to vector<1x128xf32>
    %295 = vector.extract_strided_slice %209 {offsets = [7, 0], sizes = [1, 128], strides = [1, 1]} : vector<8x512xf32> to vector<1x128xf32>
    %cst_107 = arith.constant dense<0.000000e+00> : vector<16xf32>
    %296 = vector.multi_reduction <add>, %293, %cst_107 [1] : vector<16x128xf32> to vector<16xf32>
    %297 = vector.shape_cast %296 : vector<16xf32> to vector<16x1xf32>
    %cst_108 = arith.constant 1.280000e+02 : f32
    %298 = vector.broadcast %cst_108 : f32 to vector<16x1xf32>
    %299 = arith.divf %297, %298 : vector<16x1xf32>
    %300 = arith.mulf %293, %293 : vector<16x128xf32>
    %cst_109 = arith.constant dense<0.000000e+00> : vector<16xf32>
    %301 = vector.multi_reduction <add>, %300, %cst_109 [1] : vector<16x128xf32> to vector<16xf32>
    %302 = vector.shape_cast %301 : vector<16xf32> to vector<16x1xf32>
    %cst_110 = arith.constant 1.280000e+02 : f32
    %303 = vector.broadcast %cst_110 : f32 to vector<16x1xf32>
    %304 = arith.divf %302, %303 : vector<16x1xf32>
    %305 = arith.mulf %299, %299 : vector<16x1xf32>
    %306 = arith.subf %304, %305 : vector<16x1xf32>
    %cst_111 = arith.constant 0.000000e+00 : f32
    %307 = vector.broadcast %cst_111 : f32 to vector<16x1xf32>
    %308 = arith.maximumf %306, %307 : vector<16x1xf32>
    %309 = vector.broadcast %299 : vector<16x1xf32> to vector<16x128xf32>
    %310 = arith.subf %293, %309 : vector<16x128xf32>
    %cst_112 = arith.constant 9.99999974E-6 : f32
    %311 = vector.broadcast %cst_112 : f32 to vector<16x1xf32>
    %312 = arith.addf %308, %311 : vector<16x1xf32>
    %313 = math.rsqrt %312 : vector<16x1xf32>
    %314 = vector.broadcast %313 : vector<16x1xf32> to vector<16x128xf32>
    %315 = arith.mulf %310, %314 : vector<16x128xf32>
    %316 = vector.broadcast %294 : vector<1x128xf32> to vector<16x128xf32>
    %317 = arith.mulf %315, %316 : vector<16x128xf32>
    %318 = vector.broadcast %295 : vector<1x128xf32> to vector<16x128xf32>
    %319 = arith.addf %317, %318 : vector<16x128xf32>
    %c2_113 = arith.constant 2 : index
    %c0_114 = arith.constant 0 : index
    %c0_115 = arith.constant 0 : index
    %320 = vector.load %arg11[%c2_113, %c0_114, %c0_115] : memref<3x8x512xf32, #tpu.memory_space<vmem>>, vector<1x8x512xf32>
    %321 = vector.shape_cast %320 : vector<1x8x512xf32> to vector<8x512xf32>
    %322 = arith.truncf %319 : vector<16x128xf32> to vector<16x128xbf16>
    %c2_116 = arith.constant 2 : index
    %c0_117 = arith.constant 0 : index
    %c0_118 = arith.constant 0 : index
    %323 = vector.load %arg7[%c2_116, %c0_117, %c0_118] : memref<3x128x384xbf16, #tpu.memory_space<vmem>>, vector<1x128x384xbf16>
    %324 = vector.shape_cast %323 : vector<1x128x384xbf16> to vector<128x384xbf16>
    %cst_119 = arith.constant dense<0.000000e+00> : vector<16x384xf32>
    %325 = tpu.matmul %322, %324, %cst_119 {dimension_numbers = #tpu.dot_dimension_numbers<[1], [0], [0], [1], [0, 0, 1, 1], [], []>} : vector<16x128xbf16>, vector<128x384xbf16>, vector<16x384xf32> -> vector<16x384xf32>
    %326 = vector.extract_strided_slice %321 {offsets = [0, 0], sizes = [1, 384], strides = [1, 1]} : vector<8x512xf32> to vector<1x384xf32>
    %327 = vector.broadcast %326 : vector<1x384xf32> to vector<16x384xf32>
    %328 = arith.addf %325, %327 : vector<16x384xf32>
    %329 = vector.extract_strided_slice %328 {offsets = [0, 0], sizes = [16, 128], strides = [1, 1]} : vector<16x384xf32> to vector<16x128xf32>
    %330 = vector.extract_strided_slice %328 {offsets = [0, 128], sizes = [16, 128], strides = [1, 1]} : vector<16x384xf32> to vector<16x128xf32>
    %331 = vector.extract_strided_slice %328 {offsets = [0, 256], sizes = [16, 128], strides = [1, 1]} : vector<16x384xf32> to vector<16x128xf32>
    %332 = tpu.concatenate %330, %330, %330, %330, %330, %330, %330, %330 in 0 : vector<16x128xf32>, vector<16x128xf32>, vector<16x128xf32>, vector<16x128xf32>, vector<16x128xf32>, vector<16x128xf32>, vector<16x128xf32>, vector<16x128xf32> -> vector<128x128xf32>
    %333 = arith.mulf %332, %0 : vector<128x128xf32>
    %334 = arith.truncf %333 : vector<128x128xf32> to vector<128x128xbf16>
    %335 = tpu.concatenate %331, %331, %331, %331, %331, %331, %331, %331 in 0 : vector<16x128xf32>, vector<16x128xf32>, vector<16x128xf32>, vector<16x128xf32>, vector<16x128xf32>, vector<16x128xf32>, vector<16x128xf32>, vector<16x128xf32> -> vector<128x128xf32>
    %336 = arith.mulf %335, %0 : vector<128x128xf32>
    %337 = arith.truncf %336 : vector<128x128xf32> to vector<128x128xbf16>
    %338 = arith.truncf %329 : vector<16x128xf32> to vector<16x128xbf16>
    %cst_120 = arith.constant dense<0.000000e+00> : vector<16x128xf32>
    %339 = tpu.matmul %338, %334, %cst_120 {dimension_numbers = #tpu.dot_dimension_numbers<[1], [1], [0], [0], [0, 0, 1, 0], [], []>} : vector<16x128xbf16>, vector<128x128xbf16>, vector<16x128xf32> -> vector<16x128xf32>
    %cst_121 = arith.constant 2.500000e-01 : f32
    %340 = vector.broadcast %cst_121 : f32 to vector<16x128xf32>
    %341 = arith.mulf %339, %340 : vector<16x128xf32>
    %342 = arith.addf %341, %2 : vector<16x128xf32>
    %cst_122 = arith.constant dense<0xFF800000> : vector<16xf32>
    %343 = vector.multi_reduction <maximumf>, %342, %cst_122 [1] : vector<16x128xf32> to vector<16xf32>
    %344 = vector.shape_cast %343 : vector<16xf32> to vector<16x1xf32>
    %345 = vector.broadcast %344 : vector<16x1xf32> to vector<16x128xf32>
    %346 = arith.subf %342, %345 : vector<16x128xf32>
    %347 = math.exp %346 : vector<16x128xf32>
    %348 = arith.truncf %347 : vector<16x128xf32> to vector<16x128xbf16>
    %cst_123 = arith.constant dense<0.000000e+00> : vector<16x128xf32>
    %349 = tpu.matmul %348, %337, %cst_123 {dimension_numbers = #tpu.dot_dimension_numbers<[1], [0], [0], [1], [0, 0, 1, 1], [], []>} : vector<16x128xbf16>, vector<128x128xbf16>, vector<16x128xf32> -> vector<16x128xf32>
    %cst_124 = arith.constant dense<0.000000e+00> : vector<16x128xf32>
    %350 = tpu.matmul %348, %1, %cst_124 {dimension_numbers = #tpu.dot_dimension_numbers<[1], [0], [0], [1], [0, 0, 1, 1], [], []>} : vector<16x128xbf16>, vector<128x128xbf16>, vector<16x128xf32> -> vector<16x128xf32>
    %cst_125 = arith.constant 9.99999968E-21 : f32
    %351 = vector.broadcast %cst_125 : f32 to vector<16x128xf32>
    %352 = arith.maximumf %350, %351 : vector<16x128xf32>
    %353 = tpu.reciprocal %352 {approx = true} : vector<16x128xf32> -> vector<16x128xf32>
    %354 = arith.mulf %349, %353 : vector<16x128xf32>
    %355 = arith.truncf %354 : vector<16x128xf32> to vector<16x128xbf16>
    %c2_126 = arith.constant 2 : index
    %c0_127 = arith.constant 0 : index
    %c0_128 = arith.constant 0 : index
    %356 = vector.load %arg8[%c2_126, %c0_127, %c0_128] : memref<3x128x128xbf16, #tpu.memory_space<vmem>>, vector<1x128x128xbf16>
    %357 = vector.shape_cast %356 : vector<1x128x128xbf16> to vector<128x128xbf16>
    %cst_129 = arith.constant dense<0.000000e+00> : vector<16x128xf32>
    %358 = tpu.matmul %355, %357, %cst_129 {dimension_numbers = #tpu.dot_dimension_numbers<[1], [0], [0], [1], [0, 0, 1, 1], [], []>} : vector<16x128xbf16>, vector<128x128xbf16>, vector<16x128xf32> -> vector<16x128xf32>
    %359 = vector.extract_strided_slice %321 {offsets = [1, 0], sizes = [1, 128], strides = [1, 1]} : vector<8x512xf32> to vector<1x128xf32>
    %360 = vector.broadcast %359 : vector<1x128xf32> to vector<16x128xf32>
    %361 = arith.addf %358, %360 : vector<16x128xf32>
    %362 = arith.addf %319, %361 : vector<16x128xf32>
    %363 = vector.extract_strided_slice %321 {offsets = [2, 0], sizes = [1, 128], strides = [1, 1]} : vector<8x512xf32> to vector<1x128xf32>
    %364 = vector.extract_strided_slice %321 {offsets = [3, 0], sizes = [1, 128], strides = [1, 1]} : vector<8x512xf32> to vector<1x128xf32>
    %cst_130 = arith.constant dense<0.000000e+00> : vector<16xf32>
    %365 = vector.multi_reduction <add>, %362, %cst_130 [1] : vector<16x128xf32> to vector<16xf32>
    %366 = vector.shape_cast %365 : vector<16xf32> to vector<16x1xf32>
    %cst_131 = arith.constant 1.280000e+02 : f32
    %367 = vector.broadcast %cst_131 : f32 to vector<16x1xf32>
    %368 = arith.divf %366, %367 : vector<16x1xf32>
    %369 = arith.mulf %362, %362 : vector<16x128xf32>
    %cst_132 = arith.constant dense<0.000000e+00> : vector<16xf32>
    %370 = vector.multi_reduction <add>, %369, %cst_132 [1] : vector<16x128xf32> to vector<16xf32>
    %371 = vector.shape_cast %370 : vector<16xf32> to vector<16x1xf32>
    %cst_133 = arith.constant 1.280000e+02 : f32
    %372 = vector.broadcast %cst_133 : f32 to vector<16x1xf32>
    %373 = arith.divf %371, %372 : vector<16x1xf32>
    %374 = arith.mulf %368, %368 : vector<16x1xf32>
    %375 = arith.subf %373, %374 : vector<16x1xf32>
    %cst_134 = arith.constant 0.000000e+00 : f32
    %376 = vector.broadcast %cst_134 : f32 to vector<16x1xf32>
    %377 = arith.maximumf %375, %376 : vector<16x1xf32>
    %378 = vector.broadcast %368 : vector<16x1xf32> to vector<16x128xf32>
    %379 = arith.subf %362, %378 : vector<16x128xf32>
    %cst_135 = arith.constant 9.99999974E-6 : f32
    %380 = vector.broadcast %cst_135 : f32 to vector<16x1xf32>
    %381 = arith.addf %377, %380 : vector<16x1xf32>
    %382 = math.rsqrt %381 : vector<16x1xf32>
    %383 = vector.broadcast %382 : vector<16x1xf32> to vector<16x128xf32>
    %384 = arith.mulf %379, %383 : vector<16x128xf32>
    %385 = vector.broadcast %363 : vector<1x128xf32> to vector<16x128xf32>
    %386 = arith.mulf %384, %385 : vector<16x128xf32>
    %387 = vector.broadcast %364 : vector<1x128xf32> to vector<16x128xf32>
    %388 = arith.addf %386, %387 : vector<16x128xf32>
    %389 = arith.truncf %388 : vector<16x128xf32> to vector<16x128xbf16>
    %c2_136 = arith.constant 2 : index
    %c0_137 = arith.constant 0 : index
    %c0_138 = arith.constant 0 : index
    %390 = vector.load %arg9[%c2_136, %c0_137, %c0_138] : memref<3x128x512xbf16, #tpu.memory_space<vmem>>, vector<1x128x512xbf16>
    %391 = vector.shape_cast %390 : vector<1x128x512xbf16> to vector<128x512xbf16>
    %cst_139 = arith.constant dense<0.000000e+00> : vector<16x512xf32>
    %392 = tpu.matmul %389, %391, %cst_139 {dimension_numbers = #tpu.dot_dimension_numbers<[1], [0], [0], [1], [0, 0, 1, 1], [], []>} : vector<16x128xbf16>, vector<128x512xbf16>, vector<16x512xf32> -> vector<16x512xf32>
    %393 = vector.extract_strided_slice %321 {offsets = [4, 0], sizes = [1, 512], strides = [1, 1]} : vector<8x512xf32> to vector<1x512xf32>
    %394 = vector.broadcast %393 : vector<1x512xf32> to vector<16x512xf32>
    %395 = arith.addf %392, %394 : vector<16x512xf32>
    %cst_140 = arith.constant 0.000000e+00 : f32
    %396 = vector.broadcast %cst_140 : f32 to vector<16x512xf32>
    %397 = arith.maximumf %395, %396 : vector<16x512xf32>
    %398 = arith.truncf %397 : vector<16x512xf32> to vector<16x512xbf16>
    %c2_141 = arith.constant 2 : index
    %c0_142 = arith.constant 0 : index
    %c0_143 = arith.constant 0 : index
    %399 = vector.load %arg10[%c2_141, %c0_142, %c0_143] : memref<3x512x128xbf16, #tpu.memory_space<vmem>>, vector<1x512x128xbf16>
    %400 = vector.shape_cast %399 : vector<1x512x128xbf16> to vector<512x128xbf16>
    %cst_144 = arith.constant dense<0.000000e+00> : vector<16x128xf32>
    %401 = tpu.matmul %398, %400, %cst_144 {dimension_numbers = #tpu.dot_dimension_numbers<[1], [0], [0], [1], [0, 0, 1, 1], [], []>} : vector<16x512xbf16>, vector<512x128xbf16>, vector<16x128xf32> -> vector<16x128xf32>
    %402 = vector.extract_strided_slice %321 {offsets = [5, 0], sizes = [1, 128], strides = [1, 1]} : vector<8x512xf32> to vector<1x128xf32>
    %403 = vector.broadcast %402 : vector<1x128xf32> to vector<16x128xf32>
    %404 = arith.addf %401, %403 : vector<16x128xf32>
    %405 = arith.addf %388, %404 : vector<16x128xf32>
    %406 = vector.extract_strided_slice %321 {offsets = [6, 0], sizes = [1, 128], strides = [1, 1]} : vector<8x512xf32> to vector<1x128xf32>
    %407 = vector.extract_strided_slice %321 {offsets = [7, 0], sizes = [1, 128], strides = [1, 1]} : vector<8x512xf32> to vector<1x128xf32>
    %cst_145 = arith.constant dense<0.000000e+00> : vector<16xf32>
    %408 = vector.multi_reduction <add>, %405, %cst_145 [1] : vector<16x128xf32> to vector<16xf32>
    %409 = vector.shape_cast %408 : vector<16xf32> to vector<16x1xf32>
    %cst_146 = arith.constant 1.280000e+02 : f32
    %410 = vector.broadcast %cst_146 : f32 to vector<16x1xf32>
    %411 = arith.divf %409, %410 : vector<16x1xf32>
    %412 = arith.mulf %405, %405 : vector<16x128xf32>
    %cst_147 = arith.constant dense<0.000000e+00> : vector<16xf32>
    %413 = vector.multi_reduction <add>, %412, %cst_147 [1] : vector<16x128xf32> to vector<16xf32>
    %414 = vector.shape_cast %413 : vector<16xf32> to vector<16x1xf32>
    %cst_148 = arith.constant 1.280000e+02 : f32
    %415 = vector.broadcast %cst_148 : f32 to vector<16x1xf32>
    %416 = arith.divf %414, %415 : vector<16x1xf32>
    %417 = arith.mulf %411, %411 : vector<16x1xf32>
    %418 = arith.subf %416, %417 : vector<16x1xf32>
    %cst_149 = arith.constant 0.000000e+00 : f32
    %419 = vector.broadcast %cst_149 : f32 to vector<16x1xf32>
    %420 = arith.maximumf %418, %419 : vector<16x1xf32>
    %421 = vector.broadcast %411 : vector<16x1xf32> to vector<16x128xf32>
    %422 = arith.subf %405, %421 : vector<16x128xf32>
    %cst_150 = arith.constant 9.99999974E-6 : f32
    %423 = vector.broadcast %cst_150 : f32 to vector<16x1xf32>
    %424 = arith.addf %420, %423 : vector<16x1xf32>
    %425 = math.rsqrt %424 : vector<16x1xf32>
    %426 = vector.broadcast %425 : vector<16x1xf32> to vector<16x128xf32>
    %427 = arith.mulf %422, %426 : vector<16x128xf32>
    %428 = vector.broadcast %406 : vector<1x128xf32> to vector<16x128xf32>
    %429 = arith.mulf %427, %428 : vector<16x128xf32>
    %430 = vector.broadcast %407 : vector<1x128xf32> to vector<16x128xf32>
    %431 = arith.addf %429, %430 : vector<16x128xf32>
    %cst_151 = arith.constant 0.000000e+00 : f32
    %432 = vector.shape_cast %81 : vector<16x1xi1> to vector<16x1xi1>
    %433 = vector.broadcast %432 : vector<16x1xi1> to vector<16x128xi1>
    %434 = vector.broadcast %cst_151 : f32 to vector<16x128xf32>
    %435 = arith.select %433, %431, %434 : vector<16x128xi1>, vector<16x128xf32>
    %436 = vector.shape_cast %435 : vector<16x128xf32> to vector<2x8x128xf32>
    %cst_152 = arith.constant dense<0.000000e+00> : vector<2x128xf32>
    %437 = vector.multi_reduction <add>, %436, %cst_152 [1] : vector<2x8x128xf32> to vector<2x128xf32>
    %438 = arith.truncf %437 : vector<2x128xf32> to vector<2x128xbf16>
    %c0_153 = arith.constant 0 : index
    %c0_154 = arith.constant 0 : index
    %439 = vector.load %arg12[%c0_153, %c0_154] : memref<128x128xbf16, #tpu.memory_space<vmem>>, vector<128x128xbf16>
    %cst_155 = arith.constant dense<0.000000e+00> : vector<2x128xf32>
    %440 = tpu.matmul %438, %439, %cst_155 {dimension_numbers = #tpu.dot_dimension_numbers<[1], [0], [0], [1], [0, 0, 1, 1], [], []>} : vector<2x128xbf16>, vector<128x128xbf16>, vector<2x128xf32> -> vector<2x128xf32>
    %c0_156 = arith.constant 0 : index
    %c0_157 = arith.constant 0 : index
    %441 = vector.load %arg13[%c0_156, %c0_157] : memref<1x128xf32, #tpu.memory_space<vmem>>, vector<1x128xf32>
    %442 = vector.broadcast %441 : vector<1x128xf32> to vector<2x128xf32>
    %443 = arith.addf %440, %442 : vector<2x128xf32>
    %c0_158 = arith.constant 0 : index
    %c0_159 = arith.constant 0 : index
    %444 = vector.load %arg14[%c0_158, %c0_159] : memref<2x128xf32, #tpu.memory_space<vmem>>, vector<2x128xf32>
    tpu.vector_store %arg14[%c0_158, %c0_159], %443 {strides = array<i32>} : memref<2x128xf32, #tpu.memory_space<vmem>>, vector<2x128xf32>,
    return
  }
}

</mosaic_0001>

<bundles_post_ra>
// kernel: counter_forward.1
= control target key start
LH: loop header
LB: loop body
LE: loop exit
PB: predicated region body
PF: predicated region fallthrough
CT: control target
= control target key end

     0   :  { %19 = vsyncpa [#allocation5], 0  ;;  %s7445_s0 = inlined_call_operand.vmem [shape: s32[2], index: 0, kind: input, shape index: {}]   ;;  %s7446_s1 = inlined_call_operand.vmem [shape: bf16[16,128], index: 1, kind: input, shape index: {}]   ;;  %s7447_s2 = inlined_call_operand.vmem [shape: f32[16,128], index: 2, kind: input, shape index: {}]   ;;  %s7448_s3 = inlined_call_operand.hbm [shape: f32[128,128], index: 3, kind: input, shape index: {}]   ;;  %s7449_s4 = inlined_call_operand.hbm [shape: bf16[3,128,128], index: 4, kind: input, shape index: {}]   ;;  %s7450_s5 = inlined_call_operand.vmem [shape: f32[8,128], index: 5, kind: input, shape index: {}]   ;;  %s7451_s6 = inlined_call_operand.vmem [shape: f32[2,16,128], index: 6, kind: input, shape index: {}]   ;;  %s7452_s7 = inlined_call_operand.hbm [shape: bf16[3,128,384], index: 7, kind: input, shape index: {}]   ;;  %s7453_s8 = inlined_call_operand.hbm [shape: bf16[3,128,128], index: 8, kind: input, shape index: {}]   ;;  %s7454_s9 = inlined_call_operand.hbm [shape: bf16[3,128,512], index: 9, kind: input, shape index: {}]   ;;  %s7455_s10 = inlined_call_operand.hbm [shape: bf16[3,512,128], index: 10, kind: input, shape index: {}]   ;;  %s7456_s11 = inlined_call_operand.hbm [shape: f32[3,8,512], index: 11, kind: input, shape index: {}]   ;;  %s7457_s12 = inlined_call_operand.hbm [shape: bf16[128,128], index: 12, kind: input, shape index: {}]   ;;  %s7458_s13 = inlined_call_operand.hbm [shape: f32[1,128], index: 13, kind: input, shape index: {}]   ;;  %s7459_s14 = inlined_call_operand.hbm [shape: f32[2,128], index: 14, kind: output, shape index: {}]  }
   0x1   :  { %20 = vsyncpa [#allocation3], 0 }
   0x2   :  { %21 = vsyncpa [#allocation8], 0 }
   0x3   :  { %22 = vsyncpa [#allocation11], 0 }
   0x4   :  { %23 = vsyncpa [#allocation14], 0 }
   0x5   :  { %24 = vsyncpa [#allocation17], 0 }
   0x6   :  { %25 = vsyncpa [#allocation4], 0  ;;  %s6466_s29 = smov [#allocation7]   ;;  %s6220_s17 = scalar_lea.hbm %s7449_s4, 3072 }
   0x7   :  { %s57_s30 = sshll.u32 %s6466_s29, 4  ;;  %p6221_p0 = scmp.ne.s32.totalorder %s7449_s4, %s6220_s17  ;;  %s58_s30 = int_to_ptr.vmem [resolvable:$true] %s57_s30 }
   0x8   :  { %p6224_p1 = scmp.lt.u32.totalorder %s6220_s17, %s7449_s4 }
   0xa   :  { %p6226_p2 = pnand %p6224_p1, %p6221_p0 }
   0xc   :  { %6229 = shalt.err (!%p6226_p2)
}
   0xd   :  { %s6230_s22 = scalar_lea.vmem %s58_s30, 3072  ;;  %p6235_p4 = scmp.lt.s32.totalorder %s58_s30, %s58_s30 }
   0xe   :  { %p6231_p3 = scmp.ne.s32.totalorder %s58_s30, %s6230_s22  ;;  %p6236_p5 = scmp.lt.s32.totalorder %s6230_s22, %s6230_s22 }
  0x10   :  { %p6237_p6 = por %p6236_p5, %p6235_p4 }
  0x12   :  { %p6238_p7 = pnand %p6237_p6, %p6231_p3 }
  0x14   :  { %6241 = shalt.err (!%p6238_p7)
}
  0x15   :  { %s6467_s23 = smov 64   ;;  %s6468_s24 = smov 4  }
  0x16   :  { %63 = dma.hbm_to_vmem [thread:$0]  %s7449_s4, 3072, %s58_s30, [#allocation8], %s6467_s23, %s6467_s23, %s6468_s24  }
  0x17   :  { %s6469_s27 = smov [#allocation10]   ;;  %s6470_s29 = smov [#allocation13]  }
  0x18   :  { %s85_s28 = sshll.u32 %s6469_s27, 4  ;;  %s109_s15 = sshll.u32 %s6470_s29, 4  ;;  %s86_s28 = int_to_ptr.vmem [resolvable:$true] %s85_s28  ;;  %s110_s15 = int_to_ptr.vmem [resolvable:$true] %s109_s15 }
  0x19   :  { %s6242_s18 = scalar_lea.hbm %s7453_s8, 3072 }
  0x1a   :  { %p6243_p8 = scmp.ne.s32.totalorder %s7453_s8, %s6242_s18  ;;  %p6246_p9 = scmp.lt.u32.totalorder %s6242_s18, %s7453_s8 }
  0x1c   :  { %p6248_p10 = pnand %p6246_p9, %p6243_p8 }
  0x1e   :  { %6251 = shalt.err (!%p6248_p10)
}
  0x1f   :  { %s6252_s4 = scalar_lea.vmem %s86_s28, 3072  ;;  %p6257_p12 = scmp.lt.s32.totalorder %s86_s28, %s86_s28 }
  0x20   :  { %p6253_p11 = scmp.ne.s32.totalorder %s86_s28, %s6252_s4  ;;  %p6258_p13 = scmp.lt.s32.totalorder %s6252_s4, %s6252_s4 }
  0x22   :  { %p6259_p0 = por %p6258_p13, %p6257_p12 }
  0x24   :  { %p6260_p1 = pnand %p6259_p0, %p6253_p11 }
  0x26   :  { %6263 = shalt.err (!%p6260_p1)
}
  0x27   :  { %91 = dma.hbm_to_vmem [thread:$0]  %s7453_s8, 3072, %s86_s28, [#allocation11], %s6467_s23, %s6467_s23, %s6468_s24  }
  0x28   :  { %s6264_s29 = scalar_lea.hbm %s7455_s10, 12288 }
  0x29   :  { %p6265_p2 = scmp.ne.s32.totalorder %s7455_s10, %s6264_s29  ;;  %p6268_p3 = scmp.lt.u32.totalorder %s6264_s29, %s7455_s10 }
  0x2b   :  { %p6270_p4 = pnand %p6268_p3, %p6265_p2 }
  0x2d   :  { %6273 = shalt.err (!%p6270_p4)
}
  0x2e   :  { %s6274_s20 = scalar_lea.vmem %s110_s15, 12288  ;;  %p6279_p6 = scmp.lt.s32.totalorder %s110_s15, %s110_s15 }
  0x2f   :  { %p6275_p5 = scmp.ne.s32.totalorder %s110_s15, %s6274_s20  ;;  %p6280_p7 = scmp.lt.s32.totalorder %s6274_s20, %s6274_s20 }
  0x31   :  { %p6281_p8 = por %p6280_p7, %p6279_p6 }
  0x33   :  { %p6282_p9 = pnand %p6281_p8, %p6275_p5 }
  0x35   :  { %6285 = shalt.err (!%p6282_p9)
}
  0x36   :  { %115 = dma.hbm_to_vmem [thread:$0]  %s7455_s10, 12288, %s110_s15, [#allocation14], %s6467_s23, %s6467_s23, %s6468_s24  }
  0x37   :  { %s6471_s21 = smov [#allocation16]   ;;  %s32_s25 = sshll.u32 %s7445_s0, 4  ;;  %s33_s25 = int_to_ptr.vmem [resolvable:$true] %s32_s25 }
  0x38   :  { %s133_s22 = sshll.u32 %s6471_s21, 4  ;;  %s6286_s29 = scalar_lea.hbm %s7457_s12, 1024  ;;  %s134_s22 = int_to_ptr.vmem [resolvable:$true] %s133_s22 }
  0x39   :  { %p6287_p10 = scmp.ne.s32.totalorder %s7457_s12, %s6286_s29  ;;  %p6290_p11 = scmp.lt.u32.totalorder %s6286_s29, %s7457_s12 }
  0x3b   :  { %p6292_p12 = pnand %p6290_p11, %p6287_p10 }
  0x3d   :  { %6295 = shalt.err (!%p6292_p12)
}
  0x3e   :  { %s6296_s10 = scalar_lea.vmem %s134_s22, 1024  ;;  %p6301_p0 = scmp.lt.s32.totalorder %s134_s22, %s134_s22 }
  0x3f   :  { %p6297_p13 = scmp.ne.s32.totalorder %s134_s22, %s6296_s10  ;;  %p6302_p1 = scmp.lt.s32.totalorder %s6296_s10, %s6296_s10 }
  0x41   :  { %p6303_p2 = por %p6302_p1, %p6301_p0 }
  0x43   :  { %p6304_p3 = pnand %p6303_p2, %p6297_p13 }
  0x45   :  { %6307 = shalt.err (!%p6304_p3)
}
  0x46   :  { %139 = dma.hbm_to_vmem [thread:$0]  %s7457_s12, 1024, %s134_s22, [#allocation17], %s6467_s23, %s6467_s23, %s6468_s24  }
  0x47   :  { %s6308_s20 = scalar_lea.vmem %s33_s25, 16  ;;  %p6313_p5 = scmp.lt.s32.totalorder %s33_s25, %s33_s25 }
  0x48   :  { %p6309_p4 = scmp.ne.s32.totalorder %s33_s25, %s6308_s20  ;;  %p6314_p6 = scmp.lt.s32.totalorder %s6308_s20, %s6308_s20 }
  0x4a   :  { %p6315_p7 = por %p6314_p6, %p6313_p5 }
  0x4c   :  { %p6316_p8 = pnand %p6315_p7, %p6309_p4 }
  0x4e   :  { %6319 = shalt.err (!%p6316_p8)
}
  0x4f   :  { %s6472_s8 = smov [#allocation2]   ;;  %s6473_s28 = smov [#allocation6]  }
  0x50   :  { %35 = dma.vmem_to_smem %s33_s25, 16, %s6472_s8, [#allocation5]  }
  0x51   :  { %s45_s21 = sshll.u32 %s6473_s28, 4  ;;  %s6320_s26 = scalar_lea.hbm %s7448_s3, 2048  ;;  %s46_s21 = int_to_ptr.vmem [resolvable:$true] %s45_s21 }
  0x52   :  { %p6321_p9 = scmp.ne.s32.totalorder %s7448_s3, %s6320_s26  ;;  %p6324_p10 = scmp.lt.u32.totalorder %s6320_s26, %s7448_s3 }
  0x54   :  { %p6326_p11 = pnand %p6324_p10, %p6321_p9 }
  0x56   :  { %6329 = shalt.err (!%p6326_p11)
}
  0x57   :  { %s6330_s24 = scalar_lea.vmem %s46_s21, 2048  ;;  %p6335_p13 = scmp.lt.s32.totalorder %s46_s21, %s46_s21 }
  0x58   :  { %p6331_p12 = scmp.ne.s32.totalorder %s46_s21, %s6330_s24  ;;  %p6336_p0 = scmp.lt.s32.totalorder %s6330_s24, %s6330_s24 }
  0x5a   :  { %p6337_p1 = por %p6336_p0, %p6335_p13 }
  0x5c   :  { %p6338_p2 = pnand %p6337_p1, %p6331_p12 }
  0x5e   :  { %6341 = shalt.err (!%p6338_p2)
}
  0x5f   :  { %s6474_s22 = smov 128   ;;  %s6475_s25 = smov 8  }
  0x60   :  { %51 = dma.hbm_to_vmem [thread:$0]  %s7448_s3, 2048, %s46_s21, [#allocation3], %s6474_s22, %s6474_s22, %s6475_s25  }
  0x61   :  { %s6476_s18 = smov [#allocation9]   ;;  %s6342_s15 = scalar_lea.hbm %s7452_s7, 9216 }
  0x62   :  { %s73_s19 = sshll.u32 %s6476_s18, 4  ;;  %p6343_p3 = scmp.ne.s32.totalorder %s7452_s7, %s6342_s15  ;;  %s74_s19 = int_to_ptr.vmem [resolvable:$true] %s73_s19 }
  0x63   :  { %p6346_p4 = scmp.lt.u32.totalorder %s6342_s15, %s7452_s7 }
  0x65   :  { %p6348_p5 = pnand %p6346_p4, %p6343_p3 }
  0x67   :  { %6351 = shalt.err (!%p6348_p5)
}
  0x68   :  { %s6352_s30 = scalar_lea.vmem %s74_s19, 9216  ;;  %p6357_p7 = scmp.lt.s32.totalorder %s74_s19, %s74_s19 }
  0x69   :  { %p6353_p6 = scmp.ne.s32.totalorder %s74_s19, %s6352_s30  ;;  %p6358_p8 = scmp.lt.s32.totalorder %s6352_s30, %s6352_s30 }
  0x6b   :  { %p6359_p9 = por %p6358_p8, %p6357_p7 }
  0x6d   :  { %p6360_p10 = pnand %p6359_p9, %p6353_p6 }
  0x6f   :  { %6363 = shalt.err (!%p6360_p10)
}
  0x70   :  { %s6477_s3 = smov 192   ;;  %s6478_s21 = smov 12  }
  0x71   :  { %79 = dma.hbm_to_vmem [thread:$0]  %s7452_s7, 9216, %s74_s19, [#allocation8], %s6477_s3, %s6477_s3, %s6478_s21  }
  0x72   :  { %s6479_s29 = smov [#allocation12]   ;;  %s6364_s22 = scalar_lea.hbm %s7454_s9, 12288 }
  0x73   :  { %s97_s12 = sshll.u32 %s6479_s29, 4  ;;  %p6365_p11 = scmp.ne.s32.totalorder %s7454_s9, %s6364_s22  ;;  %s98_s12 = int_to_ptr.vmem [resolvable:$true] %s97_s12 }
  0x74   :  { %p6368_p12 = scmp.lt.u32.totalorder %s6364_s22, %s7454_s9 }
  0x76   :  { %p6370_p13 = pnand %p6368_p12, %p6365_p11 }
  0x78   :  { %6373 = shalt.err (!%p6370_p13)
}
  0x79   :  { %s6374_s10 = scalar_lea.vmem %s98_s12, 12288  ;;  %p6379_p1 = scmp.lt.s32.totalorder %s98_s12, %s98_s12 }
  0x7a   :  { %p6375_p0 = scmp.ne.s32.totalorder %s98_s12, %s6374_s10  ;;  %p6380_p2 = scmp.lt.s32.totalorder %s6374_s10, %s6374_s10 }
  0x7c   :  { %p6381_p3 = por %p6380_p2, %p6379_p1 }
  0x7e   :  { %p6382_p4 = pnand %p6381_p3, %p6375_p0 }
  0x80   :  { %6385 = shalt.err (!%p6382_p4)
}
  0x81   :  { %s6480_s7 = smov 256   ;;  %s6481_s19 = smov 16  }
  0x82   :  { %103 = dma.hbm_to_vmem [thread:$0]  %s7454_s9, 12288, %s98_s12, [#allocation11], %s6480_s7, %s6480_s7, %s6481_s19  }
  0x83   :  { %s6482_s20 = smov [#allocation15]   ;;  %s6386_s30 = scalar_lea.hbm %s7456_s11, 1536 }
  0x84   :  { %s121_s8 = sshll.u32 %s6482_s20, 4  ;;  %p6387_p5 = scmp.ne.s32.totalorder %s7456_s11, %s6386_s30  ;;  %s122_s8 = int_to_ptr.vmem [resolvable:$true] %s121_s8 }
  0x85   :  { %p6390_p6 = scmp.lt.u32.totalorder %s6386_s30, %s7456_s11 }
  0x87   :  { %p6392_p7 = pnand %p6390_p6, %p6387_p5 }
  0x89   :  { %6395 = shalt.err (!%p6392_p7)
}
  0x8a   :  { %s6396_s29 = scalar_lea.vmem %s122_s8, 1536  ;;  %p6401_p9 = scmp.lt.s32.totalorder %s122_s8, %s122_s8 }
  0x8b   :  { %p6397_p8 = scmp.ne.s32.totalorder %s122_s8, %s6396_s29  ;;  %p6402_p10 = scmp.lt.s32.totalorder %s6396_s29, %s6396_s29 }
  0x8d   :  { %p6403_p11 = por %p6402_p10, %p6401_p9 }
  0x8f   :  { %p6404_p12 = pnand %p6403_p11, %p6397_p8 }
  0x91   :  { %6407 = shalt.err (!%p6404_p12)
}
  0x92   :  { %s6483_s9 = smov 512   ;;  %s6484_s12 = smov 32  }
  0x93   :  { %127 = dma.hbm_to_vmem [thread:$0]  %s7456_s11, 1536, %s122_s8, [#allocation14], %s6483_s9, %s6483_s9, %s6484_s12  }
  0x94   :  { %s6485_s22 = smov [#allocation18]   ;;  %s6408_s18 = scalar_lea.hbm %s7458_s13, 16 }
  0x95   :  { %s146_s25 = sshll.u32 %s6485_s22, 4  ;;  %p6409_p13 = scmp.ne.s32.totalorder %s7458_s13, %s6408_s18  ;;  %s147_s25 = int_to_ptr.vmem [resolvable:$true] %s146_s25 }
  0x96   :  { %p6412_p0 = scmp.lt.u32.totalorder %s6408_s18, %s7458_s13 }
  0x98   :  { %p6414_p1 = pnand %p6412_p0, %p6409_p13 }
  0x9a   :  { %6417 = shalt.err (!%p6414_p1)
}
  0x9b   :  { %s6418_s15 = scalar_lea.vmem %s147_s25, 16  ;;  %s6422_s11 = scalar_lea.vmem %s147_s25, 32 }
  0x9c   :  { %p6419_p2 = scmp.ne.s32.totalorder %s147_s25, %s6418_s15  ;;  %p6423_p3 = scmp.lt.s32.totalorder %s147_s25, %s147_s25 }
  0x9d   :  { %p6424_p4 = scmp.lt.s32.totalorder %s6422_s11, %s6418_s15 }
  0x9f   :  { %p6425_p5 = por %p6424_p4, %p6423_p3 }
  0xa1   :  { %p6426_p6 = pnand %p6425_p5, %p6419_p2 }
  0xa3   :  { %6429 = shalt.err (!%p6426_p6)
}
  0xa4   :  { %149 = dma.hbm_to_vmem [thread:$0]  %s7458_s13, 16, %s147_s25, [#allocation17]  }
  0xa5   :  { %6452 = dma.done.wait [#allocation5], 16  }
  0xa6   :  { %6453 = vsyncadd [#allocation5], 4294967280 }
  0xa7   :  { %6454 = dma.done.wait [#allocation3], 2048  }
  0xa8   :  { %6455 = vsyncadd [#allocation3], 4294965248 }
  0xa9   :  { %6456 = dma.done.wait [#allocation8], 12288  }
  0xaa   :  { %6457 = vsyncadd [#allocation8], 4294955008 }
  0xab   :  { %6458 = dma.done.wait [#allocation11], 15360  }
  0xac   :  { %6459 = vsyncadd [#allocation11], 4294951936 }
  0xad   :  { %6460 = dma.done.wait [#allocation14], 13824  }
  0xae   :  { %6461 = vsyncadd [#allocation14], 4294953472 }
  0xaf   :  { %6462 = dma.done.wait [#allocation17], 1040  }
  0xb0   :  { %6463 = vsyncadd [#allocation17], 4294966256 }
  0xb1   :  { %180 = sfence }
  0xb2   :  { %v5738_v0 = vld [vmem:[#allocation7] sm:$0xff]   ;;  %v6486_v1 = vmov 0.0   ;;  %v5739_v2 = vld [vmem:[#allocation7 + $0x8] sm:$0xff]   ;;  %vm6487_vm0 = vmmov 0   ;;  %v5740_v3 = vld [vmem:[#allocation7 + $0x10] sm:$0xff]   ;;  %v227_v24 = vlaneseq  ;;  %s4730_s30 = sld [smem:[#allocation2 + $0x1]] }
  0xb3   :  { %5334 = vmatprep.subr.bf16.mxu0 %v6486_v1  ;;  %5354 = vmatprep.subr.bf16.mxu1 %v6486_v1  ;;  %v5747_v4 = vld [vmem:[#allocation7 + $0x40] sm:$0xff]   ;;  %v5741_v5 = vld [vmem:[#allocation7 + $0x18] sm:$0xff]   ;;  %v5748_v6 = vld [vmem:[#allocation7 + $0x48] sm:$0xff]   ;;  %vm4592_vm5 = vcmask 1041409  }
  0xb4   :  { %5335 = vmatpush3.bf16.msra.mxu0 %v5738_v0  ;;  %5350 = vmatprep.mubr.msk.bf16.mxu0 %vm6487_vm0, %v6486_v1  ;;  %v5742_v7 = vld [vmem:[#allocation7 + $0x20] sm:$0xff]   ;;  %v5749_v8 = vld [vmem:[#allocation7 + $0x50] sm:$0xff]   ;;  %v5743_v9 = vld [vmem:[#allocation7 + $0x28] sm:$0xff]   ;;  %v6720_v25 = vshrl.u32 %v227_v24, 7 }
  0xb5   :  { %5336 = vmatprep.subr.bf16.mxu0 %v6486_v1  ;;  %5370 = vmatprep.mubr.msk.bf16.mxu1 %vm6487_vm0, %v6486_v1  ;;  %v5750_v10 = vld [vmem:[#allocation7 + $0x58] sm:$0xff]   ;;  %v5744_v11 = vld [vmem:[#allocation7 + $0x30] sm:$0xff]   ;;  %v5751_v12 = vld [vmem:[#allocation7 + $0x60] sm:$0xff]  }
  0xb6   :  { %5355 = vmatpush3.bf16.msra.mxu1 %v5747_v4  ;;  %v5745_v13 = vld [vmem:[#allocation7 + $0x38] sm:$0xff]   ;;  %v5752_v14 = vld [vmem:[#allocation7 + $0x68] sm:$0xff]   ;;  %v5746_v15 = vld [vmem:[%s7446_s1] sm:$0xff]   ;;  %v6723_v26 = vsub.s32 0, %v6720_v25  ;;  %v6735_v40 = vsub.s32 1, %v6720_v25  ;;  %v6742_v51 = vsub.s32 2, %v6720_v25 }
  0xb7   :  { %5356 = vmatprep.subr.bf16.mxu1 %v6486_v1  ;;  %v5753_v16 = vld [vmem:[#allocation7 + $0x70] sm:$0xff]   ;;  %v5754_v17 = vld [vmem:[#allocation7 + $0x78] sm:$0xff]   ;;  %v5755_v18 = vld [vmem:[#allocation7 + $0x80] sm:$0xff]  }
  0xb8   :  { %5337 = vmatpush3.bf16.msra.mxu0 %v5739_v2  ;;  %v5756_v19 = vld [vmem:[#allocation7 + $0x88] sm:$0xff]   ;;  %v5757_v20 = vld [vmem:[#allocation7 + $0x90] sm:$0xff]   ;;  %v5758_v21 = vld [vmem:[#allocation7 + $0x98] sm:$0xff]  }
  0xb9   :  { %5338 = vmatprep.subr.bf16.mxu0 %v6486_v1  ;;  %v5759_v22 = vld [vmem:[#allocation7 + $0xa0] sm:$0xff]   ;;  %v5760_v23 = vld [vmem:[#allocation7 + $0xa8] sm:$0xff]   ;;  %v5761_v38 = vld [vmem:[#allocation7 + $0xb0] sm:$0xff]  }
  0xba   :  { %5357 = vmatpush3.bf16.msra.mxu1 %v5748_v6  ;;  %v6728_v27 = vld [vmem:[%s7450_s5] sm:$0xff]  ;;  %v5762_v39 = vld [vmem:[#allocation7 + $0xb8] sm:$0xff]   ;;  %v5766_v63 = vld [vmem:[#allocation9 + $0x8] ss:$12 sps:$4 sm:$0xff]   ;;  %s602_s5 = sld [smem:[#allocation2]] }
  0xbb   :  { %5358 = vmatprep.subr.bf16.mxu1 %v6486_v1  ;;  %v230_v28 = vrot.slane %v6728_v27, %v6723_v26  ;;  %v349_v41 = vrot.slane %v6728_v27, %v6735_v40  ;;  %v462_v52 = vrot.slane %v6728_v27, %v6742_v51  ;;  %v5765_v61 = vld [vmem:[#allocation9 + $0x4] ss:$12 sps:$4 sm:$0xff]   ;;  %v5763_v62 = vld [vmem:[#allocation9] ss:$12 sps:$4 sm:$0xff]   ;;  %v5769_v0 = vld [vmem:[#allocation9 + $0x1c] ss:$12 sps:$4 sm:$0xff]  }
  0xbc   :  { %5339 = vmatpush3.bf16.msra.mxu0 %v5740_v3  ;;  %v5767_v2 = vld [vmem:[#allocation9 + $0x18] ss:$12 sps:$4 sm:$0xff]   ;;  %v5770_v3 = vld [vmem:[#allocation9 + $0x20] ss:$12 sps:$4 sm:$0xff]  }
  0xbd   :  { %5340 = vmatprep.subr.bf16.mxu0 %v6486_v1  ;;  %v5773_v4 = vld [vmem:[#allocation9 + $0x34] ss:$12 sps:$4 sm:$0xff]   ;;  %v5774_v6 = vld [vmem:[#allocation9 + $0x38] ss:$12 sps:$4 sm:$0xff]  }
  0xbe   :  { %5359 = vmatpush3.bf16.msra.mxu1 %v5749_v8  ;;  %v5775_v8 = vld [vmem:[#allocation9 + $0x48] ss:$12 sps:$4 sm:$0xff]  }
  0xbf   :  { %5360 = vmatprep.subr.bf16.mxu1 %v6486_v1 }
  0xc0   :  { %5341 = vmatpush3.bf16.msra.mxu0 %v5741_v5  ;;  %v5771_v5 = vld [vmem:[#allocation9 + $0x30] ss:$12 sps:$4 sm:$0xff]  }
  0xc1   :  { %5342 = vmatprep.subr.bf16.mxu0 %v6486_v1 }
  0xc2   :  { %5361 = vmatpush3.bf16.msra.mxu1 %v5750_v10  ;;  %v5781_v10 = vld [vmem:[#allocation9 + $0x64] ss:$12 sps:$4 sm:$0xff]  }
  0xc3   :  { %5362 = vmatprep.subr.bf16.mxu1 %v6486_v1 }
  0xc4   :  { %5343 = vmatpush3.bf16.msra.mxu0 %v5742_v7  ;;  %v5777_v7 = vld [vmem:[#allocation9 + $0x4c] ss:$12 sps:$4 sm:$0xff]  }
  0xc5   :  { %5344 = vmatprep.subr.bf16.mxu0 %v6486_v1 }
  0xc6   :  { %5363 = vmatpush3.bf16.msra.mxu1 %v5751_v12  ;;  %v5782_v12 = vld [vmem:[#allocation9 + $0x68] ss:$12 sps:$4 sm:$0xff]  }
  0xc7   :  { %5364 = vmatprep.subr.bf16.mxu1 %v6486_v1 }
  0xc8   :  { %5345 = vmatpush3.bf16.msra.mxu0 %v5743_v9  ;;  %v5778_v9 = vld [vmem:[#allocation9 + $0x50] ss:$12 sps:$4 sm:$0xff]  }
  0xc9   :  { %5346 = vmatprep.subr.bf16.mxu0 %v6486_v1 }
  0xca   :  { %5365 = vmatpush3.bf16.msra.mxu1 %v5752_v14  ;;  %v5783_v14 = vld [vmem:[#allocation9 + $0x78] ss:$12 sps:$4 sm:$0xff]  }
  0xcb   :  { %5366 = vmatprep.subr.bf16.mxu1 %v6486_v1 }
  0xcc   :  { %5347 = vmatpush3.bf16.msra.mxu0 %v5744_v11  ;;  %v5779_v11 = vld [vmem:[#allocation9 + $0x60] ss:$12 sps:$4 sm:$0xff]  }
  0xcd   :  { %5348 = vmatprep.subr.bf16.mxu0 %v6486_v1 }
  0xce   :  { %5367 = vmatpush3.bf16.msra.mxu1 %v5753_v16  ;;  %v5787_v16 = vld [vmem:[#allocation9 + $0x90] ss:$12 sps:$4 sm:$0xff]  }
  0xcf   :  { %5368 = vmatprep.subr.bf16.mxu1 %v6486_v1 }
  0xd0   :  { %5349 = vmatpush3.bf16.msra.mxu0 %v5745_v13  ;;  %v5785_v13 = vld [vmem:[#allocation9 + $0x7c] ss:$12 sps:$4 sm:$0xff]  }
  0xd1   :  { %5374 = vmatprep.subr.bf16.mxu0 %v6486_v1 }
  0xd2   :  { %5369 = vmatpush3.bf16.msra.mxu1 %v5754_v17  ;;  %v5789_v17 = vld [vmem:[#allocation9 + $0x94] ss:$12 sps:$4 sm:$0xff]  }
  0xd3   :  { %5351 = vmatmul.mubr.bf16.vlgmr.msra.gmra.mrb[0].mxu0 %v5746_v15  ;;  %825 = vmatprep.subr.bf16.mxu1 %v5765_v61  ;;  %v5786_v15 = vld [vmem:[#allocation9 + $0x80] ss:$12 sps:$4 sm:$0xff]  }
  0xd4   :  { %5390 = vmatprep.mubr.msk.bf16.mxu0 %vm6487_vm0, %v6486_v1  ;;  %5375 = vmatpush3.bf16.msra.mxu0 %v5755_v18  ;;  %v5790_v18 = vld [vmem:[#allocation9 + $0x98] ss:$12 sps:$4 sm:$0xff]  }
  0xd5   :  { %5376 = vmatprep.subr.bf16.mxu0 %v6486_v1 }
  0xd8   :  { %5377 = vmatpush3.bf16.msra.mxu0 %v5756_v19  ;;  %v5793_v19 = vld [vmem:[#allocation9 + $0xac] ss:$12 sps:$4 sm:$0xff]  }
  0xd9   :  { %5378 = vmatprep.subr.bf16.mxu0 %v6486_v1 }
  0xdc   :  { %5379 = vmatpush3.bf16.msra.mxu0 %v5757_v20  ;;  %v5791_v20 = vld [vmem:[#allocation9 + $0xa8] ss:$12 sps:$4 sm:$0xff]  }
  0xdd   :  { %5380 = vmatprep.subr.bf16.mxu0 %v6486_v1 }
  0xe0   :  { %5381 = vmatpush3.bf16.msra.mxu0 %v5758_v21  ;;  %v5794_v21 = vld [vmem:[#allocation9 + $0xb0] ss:$12 sps:$4 sm:$0xff]  }
  0xe1   :  { %5382 = vmatprep.subr.bf16.mxu0 %v6486_v1 }
  0xe4   :  { %5383 = vmatpush3.bf16.msra.mxu0 %v5759_v22  ;;  %v6488_v22 = vmov 0  }
  0xe5   :  { %5384 = vmatprep.subr.bf16.mxu0 %v6486_v1 }
  0xe8   :  { %5385 = vmatpush3.bf16.msra.mxu0 %v5760_v23 }
  0xe9   :  { %5386 = vmatprep.subr.bf16.mxu0 %v6486_v1 }
  0xec   :  { %5387 = vmatpush3.bf16.msra.mxu0 %v5761_v38 }
  0xed   :  { %5388 = vmatprep.subr.bf16.mxu0 %v6486_v1 }
  0xf0   :  { %5389 = vmatpush3.bf16.msra.mxu0 %v5762_v39 }
  0xf1   :  { %5394 = vmatprep.subr.bf16.mxu0 %v6486_v1 }
 0x1a6   :  { %v319_v29 = vpop.f32.mrb[0].mxu0 }
 0x1a7   :  { %v320_v30 = vadd.f32 %v319_v29, %v230_v28  ;;  %v5352_v31 = vpop.f32.mrb[1].mxu0 }
 0x1a8   :  { %v322_v32 = vpop.f32.mrb[2].mxu0 }
 0x1a9   :  { %v323_v33 = vadd.f32 %v322_v32, %v230_v28  ;;  %v5353_v34 = vpop.f32.mrb[3].mxu0  ;;  %v326_v35 = vmax.f32 %v320_v30, 0.0 }
 0x1ab   :  { %v327_v36 = vmax.f32 %v323_v33, 0.0 }
 0x1ad   :  { %v328_v37 = vpack.c.bf16 %v327_v36, %v326_v35 }
 0x1af   :  { %5371 = vmatmul.mubr.bf16.vlgmr.msra.gmra.mrb[0].mxu1 %v328_v37 }
 0x1b0   :  { %826 = vmatpush1.bf16.msra.mxu1 %v5763_v62  ;;  %857 = vmatprep.mubr.bf16.mxu1 %v6488_v22 }
 0x1b1   :  { %827 = vmatprep.subr.bf16.mxu1 %v5769_v0  ;;  %v5022_v0 = vld [vmem:[#allocation18] ss:$0 sm:$0xff] }
 0x1b4   :  { %828 = vmatpush1.bf16.msra.mxu1 %v5767_v2  ;;  %v636_v2 = vld [vmem:[%s7451_s6 + $0x8] sm:$0xff] }
 0x1b5   :  { %829 = vmatprep.subr.bf16.mxu1 %v5773_v4  ;;  %v4732_v4 = vld [vmem:[%s7451_s6 + $0x10] sm:$0xff] }
 0x1b8   :  { %830 = vmatpush1.bf16.msra.mxu1 %v5771_v5  ;;  %v4733_v5 = vld [vmem:[%s7451_s6 + $0x18] sm:$0xff] }
 0x1b9   :  { %831 = vmatprep.subr.bf16.mxu1 %v5777_v7 }
 0x1bc   :  { %832 = vmatpush1.bf16.msra.mxu1 %v5775_v8 }
 0x1bd   :  { %833 = vmatprep.subr.bf16.mxu1 %v5781_v10 }
 0x1c0   :  { %834 = vmatpush1.bf16.msra.mxu1 %v5779_v11  ;;  %v6821_v11 = vld [vmem:[#allocation15 + $0x10] sm:$0xff] }
 0x1c1   :  { %835 = vmatprep.subr.bf16.mxu1 %v5785_v13  ;;  %v6825_v13 = vld [vmem:[#allocation15 + $0x8] sm:$0xff] }
 0x1c4   :  { %836 = vmatpush1.bf16.msra.mxu1 %v5783_v14  ;;  %v696_v14 = vrot.slane %v6821_v11, %v6723_v26 }
 0x1c5   :  { %837 = vmatprep.subr.bf16.mxu1 %v5789_v17 }
 0x1c8   :  { %838 = vmatpush1.bf16.msra.mxu1 %v5787_v16  ;;  %v692_v16 = vrot.slane %v6825_v13, %v6723_v26 }
 0x1c9   :  { %839 = vmatprep.subr.bf16.mxu1 %v5793_v19  ;;  %v6833_v19 = vld [vmem:[#allocation6] sm:$0xff] }
 0x1cc   :  { %840 = vmatpush1.bf16.msra.mxu1 %v5791_v20  ;;  %v6835_v20 = vld [vmem:[#allocation6 + $0x10] sm:$0xff] }
 0x1cd   :  { %5414 = vmatprep.subr.bf16.mxu1 %v6486_v1 }
 0x282   :  { %v432_v42 = vpop.f32.mrb[0].mxu1 }
 0x283   :  { %v433_v43 = vadd.f32 %v432_v42, %v349_v41  ;;  %v5372_v44 = vpop.f32.mrb[1].mxu1 }
 0x284   :  { %v435_v45 = vpop.f32.mrb[2].mxu1  ;;  %v6770_v44 = vsub.s32 4, %v6720_v25 }
 0x285   :  { %v436_v46 = vadd.f32 %v435_v45, %v349_v41  ;;  %v5373_v47 = vpop.f32.mrb[3].mxu1  ;;  %v439_v48 = vmax.f32 %v433_v43, 0.0  ;;  %v6767_v43 = vsub.s32 3, %v6720_v25 }
 0x286   :  { %v6776_v47 = vsub.s32 5, %v6720_v25 }
 0x287   :  { %v440_v49 = vmax.f32 %v436_v46, 0.0  ;;  %v584_v46 = vrot.slane %v6728_v27, %v6767_v43 }
 0x289   :  { %v441_v50 = vpack.c.bf16 %v440_v49, %v439_v48 }
 0x28b   :  { %5391 = vmatmul.mubr.bf16.vlgmr.msra.gmra.mrb[4].mxu0 %v441_v50  ;;  %v590_v50 = vrot.slane %v6728_v27, %v6770_v44 }
 0x28c   :  { %5410 = vmatprep.mubr.msk.bf16.mxu0 %vm6487_vm0, %v6486_v1  ;;  %5395 = vmatpush3.bf16.msra.mxu0 %v5766_v63 }
 0x28d   :  { %5396 = vmatprep.subr.bf16.mxu0 %v6486_v1 }
 0x290   :  { %5397 = vmatpush3.bf16.msra.mxu0 %v5770_v3 }
 0x291   :  { %5398 = vmatprep.subr.bf16.mxu0 %v6486_v1 }
 0x294   :  { %5399 = vmatpush3.bf16.msra.mxu0 %v5774_v6 }
 0x295   :  { %5400 = vmatprep.subr.bf16.mxu0 %v6486_v1 }
 0x298   :  { %5401 = vmatpush3.bf16.msra.mxu0 %v5778_v9 }
 0x299   :  { %5402 = vmatprep.subr.bf16.mxu0 %v6486_v1 }
 0x29c   :  { %5403 = vmatpush3.bf16.msra.mxu0 %v5782_v12  ;;  %v6823_v12 = vld [vmem:[#allocation15] sm:$0xff] }
 0x29d   :  { %5404 = vmatprep.subr.bf16.mxu0 %v6486_v1 }
 0x2a0   :  { %5405 = vmatpush3.bf16.msra.mxu0 %v5786_v15  ;;  %v688_v15 = vrot.slane %v6823_v12, %v6723_v26 }
 0x2a1   :  { %5406 = vmatprep.subr.bf16.mxu0 %v6486_v1 }
 0x2a4   :  { %5407 = vmatpush3.bf16.msra.mxu0 %v5790_v18 }
 0x2a5   :  { %5408 = vmatprep.subr.bf16.mxu0 %v6486_v1 }
 0x2a8   :  { %5409 = vmatpush3.bf16.msra.mxu0 %v5794_v21 }
 0x2a9   :  { %5434 = vmatprep.subr.bf16.mxu0 %v6486_v1 }
 0x35e   :  { %v545_v53 = vpop.f32.mrb[4].mxu0 }
 0x35f   :  { %v6746_v54 = vadd.f32 %v545_v53, %v462_v52  ;;  %v5392_v55 = vpop.f32.mrb[5].mxu0 }
 0x360   :  { %v548_v56 = vpop.f32.mrb[6].mxu0 }
 0x361   :  { %v6748_v57 = vadd.f32 %v548_v56, %v462_v52  ;;  %552 = vadd.xlane.f32.xlu0 %v6746_v54  ;;  %v5393_v58 = vpop.f32.mrb[7].mxu0  ;;  %v559_v59 = vmul.f32 %v6746_v54, %v6746_v54  ;;  %v603_v52 = vstv %s602_s5  ;;  %v632_v56 = vrot.slane %v6728_v27, %v6776_v47 }
 0x362   :  { %vm621_vm1 = vcmp.gt.s32.totalorder %v6720_v25, %v603_v52  ;;  %vm6785_vm2 = vcmp.eq.s32.totalorder %v6720_v25, %v603_v52 }
 0x363   :  { %561 = vadd.xlane.f32.xlu1 %v559_v59  ;;  %v560_v60 = vmul.f32 %v6748_v57, %v6748_v57 }
 0x365   :  { %554 = vadd.xlane.f32.xlu0 %v6748_v57 }
 0x367   :  { %563 = vadd.xlane.f32.xlu1 %v560_v60  ;;  %v615_v60 = vstv %s4730_s30 }
 0x368   :  { %vm622_vm3 = vcmp.gt.s32.totalorder %v6720_v25, %v615_v60  ;;  %vm6794_vm4 = vcmp.eq.s32.totalorder %v6720_v25, %v615_v60 }
 0x3ee   :  { %v553_v23 = vpop.xlane.xlu0 %552 }
 0x3ef   :  { %v557_v24 = vmul.f32 0.0078125, %v553_v23 }
 0x3f0   :  { %v562_v28 = vpop.xlane.xlu1 %561 }
 0x3f1   :  { %v567_v29 = vmul.f32 %v557_v24, %v557_v24  ;;  %v565_v30 = vmul.f32 0.0078125, %v562_v28  ;;  %v573_v45 = vsub.f32 %v6746_v54, %v557_v24  ;;  %v6839_v28 = vld [vmem:[#allocation6 + $0x20] sm:$0xff] }
 0x3f2   :  { %v555_v31 = vpop.xlane.xlu0 %554 }
 0x3f3   :  { %v569_v32 = vsub.f32 %v565_v30, %v567_v29  ;;  %v558_v33 = vmul.f32 0.0078125, %v555_v31 }
 0x3f4   :  { %v564_v34 = vpop.xlane.xlu1 %563 }
 0x3f5   :  { %v571_v35 = vmax.f32 %v569_v32, 0.0  ;;  %v568_v36 = vmul.f32 %v558_v33, %v558_v33  ;;  %v566_v37 = vmul.f32 0.0078125, %v564_v34  ;;  %v574_v55 = vsub.f32 %v6748_v57, %v558_v33  ;;  %v635_v57 = vld [vmem:[%s7451_s6] sm:$0xff]  ;;  %v6845_v33 = vld [vmem:[#allocation6 + $0x8] sm:$0xff]  ;;  %v6847_v34 = vld [vmem:[#allocation6 + $0x18] sm:$0xff] }
 0x3f7   :  { %v575_v38 = vadd.f32 1e-05, %v571_v35  ;;  %v570_v39 = vsub.f32 %v566_v37, %v568_v36  ;;  %v6849_v35 = vld [vmem:[#allocation6 + $0x28] sm:$0xff] }
 0x3f9   :  { %6131 = vrsqrt.f32 %v575_v38  ;;  %v572_v41 = vmax.f32 %v570_v39, 0.0 }
 0x3fb   :  { %v576_v42 = vadd.f32 1e-05, %v572_v41 }
 0x3fd   :  { %6133 = vrsqrt.f32 %v576_v42 }
 0x403   :  { %v6132_v48 = vpop.eup %6131 }
 0x404   :  { %v579_v49 = vmul.f32 %v6132_v48, %v573_v45  ;;  %v6857_v45 = vld [vmem:[#allocation6 + $0x30] sm:$0xff] }
 0x406   :  { %v585_v53 = vmul.f32 %v584_v46, %v579_v49 }
 0x407   :  { %v6134_v58 = vpop.eup %6133 }
 0x408   :  { %v580_v54 = vmul.f32 %v6134_v58, %v574_v55  ;;  %v591_v59 = vadd.f32 %v590_v50, %v585_v53  ;;  %v6867_v53 = vld [vmem:[#allocation6 + $0x40] sm:$0xff] }
 0x40a   :  { %v586_v61 = vmul.f32 %v584_v46, %v580_v54  ;;  %v633_v63 = vsel %vm621_vm1, %v632_v56, %v591_v59  ;;  %v6859_v46 = vld [vmem:[#allocation6 + $0x38] sm:$0xff]  ;;  %v6874_v59 = vld [vmem:[#allocation6 + $0x48] sm:$0xff] }
 0x40b   :  { %v641_v3 = vsel %vm6785_vm2, %v635_v57, %v633_v63 }
 0x40c   :  { %v592_v27 = vadd.f32 %v590_v50, %v586_v61  ;;  %v6811_v8 = vadd.f32 %v4732_v4, %v641_v3 }
 0x40e   :  { %v634_v6 = vsel %vm622_vm3, %v632_v56, %v592_v27  ;;  %v6881_v27 = vld [vmem:[#allocation6 + $0x50] sm:$0xff] }
 0x40f   :  { %v642_v7 = vsel %vm6794_vm4, %v636_v2, %v634_v6  ;;  %v6883_v2 = vld [vmem:[#allocation6 + $0x58] sm:$0xff] }
 0x410   :  { %v6813_v9 = vadd.f32 %v4733_v5, %v642_v7  ;;  %v6887_v7 = vld [vmem:[#allocation6 + $0x60] sm:$0xff] }
 0x412   :  { %v652_v10 = vpack.c.bf16 %v6813_v9, %v6811_v8 }
 0x414   :  { %858 = vmatmul.mubr.bf16.vlgmr.msra.gmra.mrb[4].mxu1 %v652_v10  ;;  %5411 = vmatmul.mubr.bf16.vlgmr.msra.gmra.mrb[8].mxu0 %v652_v10  ;;  %v6889_v10 = vld [vmem:[#allocation6 + $0x68] sm:$0xff] }
 0x415   :  { %5430 = vmatprep.mubr.msk.bf16.mxu1 %vm6487_vm0, %v6486_v1  ;;  %5450 = vmatprep.mubr.msk.bf16.mxu0 %vm6487_vm0, %v6486_v1 }
 0x4e7   :  { %v859_v17 = vpop.f32.mrb[4].mxu1  ;;  %v902_v18 = vpop.f32.mrb[8].mxu0 }
 0x4e8   :  { %v6837_v21 = vadd.f32 %v902_v18, %v696_v14  ;;  %v861_v23 = vpop.f32.mrb[5].mxu1  ;;  %v5412_v24 = vpop.f32.mrb[9].mxu0  ;;  %v6841_v29 = vadd.f32 %v859_v17, %v688_v15 }
 0x4e9   :  { %v6843_v30 = vadd.f32 %v861_v23, %v692_v16  ;;  %v863_v31 = vpop.f32.mrb[6].mxu1  ;;  %v905_v32 = vpop.f32.mrb[10].mxu0 }
 0x4ea   :  { %v6851_v36 = vadd.f32 %v863_v31, %v688_v15  ;;  %v906_v37 = vadd.f32 %v905_v32, %v696_v14  ;;  %v865_v38 = vpop.f32.mrb[7].mxu1  ;;  %v5413_v39 = vpop.f32.mrb[11].mxu0  ;;  %v933_v41 = vmul.f32 %v6837_v21, %v6833_v19  ;;  %v935_v42 = vmul.f32 %v6837_v21, %v6835_v20  ;;  %v6898_v32 = vld [vmem:[#allocation6 + $0x70] sm:$0xff] }
 0x4eb   :  { %v866_v48 = vadd.f32 %v865_v38, %v692_v16  ;;  %v909_v49 = vmul.f32 %v6843_v30, %v6833_v19  ;;  %v937_v50 = vmul.f32 %v6837_v21, %v6839_v28  ;;  %v911_v52 = vmul.f32 %v6843_v30, %v6835_v20  ;;  %v6900_v38 = vld [vmem:[#allocation6 + $0x78] sm:$0xff] }
 0x4ec   :  { %v957_v55 = vpack.c.bf16 %v6851_v36, %v6841_v29  ;;  %v934_v56 = vmul.f32 %v906_v37, %v6845_v33  ;;  %v936_v58 = vmul.f32 %v906_v37, %v6847_v34  ;;  %v938_v54 = vmul.f32 %v906_v37, %v6849_v35 }
 0x4ed   :  { %v910_v60 = vmul.f32 %v866_v48, %v6845_v33  ;;  %v912_v61 = vmul.f32 %v866_v48, %v6847_v34  ;;  %v939_v63 = vmul.f32 %v6837_v21, %v6857_v45  ;;  %v940_v57 = vmul.f32 %v906_v37, %v6859_v46 }
 0x4ee   :  { %v949_v3 = vpack.c.bf16 %v934_v56, %v933_v41  ;;  %v950_v4 = vpack.c.bf16 %v936_v58, %v935_v42  ;;  %v951_v5 = vpack.c.bf16 %v938_v54, %v937_v50  ;;  %v941_v6 = vmul.f32 %v6837_v21, %v6867_v53 }
 0x4ef   :  { %v925_v14 = vpack.c.bf16 %v910_v60, %v909_v49  ;;  %v926_v15 = vpack.c.bf16 %v912_v61, %v911_v52  ;;  %v952_v16 = vpack.c.bf16 %v940_v57, %v939_v63  ;;  %v942_v17 = vmul.f32 %v906_v37, %v6874_v59 }
 0x4f0   :  { %5435 = vmatpush3.bf16.msra.mxu0 %v949_v3  ;;  %v913_v18 = vmul.f32 %v6843_v30, %v6839_v28  ;;  %v914_v23 = vmul.f32 %v866_v48, %v6849_v35  ;;  %v943_v24 = vmul.f32 %v6837_v21, %v6881_v27  ;;  %v944_v31 = vmul.f32 %v906_v37, %v6883_v2 }
 0x4f1   :  { %5415 = vmatpush3.bf16.xpose.msra.mxu1 %v925_v14  ;;  %5436 = vmatprep.subr.bf16.mxu0 %v6486_v1  ;;  %v953_v39 = vpack.c.bf16 %v942_v17, %v941_v6  ;;  %v945_v41 = vmul.f32 %v6837_v21, %v6887_v7  ;;  %v946_v42 = vmul.f32 %v906_v37, %v6889_v10 }
 0x4f2   :  { %5416 = vmatprep.subr.bf16.mxu1 %v6486_v1  ;;  %v927_v49 = vpack.c.bf16 %v914_v23, %v913_v18  ;;  %v954_v50 = vpack.c.bf16 %v944_v31, %v943_v24  ;;  %v915_v52 = vmul.f32 %v6843_v30, %v6857_v45  ;;  %v916_v56 = vmul.f32 %v866_v48, %v6859_v46 }
 0x4f3   :  { %v955_v58 = vpack.c.bf16 %v946_v42, %v945_v41  ;;  %v947_v54 = vmul.f32 %v6837_v21, %v6898_v32  ;;  %v948_v60 = vmul.f32 %v906_v37, %v6900_v38  ;;  %v917_v61 = vmul.f32 %v6843_v30, %v6867_v53 }
 0x4f4   :  { %5437 = vmatpush3.bf16.msra.mxu0 %v950_v4  ;;  %v928_v63 = vpack.c.bf16 %v916_v56, %v915_v52  ;;  %v918_v57 = vmul.f32 %v866_v48, %v6874_v59  ;;  %v919_v3 = vmul.f32 %v6843_v30, %v6881_v27  ;;  %v920_v6 = vmul.f32 %v866_v48, %v6883_v2 }
 0x4f5   :  { %5438 = vmatprep.subr.bf16.mxu0 %v6486_v1  ;;  %v956_v14 = vpack.c.bf16 %v948_v60, %v947_v54  ;;  %v921_v21 = vmul.f32 %v6843_v30, %v6887_v7  ;;  %v922_v37 = vmul.f32 %v866_v48, %v6889_v10  ;;  %v923_v4 = vmul.f32 %v6843_v30, %v6898_v32 }
 0x4f6   :  { %v929_v17 = vpack.c.bf16 %v918_v57, %v917_v61  ;;  %v930_v18 = vpack.c.bf16 %v920_v6, %v919_v3  ;;  %v924_v23 = vmul.f32 %v866_v48, %v6900_v38  ;;  %v206_v48 = vld [vmem:[%s7447_s2] sm:$0xff]  ;;  %v6952_v61 = vpack.c.bf16 %v6845_v33, %v6833_v19 }
 0x4f7   :  { %v931_v24 = vpack.c.bf16 %v922_v37, %v921_v21  ;;  %v6957_v57 = vpack.c.bf16 %v6847_v34, %v6835_v20  ;;  %v6965_v3 = vpack.c.bf16 %v6849_v35, %v6839_v28  ;;  %v6971_v19 = vpack.c.bf16 %v6859_v46, %v6857_v45  ;;  %v5795_v35 = vld [vmem:[#allocation10] sm:$0xff]   ;;  %v5796_v45 = vld [vmem:[#allocation10 + $0x8] sm:$0xff]   ;;  %v5797_v46 = vld [vmem:[#allocation10 + $0x10] sm:$0xff]  }
 0x4f8   :  { %5439 = vmatpush3.bf16.msra.mxu0 %v951_v5  ;;  %v932_v31 = vpack.c.bf16 %v924_v23, %v923_v4  ;;  %v6977_v20 = vpack.c.bf16 %v6874_v59, %v6867_v53  ;;  %v6983_v28 = vpack.c.bf16 %v6883_v2, %v6881_v27  ;;  %v6989_v33 = vpack.c.bf16 %v6889_v10, %v6887_v7  ;;  %v5798_v53 = vld [vmem:[#allocation10 + $0x18] sm:$0xff]   ;;  %v5799_v59 = vld [vmem:[#allocation10 + $0x20] sm:$0xff]   ;;  %v5800_v27 = vld [vmem:[#allocation10 + $0x28] sm:$0xff]  }
 0x4f9   :  { %5417 = vmatpush3.bf16.xpose.msra.mxu1 %v926_v15  ;;  %5440 = vmatprep.subr.bf16.mxu0 %v6486_v1  ;;  %v6995_v34 = vpack.c.bf16 %v6900_v38, %v6898_v32  ;;  %v5801_v2 = vld [vmem:[#allocation10 + $0x30] sm:$0xff]   ;;  %v5802_v7 = vld [vmem:[#allocation10 + $0x38] sm:$0xff]  }
 0x4fa   :  { %5418 = vmatprep.subr.bf16.mxu1 %v6486_v1 }
 0x4fc   :  { %5441 = vmatpush3.bf16.msra.mxu0 %v952_v16 }
 0x4fd   :  { %5442 = vmatprep.subr.bf16.mxu0 %v6486_v1 }
 0x500   :  { %5443 = vmatpush3.bf16.msra.mxu0 %v953_v39  ;;  %v207_v39 = vld [vmem:[%s7447_s2 + $0x8] sm:$0xff] }
 0x501   :  { %5419 = vmatpush3.bf16.xpose.msra.mxu1 %v927_v49  ;;  %5444 = vmatprep.subr.bf16.mxu0 %v6486_v1 }
 0x502   :  { %5420 = vmatprep.subr.bf16.mxu1 %v6486_v1 }
 0x504   :  { %5445 = vmatpush3.bf16.msra.mxu0 %v954_v50 }
 0x505   :  { %5446 = vmatprep.subr.bf16.mxu0 %v6486_v1 }
 0x508   :  { %5447 = vmatpush3.bf16.msra.mxu0 %v955_v58 }
 0x509   :  { %5421 = vmatpush3.bf16.xpose.msra.mxu1 %v928_v63  ;;  %5448 = vmatprep.subr.bf16.mxu0 %v6486_v1 }
 0x50a   :  { %5422 = vmatprep.subr.bf16.mxu1 %v6486_v1 }
 0x50c   :  { %5449 = vmatpush3.bf16.msra.mxu0 %v956_v14 }
 0x50d   :  { %5454 = vmatprep.subr.bf16.mxu0 %v6486_v1 }
 0x511   :  { %5423 = vmatpush3.bf16.xpose.msra.mxu1 %v929_v17 }
 0x512   :  { %5424 = vmatprep.subr.bf16.mxu1 %v6486_v1 }
 0x519   :  { %5425 = vmatpush3.bf16.xpose.msra.mxu1 %v930_v18 }
 0x51a   :  { %5426 = vmatprep.subr.bf16.mxu1 %v6486_v1 }
 0x521   :  { %5427 = vmatpush3.bf16.xpose.msra.mxu1 %v931_v24 }
 0x522   :  { %5428 = vmatprep.subr.bf16.mxu1 %v6486_v1 }
 0x529   :  { %5429 = vmatpush3.bf16.xpose.msra.mxu1 %v932_v31 }
 0x52a   :  { %5474 = vmatprep.subr.bf16.mxu1 %v6486_v1 }
 0x530   :  { %5431 = vmatmul.mubr.bf16.vlgmr.msra.gmra.mrb[8].mxu1 %v957_v55 }
 0x531   :  { %5490 = vmatprep.mubr.msk.bf16.mxu1 %vm6487_vm0, %v6486_v1  ;;  %5475 = vmatpush3.bf16.msra.mxu1 %v5795_v35  ;;  %v5817_v35 = vld [vmem:[#allocation12 + $0x44] ss:$16 sps:$4 sm:$0xff]  }
 0x532   :  { %5476 = vmatprep.subr.bf16.mxu1 %v6486_v1 }
 0x535   :  { %5477 = vmatpush3.bf16.msra.mxu1 %v5796_v45  ;;  %v5815_v45 = vld [vmem:[#allocation12 + $0x40] ss:$16 sps:$4 sm:$0xff]  }
 0x536   :  { %5478 = vmatprep.subr.bf16.mxu1 %v6486_v1 }
 0x539   :  { %5479 = vmatpush3.bf16.msra.mxu1 %v5797_v46  ;;  %v5820_v46 = vld [vmem:[#allocation12 + $0x4c] ss:$16 sps:$4 sm:$0xff]  }
 0x53a   :  { %5480 = vmatprep.subr.bf16.mxu1 %v6486_v1 }
 0x53d   :  { %5481 = vmatpush3.bf16.msra.mxu1 %v5798_v53  ;;  %v5818_v53 = vld [vmem:[#allocation12 + $0x48] ss:$16 sps:$4 sm:$0xff]  }
 0x53e   :  { %5482 = vmatprep.subr.bf16.mxu1 %v6486_v1 }
 0x541   :  { %5483 = vmatpush3.bf16.msra.mxu1 %v5799_v59  ;;  %v5823_v59 = vld [vmem:[#allocation12 + $0x64] ss:$16 sps:$4 sm:$0xff]  }
 0x542   :  { %5484 = vmatprep.subr.bf16.mxu1 %v6486_v1 }
 0x545   :  { %5485 = vmatpush3.bf16.msra.mxu1 %v5800_v27  ;;  %v5826_v27 = vld [vmem:[#allocation12 + $0x6c] ss:$16 sps:$4 sm:$0xff]  }
 0x546   :  { %5486 = vmatprep.subr.bf16.mxu1 %v6486_v1 }
 0x549   :  { %5487 = vmatpush3.bf16.msra.mxu1 %v5801_v2  ;;  %v5821_v2 = vld [vmem:[#allocation12 + $0x60] ss:$16 sps:$4 sm:$0xff]  }
 0x54a   :  { %5488 = vmatprep.subr.bf16.mxu1 %v6486_v1 }
 0x54d   :  { %5489 = vmatpush3.bf16.msra.mxu1 %v5802_v7  ;;  %v5824_v7 = vld [vmem:[#allocation12 + $0x68] ss:$16 sps:$4 sm:$0xff]  }
 0x603   :  { %v992_v30 = vpop.f32.mrb[8].mxu1 }
 0x604   :  { %v999_v5 = vmul.f32 0.25, %v992_v30  ;;  %v5432_v15 = vpop.f32.mrb[9].mxu1 }
 0x605   :  { %v995_v16 = vpop.f32.mrb[10].mxu1 }
 0x606   :  { %v1000_v41 = vmul.f32 0.25, %v995_v16  ;;  %v5433_v42 = vpop.f32.mrb[11].mxu1  ;;  %v1001_v49 = vadd.f32 %v999_v5, %v206_v48  ;;  %v1122_v5 = vrot.slane %v6823_v12, %v6735_v40 }
 0x608   :  { %1003 = vmax.xlane.f32.xlu0 %v1001_v49  ;;  %v1002_v29 = vadd.f32 %v1000_v41, %v207_v39 }
 0x60a   :  { %1005 = vmax.xlane.f32.xlu1 %v1002_v29 }
 0x695   :  { %v1004_v36 = vpop.xlane.xlu0 %1003 }
 0x696   :  { %v1007_v55 = vsub.f32 %v1001_v49, %v1004_v36 }
 0x697   :  { %v1006_v50 = vpop.xlane.xlu1 %1005 }
 0x698   :  { %v1009_v52 = vmul.f32 1.442695, %v1007_v55  ;;  %v1008_v56 = vsub.f32 %v1002_v29, %v1006_v50 }
 0x69a   :  { %v1011_v58 = vmul.f32 1.442695, %v1008_v56  ;;  %6135 = vpow2.f32 %v1009_v52  ;;  %v5803_v52 = vld [vmem:[#allocation12] ss:$16 sps:$4 sm:$0xff]   ;;  %v5806_v56 = vld [vmem:[#allocation12 + $0x8] ss:$16 sps:$4 sm:$0xff]  }
 0x69c   :  { %6137 = vpow2.f32 %v1011_v58  ;;  %v5808_v58 = vld [vmem:[#allocation12 + $0xc] ss:$16 sps:$4 sm:$0xff]  }
 0x69d   :  { %1506 = vmatprep.subr.bf16.mxu1 %v5808_v58 }
 0x6a4   :  { %v6136_v54 = vpop.eup %6135 }
 0x6a6   :  { %v6138_v60 = vpop.eup %6137 }
 0x6a7   :  { %v1013_v63 = vpack.c.bf16 %v6138_v60, %v6136_v54  ;;  %v5811_v54 = vld [vmem:[#allocation12 + $0x24] ss:$16 sps:$4 sm:$0xff]   ;;  %v5812_v60 = vld [vmem:[#allocation12 + $0x28] ss:$16 sps:$4 sm:$0xff]  }
 0x6a9   :  { %5451 = vmatmul.mubr.bf16.vlgmr.msra.gmra.mrb[12].mxu0 %v1013_v63 }
 0x6aa   :  { %5455 = vmatpush3.bf16.msra.mxu0 %v6952_v61  ;;  %5470 = vmatprep.mubr.msk.bf16.mxu0 %vm6487_vm0, %v6486_v1 }
 0x6ab   :  { %5456 = vmatprep.subr.bf16.mxu0 %v6486_v1 }
 0x6ae   :  { %5457 = vmatpush3.bf16.msra.mxu0 %v6957_v57 }
 0x6af   :  { %5458 = vmatprep.subr.bf16.mxu0 %v6486_v1 }
 0x6b2   :  { %5459 = vmatpush3.bf16.msra.mxu0 %v6965_v3 }
 0x6b3   :  { %5460 = vmatprep.subr.bf16.mxu0 %v6486_v1 }
 0x6b6   :  { %5461 = vmatpush3.bf16.msra.mxu0 %v6971_v19 }
 0x6b7   :  { %5462 = vmatprep.subr.bf16.mxu0 %v6486_v1 }
 0x6ba   :  { %5463 = vmatpush3.bf16.msra.mxu0 %v6977_v20 }
 0x6bb   :  { %5464 = vmatprep.subr.bf16.mxu0 %v6486_v1 }
 0x6be   :  { %5465 = vmatpush3.bf16.msra.mxu0 %v6983_v28 }
 0x6bf   :  { %5466 = vmatprep.subr.bf16.mxu0 %v6486_v1 }
 0x6c2   :  { %5467 = vmatpush3.bf16.msra.mxu0 %v6989_v33 }
 0x6c3   :  { %5468 = vmatprep.subr.bf16.mxu0 %v6486_v1 }
 0x6c6   :  { %5469 = vmatpush3.bf16.msra.mxu0 %v6995_v34 }
 0x6c9   :  { %5471 = vmatmul.mubr.bf16.vlgmr.msra.gmra.mrb[16].mxu0 %v1013_v63  ;;  %v5814_v63 = vld [vmem:[#allocation12 + $0x2c] ss:$16 sps:$4 sm:$0xff]  }
 0x6ca   :  { %1495 = vmatprep.mubr.bf16.mxu0 %v6488_v22 }
 0x77c   :  { %v1048_v10 = vpop.f32.mrb[12].mxu0 }
 0x77d   :  { %v5452_v32 = vpop.f32.mrb[13].mxu0 }
 0x77e   :  { %v1051_v38 = vpop.f32.mrb[14].mxu0  ;;  %v5832_v32 = vld [vmem:[#allocation12 + $0x8c] ss:$16 sps:$4 sm:$0xff]  }
 0x77f   :  { %v5453_v6 = vpop.f32.mrb[15].mxu0 }
 0x780   :  { %v5830_v6 = vld [vmem:[#allocation12 + $0x88] ss:$16 sps:$4 sm:$0xff]  }
 0x79c   :  { %v1089_v14 = vpop.f32.mrb[16].mxu0 }
 0x79d   :  { %v1096_v21 = vmax.f32 %v1089_v14, 1e-20  ;;  %v5472_v37 = vpop.f32.mrb[17].mxu0  ;;  %v5835_v14 = vld [vmem:[#allocation12 + $0xa4] ss:$16 sps:$4 sm:$0xff]  }
 0x79e   :  { %v1092_v17 = vpop.f32.mrb[18].mxu0  ;;  %v5833_v37 = vld [vmem:[#allocation12 + $0xa0] ss:$16 sps:$4 sm:$0xff]  }
 0x79f   :  { %6139 = vrcp.f32 %v1096_v21  ;;  %v1097_v18 = vmax.f32 %v1092_v17, 1e-20  ;;  %v5473_v4 = vpop.f32.mrb[19].mxu0  ;;  %v5838_v21 = vld [vmem:[#allocation12 + $0xac] ss:$16 sps:$4 sm:$0xff]  }
 0x7a0   :  { %v5836_v17 = vld [vmem:[#allocation12 + $0xa8] ss:$16 sps:$4 sm:$0xff]   ;;  %v5844_v4 = vld [vmem:[#allocation12 + $0xcc] ss:$16 sps:$4 sm:$0xff]  }
 0x7a1   :  { %6141 = vrcp.f32 %v1097_v18  ;;  %v5841_v18 = vld [vmem:[#allocation12 + $0xc4] ss:$16 sps:$4 sm:$0xff]  }
 0x7a9   :  { %v6140_v23 = vpop.eup %6139 }
 0x7aa   :  { %v1100_v24 = vmul.f32 %v6140_v23, %v1048_v10  ;;  %v5829_v10 = vld [vmem:[#allocation12 + $0x84] ss:$16 sps:$4 sm:$0xff]   ;;  %v5839_v23 = vld [vmem:[#allocation12 + $0xc0] ss:$16 sps:$4 sm:$0xff]  }
 0x7ab   :  { %v6142_v31 = vpop.eup %6141 }
 0x7ac   :  { %v1101_v30 = vmul.f32 %v6142_v31, %v1051_v38  ;;  %v5827_v38 = vld [vmem:[#allocation12 + $0x80] ss:$16 sps:$4 sm:$0xff]   ;;  %v5847_v31 = vld [vmem:[#allocation12 + $0xe4] ss:$16 sps:$4 sm:$0xff]  }
 0x7ae   :  { %v1102_v48 = vpack.c.bf16 %v1101_v30, %v1100_v24  ;;  %v5842_v24 = vld [vmem:[#allocation12 + $0xc8] ss:$16 sps:$4 sm:$0xff]   ;;  %v5850_v30 = vld [vmem:[#allocation12 + $0xec] ss:$16 sps:$4 sm:$0xff]  }
 0x7b0   :  { %5491 = vmatmul.mubr.bf16.vlgmr.msra.gmra.mrb[12].mxu1 %v1102_v48  ;;  %v5845_v48 = vld [vmem:[#allocation12 + $0xe0] ss:$16 sps:$4 sm:$0xff]  }
 0x7b1   :  { %1538 = vmatprep.mubr.bf16.mxu1 %v6488_v22  ;;  %1507 = vmatpush1.bf16.msra.mxu1 %v5806_v56 }
 0x7b2   :  { %1508 = vmatprep.subr.bf16.mxu1 %v5814_v63 }
 0x7b5   :  { %1509 = vmatpush1.bf16.msra.mxu1 %v5812_v60 }
 0x7b6   :  { %1510 = vmatprep.subr.bf16.mxu1 %v5820_v46 }
 0x7b9   :  { %1511 = vmatpush1.bf16.msra.mxu1 %v5818_v53  ;;  %v1245_v53 = vrot.slane %v6823_v12, %v6742_v51 }
 0x7ba   :  { %1512 = vmatprep.subr.bf16.mxu1 %v5826_v27 }
 0x7bd   :  { %1513 = vmatpush1.bf16.msra.mxu1 %v5824_v7 }
 0x7be   :  { %1514 = vmatprep.subr.bf16.mxu1 %v5832_v32 }
 0x7c1   :  { %1515 = vmatpush1.bf16.msra.mxu1 %v5830_v6 }
 0x7c2   :  { %1516 = vmatprep.subr.bf16.mxu1 %v5838_v21 }
 0x7c5   :  { %1517 = vmatpush1.bf16.msra.mxu1 %v5836_v17 }
 0x7c6   :  { %1518 = vmatprep.subr.bf16.mxu1 %v5844_v4  ;;  %v5856_v4 = vld [vmem:[#allocation13 + $0xc8] sm:$0xff]  }
 0x7c9   :  { %1519 = vmatpush1.bf16.msra.mxu1 %v5842_v24  ;;  %v5859_v24 = vld [vmem:[#allocation13 + $0x50] sm:$0xff]  }
 0x7ca   :  { %1520 = vmatprep.subr.bf16.mxu1 %v5850_v30  ;;  %v5861_v30 = vld [vmem:[#allocation13 + $0x10] sm:$0xff]  }
 0x883   :  { %v1205_v15 = vpop.f32.mrb[12].mxu1 }
 0x884   :  { %v1206_v16 = vadd.f32 %v1205_v15, %v1122_v5  ;;  %v5492_v39 = vpop.f32.mrb[13].mxu1  ;;  %v5851_v15 = vld [vmem:[#allocation13 + $0x40] sm:$0xff]  }
 0x885   :  { %v1208_v41 = vpop.f32.mrb[14].mxu1 }
 0x886   :  { %v7011_v42 = vadd.f32 %v1206_v16, %v6811_v8  ;;  %v1209_v49 = vadd.f32 %v1208_v41, %v1122_v5  ;;  %v5493_v29 = vpop.f32.mrb[15].mxu1  ;;  %v5805_v8 = vld [vmem:[#allocation12 + $0x4] ss:$16 sps:$4 sm:$0xff]   ;;  %v5848_v5 = vld [vmem:[#allocation12 + $0xe8] ss:$16 sps:$4 sm:$0xff]  }
 0x887   :  { %1463 = vmatprep.subr.bf16.mxu0 %v5805_v8  ;;  %v5852_v16 = vld [vmem:[#allocation13 + $0xc0] sm:$0xff]   ;;  %1521 = vmatpush1.bf16.msra.mxu1 %v5848_v5  ;;  %v5863_v5 = vld [vmem:[#allocation13 + $0x58] sm:$0xff]  }
 0x888   :  { %v7014_v36 = vadd.f32 %v1209_v49, %v6813_v9  ;;  %1214 = vadd.xlane.f32.xlu0 %v7011_v42  ;;  %v1220_v55 = vmul.f32 %v7011_v42, %v7011_v42  ;;  %1464 = vmatpush1.bf16.msra.mxu0 %v5803_v52  ;;  %v5809_v9 = vld [vmem:[#allocation12 + $0x20] ss:$16 sps:$4 sm:$0xff]  }
 0x889   :  { %1465 = vmatprep.subr.bf16.mxu0 %v5811_v54  ;;  %5125 = vmatprep.subr.bf16.mxu1 %v5852_v16  ;;  %v5865_v16 = vld [vmem:[#allocation13 + $0x18] sm:$0xff]  }
 0x88a   :  { %1216 = vadd.xlane.f32.xlu1 %v7014_v36  ;;  %v1221_v50 = vmul.f32 %v7014_v36, %v7014_v36 }
 0x88c   :  { %1222 = vadd.xlane.f32.xlu0 %v1220_v55  ;;  %1466 = vmatpush1.bf16.msra.mxu0 %v5809_v9 }
 0x88d   :  { %1467 = vmatprep.subr.bf16.mxu0 %v5817_v35 }
 0x88e   :  { %1224 = vadd.xlane.f32.xlu1 %v1221_v50 }
 0x890   :  { %1468 = vmatpush1.bf16.msra.mxu0 %v5815_v45 }
 0x891   :  { %1469 = vmatprep.subr.bf16.mxu0 %v5823_v59 }
 0x894   :  { %1470 = vmatpush1.bf16.msra.mxu0 %v5821_v2 }
 0x895   :  { %1471 = vmatprep.subr.bf16.mxu0 %v5829_v10 }
 0x898   :  { %1472 = vmatpush1.bf16.msra.mxu0 %v5827_v38  ;;  %v1251_v38 = vrot.slane %v6823_v12, %v6767_v43 }
 0x899   :  { %1473 = vmatprep.subr.bf16.mxu0 %v5835_v14 }
 0x89c   :  { %1474 = vmatpush1.bf16.msra.mxu0 %v5833_v37  ;;  %v5853_v37 = vld [vmem:[#allocation13] sm:$0xff]  }
 0x89d   :  { %1475 = vmatprep.subr.bf16.mxu0 %v5841_v18  ;;  %v5855_v18 = vld [vmem:[#allocation13 + $0x48] sm:$0xff]  }
 0x8a0   :  { %1476 = vmatpush1.bf16.msra.mxu0 %v5839_v23  ;;  %v5858_v23 = vld [vmem:[#allocation13 + $0x88] sm:$0xff]  }
 0x8a1   :  { %1477 = vmatprep.subr.bf16.mxu0 %v5847_v31  ;;  %v5860_v31 = vld [vmem:[#allocation13 + $0xd0] sm:$0xff]  }
 0x8a4   :  { %1478 = vmatpush1.bf16.msra.mxu0 %v5845_v48  ;;  %v5862_v48 = vld [vmem:[#allocation13 + $0x90] sm:$0xff]  }
 0x8a5   :  { %5103 = vmatprep.subr.bf16.mxu0 %v5851_v15  ;;  %v5864_v15 = vld [vmem:[#allocation13 + $0xd8] sm:$0xff]  }
 0x915   :  { %v1215_v39 = vpop.xlane.xlu0 %1214 }
 0x916   :  { %v1218_v41 = vmul.f32 0.0078125, %v1215_v39  ;;  %v5866_v39 = vld [vmem:[#allocation13 + $0x98] sm:$0xff]  }
 0x917   :  { %v1217_v49 = vpop.xlane.xlu1 %1216 }
 0x918   :  { %v1219_v29 = vmul.f32 0.0078125, %v1217_v49  ;;  %v1228_v50 = vmul.f32 %v1218_v41, %v1218_v41  ;;  %v1234_v46 = vsub.f32 %v7011_v42, %v1218_v41  ;;  %v5854_v42 = vld [vmem:[#allocation13 + $0x80] sm:$0xff]  }
 0x919   :  { %v1223_v55 = vpop.xlane.xlu0 %1222  ;;  %v5867_v41 = vld [vmem:[#allocation13 + $0x60] sm:$0xff]  }
 0x91a   :  { %v1226_v52 = vmul.f32 0.0078125, %v1223_v55  ;;  %v1229_v56 = vmul.f32 %v1219_v29, %v1219_v29  ;;  %v1235_v27 = vsub.f32 %v7014_v36, %v1219_v29  ;;  %v5857_v36 = vld [vmem:[#allocation13 + $0x8] sm:$0xff]   ;;  %v5868_v49 = vld [vmem:[#allocation13 + $0xe0] sm:$0xff]  }
 0x91b   :  { %v1225_v8 = vpop.xlane.xlu1 %1224  ;;  %v5869_v29 = vld [vmem:[#allocation13 + $0x20] sm:$0xff]  }
 0x91c   :  { %v1230_v58 = vsub.f32 %v1226_v52, %v1228_v50  ;;  %v1227_v9 = vmul.f32 0.0078125, %v1225_v8  ;;  %v5870_v55 = vld [vmem:[#allocation13 + $0xa0] sm:$0xff]   ;;  %v5871_v50 = vld [vmem:[#allocation13 + $0x68] sm:$0xff]  }
 0x91d   :  { %v5872_v52 = vld [vmem:[#allocation13 + $0xe8] sm:$0xff]  }
 0x91e   :  { %v1232_v54 = vmax.f32 %v1230_v58, 0.0  ;;  %v1231_v60 = vsub.f32 %v1227_v9, %v1229_v56  ;;  %v5873_v8 = vld [vmem:[#allocation13 + $0x28] sm:$0xff]   ;;  %v5875_v58 = vld [vmem:[#allocation13 + $0x70] sm:$0xff]  }
 0x91f   :  { %v5874_v56 = vld [vmem:[#allocation13 + $0xa8] sm:$0xff]   ;;  %v5876_v9 = vld [vmem:[#allocation13 + $0xf0] sm:$0xff]  }
 0x920   :  { %v1236_v63 = vadd.f32 1e-05, %v1232_v54  ;;  %v1233_v35 = vmax.f32 %v1231_v60, 0.0  ;;  %v5877_v54 = vld [vmem:[#allocation13 + $0x30] sm:$0xff]  }
 0x921   :  { %v5878_v60 = vld [vmem:[#allocation13 + $0xb0] sm:$0xff]  }
 0x922   :  { %6143 = vrsqrt.f32 %v1236_v63  ;;  %v1237_v45 = vadd.f32 1e-05, %v1233_v35  ;;  %v5879_v63 = vld [vmem:[#allocation13 + $0x78] sm:$0xff]  }
 0x923   :  { %v5880_v35 = vld [vmem:[#allocation13 + $0xf8] sm:$0xff]  }
 0x924   :  { %6145 = vrsqrt.f32 %v1237_v45  ;;  %v5881_v45 = vld [vmem:[#allocation13 + $0x38] sm:$0xff]  }
 0x92c   :  { %v6144_v59 = vpop.eup %6143 }
 0x92d   :  { %v1240_v2 = vmul.f32 %v6144_v59, %v1234_v46  ;;  %v5882_v46 = vld [vmem:[#allocation13 + $0xb8] sm:$0xff]   ;;  %v1290_v59 = vrot.slane %v6823_v12, %v6770_v44 }
 0x92e   :  { %v6146_v7 = vpop.eup %6145 }
 0x92f   :  { %v1241_v10 = vmul.f32 %v6146_v7, %v1235_v27  ;;  %v1246_v32 = vmul.f32 %v1245_v53, %v1240_v2  ;;  %v1298_v27 = vrot.slane %v6821_v11, %v6770_v44  ;;  %v1294_v2 = vrot.slane %v6825_v13, %v6770_v44 }
 0x931   :  { %v1247_v6 = vmul.f32 %v1245_v53, %v1241_v10  ;;  %v7028_v14 = vadd.f32 %v1251_v38, %v1246_v32  ;;  %v651_v53 = vld [vmem:[#allocation15 + $0x18] sm:$0xff] }
 0x932   :  { %v1302_v7 = vrot.slane %v651_v53, %v6770_v44 }
 0x933   :  { %v7030_v21 = vadd.f32 %v1251_v38, %v1247_v6 }
 0x935   :  { %v1254_v17 = vpack.c.bf16 %v7030_v21, %v7028_v14 }
 0x937   :  { %1496 = vmatmul.mubr.bf16.vlgmr.msra.gmra.mrb[20].mxu0 %v1254_v17  ;;  %1539 = vmatmul.mubr.bf16.vlgmr.msra.gmra.mrb[16].mxu1 %v1254_v17 }
 0x938   :  { %5104 = vmatpush3.bf16.msra.mxu0 %v5853_v37  ;;  %5126 = vmatpush3.bf16.msra.mxu1 %v5854_v42 }
 0x939   :  { %5105 = vmatprep.subr.bf16.mxu0 %v5855_v18  ;;  %5127 = vmatprep.subr.bf16.mxu1 %v5856_v4 }
 0x93c   :  { %5106 = vmatpush3.bf16.msra.mxu0 %v5857_v36  ;;  %5128 = vmatpush3.bf16.msra.mxu1 %v5858_v23 }
 0x93d   :  { %5107 = vmatprep.subr.bf16.mxu0 %v5859_v24  ;;  %5129 = vmatprep.subr.bf16.mxu1 %v5860_v31 }
 0x940   :  { %5108 = vmatpush3.bf16.msra.mxu0 %v5861_v30  ;;  %5130 = vmatpush3.bf16.msra.mxu1 %v5862_v48 }
 0x941   :  { %5109 = vmatprep.subr.bf16.mxu0 %v5863_v5  ;;  %5131 = vmatprep.subr.bf16.mxu1 %v5864_v15 }
 0x944   :  { %5110 = vmatpush3.bf16.msra.mxu0 %v5865_v16  ;;  %5132 = vmatpush3.bf16.msra.mxu1 %v5866_v39 }
 0x945   :  { %5111 = vmatprep.subr.bf16.mxu0 %v5867_v41  ;;  %5133 = vmatprep.subr.bf16.mxu1 %v5868_v49 }
 0x948   :  { %5112 = vmatpush3.bf16.msra.mxu0 %v5869_v29  ;;  %5134 = vmatpush3.bf16.msra.mxu1 %v5870_v55 }
 0x949   :  { %5113 = vmatprep.subr.bf16.mxu0 %v5871_v50  ;;  %5135 = vmatprep.subr.bf16.mxu1 %v5872_v52 }
 0x94c   :  { %5114 = vmatpush3.bf16.msra.mxu0 %v5873_v8  ;;  %5136 = vmatpush3.bf16.msra.mxu1 %v5874_v56 }
 0x94d   :  { %5115 = vmatprep.subr.bf16.mxu0 %v5875_v58  ;;  %5137 = vmatprep.subr.bf16.mxu1 %v5876_v9  ;;  %v1628_v9 = vrot.slane %v6823_v12, %v6776_v47 }
 0x950   :  { %5116 = vmatpush3.bf16.msra.mxu0 %v5877_v54  ;;  %5138 = vmatpush3.bf16.msra.mxu1 %v5878_v60 }
 0x951   :  { %5117 = vmatprep.subr.bf16.mxu0 %v5879_v63  ;;  %5139 = vmatprep.subr.bf16.mxu1 %v5880_v35 }
 0x954   :  { %5118 = vmatpush3.bf16.msra.mxu0 %v5881_v45  ;;  %5140 = vmatpush3.bf16.msra.mxu1 %v5882_v46 }
 0x955   :  { %5494 = vmatprep.subr.bf16.mxu1 %v6486_v1 }
 0xa0a   :  { %v1497_v10 = vpop.f32.mrb[20].mxu0  ;;  %v1540_v32 = vpop.f32.mrb[16].mxu1 }
 0xa0b   :  { %v1498_v38 = vadd.f32 %v1497_v10, %v1290_v59  ;;  %v1541_v6 = vadd.f32 %v1540_v32, %v1298_v27  ;;  %v1499_v37 = vpop.f32.mrb[21].mxu0  ;;  %v1542_v42 = vpop.f32.mrb[17].mxu1 }
 0xa0c   :  { %v1500_v17 = vadd.f32 %v1499_v37, %v1294_v2  ;;  %v1543_v18 = vadd.f32 %v1542_v42, %v1302_v7  ;;  %v1501_v4 = vpop.f32.mrb[22].mxu0  ;;  %v1544_v36 = vpop.f32.mrb[18].mxu1 }
 0xa0d   :  { %v1502_v23 = vadd.f32 %v1501_v4, %v1290_v59  ;;  %v1545_v24 = vadd.f32 %v1544_v36, %v1298_v27  ;;  %v1503_v31 = vpop.f32.mrb[23].mxu0  ;;  %v1546_v30 = vpop.f32.mrb[19].mxu1  ;;  %v1549_v5 = vmax.f32 %v1498_v38, 0.0  ;;  %v1551_v13 = vmax.f32 %v1541_v6, 0.0  ;;  %v5889_v4 = vld [vmem:[#allocation9 + $0xdc] ss:$12 sps:$4 sm:$0xff]  }
 0xa0e   :  { %v1504_v11 = vadd.f32 %v1503_v31, %v1294_v2  ;;  %v1547_v48 = vadd.f32 %v1546_v30, %v1302_v7  ;;  %v1550_v39 = vmax.f32 %v1500_v17, 0.0  ;;  %v1552_v41 = vmax.f32 %v1543_v18, 0.0  ;;  %v5883_v17 = vld [vmem:[#allocation9 + $0xc0] ss:$12 sps:$4 sm:$0xff]   ;;  %v5885_v18 = vld [vmem:[#allocation9 + $0xc4] ss:$12 sps:$4 sm:$0xff]  }
 0xa0f   :  { %v1553_v15 = vmax.f32 %v1502_v23, 0.0  ;;  %v1555_v16 = vmax.f32 %v1545_v24, 0.0  ;;  %2124 = vmatprep.subr.bf16.mxu0 %v5885_v18  ;;  %v5890_v36 = vld [vmem:[#allocation9 + $0xe0] ss:$12 sps:$4 sm:$0xff]   ;;  %v5891_v24 = vld [vmem:[#allocation9 + $0xf0] ss:$12 sps:$4 sm:$0xff]  }
 0xa10   :  { %v1554_v49 = vmax.f32 %v1504_v11, 0.0  ;;  %v1556_v29 = vmax.f32 %v1547_v48, 0.0  ;;  %v5893_v23 = vld [vmem:[#allocation9 + $0xf4] ss:$12 sps:$4 sm:$0xff]   ;;  %v5894_v31 = vld [vmem:[#allocation9 + $0xf8] ss:$12 sps:$4 sm:$0xff]  }
 0xa11   :  { %v1557_v55 = vpack.c.bf16 %v1553_v15, %v1549_v5  ;;  %v1559_v50 = vpack.c.bf16 %v1555_v16, %v1551_v13  ;;  %v5897_v30 = vld [vmem:[#allocation9 + $0x10c] ss:$12 sps:$4 sm:$0xff]   ;;  %v5895_v11 = vld [vmem:[#allocation9 + $0x108] ss:$12 sps:$4 sm:$0xff]   ;;  %v5898_v48 = vld [vmem:[#allocation9 + $0x110] ss:$12 sps:$4 sm:$0xff]  }
 0xa12   :  { %v1558_v52 = vpack.c.bf16 %v1554_v49, %v1550_v39  ;;  %v1560_v8 = vpack.c.bf16 %v1556_v29, %v1552_v41  ;;  %v5901_v5 = vld [vmem:[#allocation9 + $0x124] ss:$12 sps:$4 sm:$0xff]   ;;  %v5899_v13 = vld [vmem:[#allocation9 + $0x120] ss:$12 sps:$4 sm:$0xff]   ;;  %v5902_v15 = vld [vmem:[#allocation9 + $0x128] ss:$12 sps:$4 sm:$0xff]  }
 0xa13   :  { %v5905_v16 = vld [vmem:[#allocation9 + $0x13c] ss:$12 sps:$4 sm:$0xff]   ;;  %v5903_v39 = vld [vmem:[#allocation9 + $0x138] ss:$12 sps:$4 sm:$0xff]   ;;  %v5906_v41 = vld [vmem:[#allocation9 + $0x140] ss:$12 sps:$4 sm:$0xff]  }
 0xa14   :  { %1853 = vmatprep.mubr.bf16.mxu0 %v1558_v52  ;;  %1894 = vmatprep.mubr.bf16.mxu1 %v1560_v8  ;;  %v5909_v49 = vld [vmem:[#allocation9 + $0x154] ss:$12 sps:$4 sm:$0xff]   ;;  %v5907_v29 = vld [vmem:[#allocation9 + $0x150] ss:$12 sps:$4 sm:$0xff]   ;;  %v7074_v18 = vsub.s32 7, %v6720_v25 }
 0xa15   :  { %1854 = vmatmul.mubr.bf16.vlgmr.msra.gmra.mrb[24].mxu0 %v1557_v55  ;;  %1895 = vmatmul.mubr.bf16.vlgmr.msra.gmra.mrb[20].mxu1 %v1559_v50  ;;  %v5910_v55 = vld [vmem:[#allocation9 + $0x158] ss:$12 sps:$4 sm:$0xff]   ;;  %v5911_v52 = vld [vmem:[#allocation9 + $0x168] ss:$12 sps:$4 sm:$0xff]   ;;  %v5914_v8 = vld [vmem:[#allocation9 + $0x170] ss:$12 sps:$4 sm:$0xff]  }
 0xa16   :  { %2156 = vmatprep.mubr.bf16.mxu0 %v6488_v22  ;;  %5510 = vmatprep.mubr.msk.bf16.mxu1 %vm6487_vm0, %v6486_v1  ;;  %v5913_v50 = vld [vmem:[#allocation9 + $0x16c] ss:$12 sps:$4 sm:$0xff]  }
 0xa17   :  { %2125 = vmatpush1.bf16.msra.mxu0 %v5883_v17 }
 0xa18   :  { %2126 = vmatprep.subr.bf16.mxu0 %v5889_v4 }
 0xae8   :  { %v5119_v56 = vpop.f32.mrb[24].mxu0  ;;  %v5141_v58 = vpop.f32.mrb[20].mxu1 }
 0xae9   :  { %v5120_v54 = vpop.f32.mrb[25].mxu0  ;;  %v5142_v60 = vpop.f32.mrb[21].mxu1 }
 0xaea   :  { %v5121_v63 = vadd.f32 %v5120_v54, %v5119_v56  ;;  %v5143_v35 = vadd.f32 %v5142_v60, %v5141_v58  ;;  %v5122_v45 = vpop.f32.mrb[26].mxu0  ;;  %v5144_v46 = vpop.f32.mrb[22].mxu1 }
 0xaeb   :  { %v5123_v53 = vpop.f32.mrb[27].mxu0  ;;  %v5145_v59 = vpop.f32.mrb[23].mxu1 }
 0xaec   :  { %v1856_v27 = vadd.f32 %v5121_v63, %v1628_v9  ;;  %v5124_v2 = vadd.f32 %v5123_v53, %v5122_v45  ;;  %v5146_v7 = vadd.f32 %v5145_v59, %v5144_v46 }
 0xaee   :  { %v1897_v10 = vadd.f32 %v5143_v35, %v1856_v27  ;;  %v1859_v32 = vadd.f32 %v5124_v2, %v1628_v9 }
 0xaf0   :  { %v1900_v38 = vadd.f32 %v5146_v7, %v1859_v32  ;;  %v7048_v6 = vadd.f32 %v1897_v10, %v7028_v14  ;;  %v5886_v14 = vld [vmem:[#allocation9 + $0xc8] ss:$12 sps:$4 sm:$0xff]  }
 0xaf1   :  { %5495 = vmatpush3.bf16.msra.mxu1 %v5886_v14 }
 0xaf2   :  { %1905 = vadd.xlane.f32.xlu0 %v7048_v6  ;;  %v7052_v12 = vadd.f32 %v1900_v38, %v7030_v21  ;;  %v1911_v37 = vmul.f32 %v7048_v6, %v7048_v6  ;;  %5496 = vmatprep.subr.bf16.mxu1 %v6486_v1  ;;  %v5887_v21 = vld [vmem:[#allocation9 + $0xd8] ss:$12 sps:$4 sm:$0xff]   ;;  %v7069_v38 = vsub.s32 6, %v6720_v25  ;;  %v7088_v25 = vld [vmem:[#allocation15 + $0x30] sm:$0xff] }
 0xaf3   :  { %2127 = vmatpush1.bf16.msra.mxu0 %v5887_v21 }
 0xaf4   :  { %1907 = vadd.xlane.f32.xlu1 %v7052_v12  ;;  %v1912_v42 = vmul.f32 %v7052_v12, %v7052_v12  ;;  %2128 = vmatprep.subr.bf16.mxu0 %v5893_v23 }
 0xaf5   :  { %5497 = vmatpush3.bf16.msra.mxu1 %v5890_v36 }
 0xaf6   :  { %1913 = vadd.xlane.f32.xlu0 %v1911_v37  ;;  %5498 = vmatprep.subr.bf16.mxu1 %v6486_v1 }
 0xaf7   :  { %2129 = vmatpush1.bf16.msra.mxu0 %v5891_v24 }
 0xaf8   :  { %1915 = vadd.xlane.f32.xlu1 %v1912_v42  ;;  %2130 = vmatprep.subr.bf16.mxu0 %v5897_v30  ;;  %v6183_v42 = vld [vmem:[#allocation15] sm:$0xff] }
 0xaf9   :  { %5499 = vmatpush3.bf16.msra.mxu1 %v5894_v31  ;;  %v1936_v17 = vrot.slane %v6183_v42, %v7069_v38  ;;  %v1942_v31 = vrot.slane %v6183_v42, %v7074_v18  ;;  %v6188_v42 = vld [vmem:[#allocation6 + $0x18] sm:$0xff] }
 0xafa   :  { %5500 = vmatprep.subr.bf16.mxu1 %v6486_v1 }
 0xafb   :  { %2131 = vmatpush1.bf16.msra.mxu0 %v5895_v11 }
 0xafc   :  { %2132 = vmatprep.subr.bf16.mxu0 %v5901_v5  ;;  %v7092_v5 = vld [vmem:[#allocation15 + $0x28] sm:$0xff] }
 0xafd   :  { %5501 = vmatpush3.bf16.msra.mxu1 %v5898_v48 }
 0xafe   :  { %5502 = vmatprep.subr.bf16.mxu1 %v6486_v1 }
 0xaff   :  { %2133 = vmatpush1.bf16.msra.mxu0 %v5899_v13  ;;  %v1995_v13 = vrot.slane %v7088_v25, %v6723_v26 }
 0xb00   :  { %2134 = vmatprep.subr.bf16.mxu0 %v5905_v16  ;;  %v1991_v16 = vrot.slane %v7092_v5, %v6723_v26 }
 0xb01   :  { %5503 = vmatpush3.bf16.msra.mxu1 %v5902_v15 }
 0xb02   :  { %5504 = vmatprep.subr.bf16.mxu1 %v6486_v1 }
 0xb03   :  { %2135 = vmatpush1.bf16.msra.mxu0 %v5903_v39 }
 0xb04   :  { %2136 = vmatprep.subr.bf16.mxu0 %v5909_v49 }
 0xb05   :  { %5505 = vmatpush3.bf16.msra.mxu1 %v5906_v41 }
 0xb06   :  { %5506 = vmatprep.subr.bf16.mxu1 %v6486_v1 }
 0xb07   :  { %2137 = vmatpush1.bf16.msra.mxu0 %v5907_v29 }
 0xb08   :  { %2138 = vmatprep.subr.bf16.mxu0 %v5913_v50 }
 0xb09   :  { %5507 = vmatpush3.bf16.msra.mxu1 %v5910_v55 }
 0xb0a   :  { %5508 = vmatprep.subr.bf16.mxu1 %v6486_v1 }
 0xb0b   :  { %2139 = vmatpush1.bf16.msra.mxu0 %v5911_v52 }
 0xb0c   :  { %5514 = vmatprep.subr.bf16.mxu0 %v6486_v1 }
 0xb0d   :  { %5509 = vmatpush3.bf16.msra.mxu1 %v5914_v8 }
 0xb0e   :  { %5534 = vmatprep.subr.bf16.mxu1 %v6486_v1 }
 0xb7f   :  { %v1906_v56 = vpop.xlane.xlu0 %1905 }
 0xb80   :  { %v1909_v58 = vmul.f32 0.0078125, %v1906_v56 }
 0xb81   :  { %v1908_v9 = vpop.xlane.xlu1 %1907 }
 0xb82   :  { %v1910_v54 = vmul.f32 0.0078125, %v1908_v9  ;;  %v1919_v63 = vmul.f32 %v1909_v58, %v1909_v58  ;;  %v1925_v37 = vsub.f32 %v7048_v6, %v1909_v58 }
 0xb83   :  { %v1914_v60 = vpop.xlane.xlu0 %1913 }
 0xb84   :  { %v1917_v35 = vmul.f32 0.0078125, %v1914_v60  ;;  %v1920_v46 = vmul.f32 %v1910_v54, %v1910_v54  ;;  %v1926_v21 = vsub.f32 %v7052_v12, %v1910_v54  ;;  %v7090_v12 = vld [vmem:[#allocation15 + $0x20] sm:$0xff] }
 0xb85   :  { %v1916_v45 = vpop.xlane.xlu1 %1915  ;;  %v1987_v15 = vrot.slane %v7090_v12, %v6723_v26 }
 0xb86   :  { %v1921_v53 = vsub.f32 %v1917_v35, %v1919_v63  ;;  %v1918_v59 = vmul.f32 0.0078125, %v1916_v45  ;;  %v6184_v63 = vld [vmem:[#allocation6] sm:$0xff]  ;;  %v6185_v45 = vld [vmem:[#allocation6 + $0x10] sm:$0xff] }
 0xb88   :  { %v1923_v27 = vmax.f32 %v1921_v53, 0.0  ;;  %v1922_v2 = vsub.f32 %v1918_v59, %v1920_v46 }
 0xb8a   :  { %v1927_v7 = vadd.f32 1e-05, %v1923_v27  ;;  %v1924_v10 = vmax.f32 %v1922_v2, 0.0  ;;  %v6186_v27 = vld [vmem:[#allocation6 + $0x20] sm:$0xff] }
 0xb8c   :  { %6147 = vrsqrt.f32 %v1927_v7  ;;  %v1928_v32 = vadd.f32 1e-05, %v1924_v10 }
 0xb8e   :  { %6149 = vrsqrt.f32 %v1928_v32  ;;  %v6187_v32 = vld [vmem:[#allocation6 + $0x8] sm:$0xff] }
 0xb96   :  { %v6148_v14 = vpop.eup %6147 }
 0xb97   :  { %v1931_v4 = vmul.f32 %v6148_v14, %v1925_v37  ;;  %v6189_v14 = vld [vmem:[#allocation6 + $0x28] sm:$0xff] }
 0xb98   :  { %v6150_v36 = vpop.eup %6149 }
 0xb99   :  { %v1932_v23 = vmul.f32 %v6150_v36, %v1926_v21  ;;  %v1937_v24 = vmul.f32 %v1936_v17, %v1931_v4 }
 0xb9b   :  { %v1938_v30 = vmul.f32 %v1936_v17, %v1932_v23  ;;  %v7078_v11 = vadd.f32 %v1942_v31, %v1937_v24  ;;  %v6190_v23 = vld [vmem:[#allocation6 + $0x30] sm:$0xff] }
 0xb9d   :  { %v7080_v48 = vadd.f32 %v1942_v31, %v1938_v30  ;;  %v6191_v31 = vld [vmem:[#allocation6 + $0x38] sm:$0xff] }
 0xb9f   :  { %v1950_v6 = vpack.c.bf16 %v7080_v48, %v7078_v11 }
 0xba1   :  { %2157 = vmatmul.mubr.bf16.vlgmr.msra.gmra.mrb[28].mxu0 %v1950_v6  ;;  %5511 = vmatmul.mubr.bf16.vlgmr.msra.gmra.mrb[24].mxu1 %v1950_v6 }
 0xba2   :  { %5530 = vmatprep.mubr.msk.bf16.mxu0 %vm6487_vm0, %v6486_v1  ;;  %5550 = vmatprep.mubr.msk.bf16.mxu1 %vm6487_vm0, %v6486_v1 }
 0xc74   :  { %v2158_v39 = vpop.f32.mrb[28].mxu0  ;;  %v2201_v41 = vpop.f32.mrb[24].mxu1 }
 0xc75   :  { %v7100_v49 = vadd.f32 %v2201_v41, %v1995_v13  ;;  %v2160_v29 = vpop.f32.mrb[29].mxu0  ;;  %v5512_v55 = vpop.f32.mrb[25].mxu1  ;;  %v7102_v50 = vadd.f32 %v2158_v39, %v1987_v15 }
 0xc76   :  { %v7104_v52 = vadd.f32 %v2160_v29, %v1991_v16  ;;  %v2162_v8 = vpop.f32.mrb[30].mxu0  ;;  %v2204_v56 = vpop.f32.mrb[26].mxu1 }
 0xc77   :  { %v7106_v58 = vadd.f32 %v2162_v8, %v1987_v15  ;;  %v2205_v9 = vadd.f32 %v2204_v56, %v1995_v13  ;;  %v2164_v54 = vpop.f32.mrb[31].mxu0  ;;  %v5513_v60 = vpop.f32.mrb[27].mxu1  ;;  %v2232_v35 = vmul.f32 %v6184_v63, %v7100_v49  ;;  %v2234_v46 = vmul.f32 %v6185_v45, %v7100_v49  ;;  %v6193_v8 = vld [vmem:[#allocation6 + $0x48] sm:$0xff] }
 0xc78   :  { %v7110_v53 = vadd.f32 %v2164_v54, %v1991_v16  ;;  %v2208_v59 = vmul.f32 %v6184_v63, %v7104_v52  ;;  %v7114_v2 = vmul.f32 %v6186_v27, %v7100_v49  ;;  %v7117_v7 = vmul.f32 %v6185_v45, %v7104_v52  ;;  %v6192_v16 = vld [vmem:[#allocation6 + $0x40] sm:$0xff]  ;;  %v6194_v63 = vld [vmem:[#allocation6 + $0x50] sm:$0xff]  ;;  %v6195_v45 = vld [vmem:[#allocation6 + $0x58] sm:$0xff] }
 0xc79   :  { %v2256_v10 = vpack.c.bf16 %v7106_v58, %v7102_v50  ;;  %v2233_v37 = vmul.f32 %v6187_v32, %v2205_v9  ;;  %v2235_v17 = vmul.f32 %v6188_v42, %v2205_v9  ;;  %v2237_v21 = vmul.f32 %v6189_v14, %v2205_v9  ;;  %v6201_v50 = vld [vmem:[%s7447_s2 + $0x8] sm:$0xff] }
 0xc7a   :  { %v2209_v4 = vmul.f32 %v6187_v32, %v7110_v53  ;;  %v2211_v36 = vmul.f32 %v6188_v42, %v7110_v53  ;;  %v2238_v24 = vmul.f32 %v6190_v23, %v7100_v49  ;;  %v2239_v30 = vmul.f32 %v6191_v31, %v2205_v9  ;;  %v6197_v32 = vld [vmem:[#allocation6 + $0x68] sm:$0xff] }
 0xc7b   :  { %v2248_v6 = vpack.c.bf16 %v2233_v37, %v2232_v35  ;;  %v2249_v13 = vpack.c.bf16 %v2235_v17, %v2234_v46  ;;  %v2250_v15 = vpack.c.bf16 %v2237_v21, %v7114_v2  ;;  %v2240_v39 = vmul.f32 %v6192_v16, %v7100_v49 }
 0xc7c   :  { %v2224_v41 = vpack.c.bf16 %v2209_v4, %v2208_v59  ;;  %v2225_v29 = vpack.c.bf16 %v2211_v36, %v7117_v7  ;;  %v2251_v55 = vpack.c.bf16 %v2239_v30, %v2238_v24  ;;  %v2241_v56 = vmul.f32 %v6193_v8, %v2205_v9  ;;  %v6196_v59 = vld [vmem:[#allocation6 + $0x60] sm:$0xff]  ;;  %v6198_v4 = vld [vmem:[#allocation6 + $0x70] sm:$0xff]  ;;  %v6199_v24 = vld [vmem:[#allocation6 + $0x78] sm:$0xff] }
 0xc7d   :  { %5535 = vmatpush3.bf16.msra.mxu1 %v2248_v6  ;;  %v2212_v54 = vmul.f32 %v6186_v27, %v7104_v52  ;;  %v2213_v60 = vmul.f32 %v6189_v14, %v7110_v53  ;;  %v2242_v35 = vmul.f32 %v6194_v63, %v7100_v49  ;;  %v2243_v46 = vmul.f32 %v6195_v45, %v2205_v9 }
 0xc7e   :  { %5515 = vmatpush3.bf16.xpose.msra.mxu0 %v2224_v41  ;;  %5536 = vmatprep.subr.bf16.mxu1 %v6486_v1  ;;  %v2252_v2 = vpack.c.bf16 %v2241_v56, %v2240_v39  ;;  %v2244_v7 = vmul.f32 %v6196_v59, %v7100_v49  ;;  %v2245_v37 = vmul.f32 %v6197_v32, %v2205_v9 }
 0xc7f   :  { %5516 = vmatprep.subr.bf16.mxu0 %v6486_v1  ;;  %v2226_v42 = vpack.c.bf16 %v2213_v60, %v2212_v54  ;;  %v2253_v27 = vpack.c.bf16 %v2243_v46, %v2242_v35  ;;  %v2214_v17 = vmul.f32 %v6190_v23, %v7104_v52  ;;  %v2215_v14 = vmul.f32 %v6191_v31, %v7110_v53 }
 0xc80   :  { %v2254_v21 = vpack.c.bf16 %v2245_v37, %v2244_v7  ;;  %v2246_v36 = vmul.f32 %v6198_v4, %v7100_v49  ;;  %v2247_v30 = vmul.f32 %v6199_v24, %v2205_v9  ;;  %v2216_v6 = vmul.f32 %v6192_v16, %v7104_v52 }
 0xc81   :  { %5537 = vmatpush3.bf16.msra.mxu1 %v2249_v13  ;;  %v2227_v39 = vpack.c.bf16 %v2215_v14, %v2214_v17  ;;  %v2217_v41 = vmul.f32 %v6193_v8, %v7110_v53  ;;  %v2218_v56 = vmul.f32 %v6194_v63, %v7104_v52  ;;  %v2219_v54 = vmul.f32 %v6195_v45, %v7110_v53  ;;  %v6200_v45 = vld [vmem:[%s7447_s2] sm:$0xff] }
 0xc82   :  { %5538 = vmatprep.subr.bf16.mxu1 %v6486_v1  ;;  %v2255_v23 = vpack.c.bf16 %v2247_v30, %v2246_v36  ;;  %v2220_v31 = vmul.f32 %v6196_v59, %v7104_v52  ;;  %v2221_v60 = vmul.f32 %v6197_v32, %v7110_v53  ;;  %v2222_v9 = vmul.f32 %v6198_v4, %v7104_v52  ;;  %v5915_v14 = vld [vmem:[#allocation10 + $0x40] sm:$0xff]   ;;  %v5917_v4 = vld [vmem:[#allocation10 + $0x50] sm:$0xff]   ;;  %v5918_v36 = vld [vmem:[#allocation10 + $0x58] sm:$0xff]  }
 0xc83   :  { %v2228_v49 = vpack.c.bf16 %v2217_v41, %v2216_v6  ;;  %v2229_v35 = vpack.c.bf16 %v2219_v54, %v2218_v56  ;;  %v2223_v13 = vmul.f32 %v6199_v24, %v7110_v53  ;;  %v5919_v24 = vld [vmem:[#allocation10 + $0x60] sm:$0xff]   ;;  %v5920_v30 = vld [vmem:[#allocation10 + $0x68] sm:$0xff]   ;;  %v5921_v6 = vld [vmem:[#allocation10 + $0x70] sm:$0xff]  }
 0xc84   :  { %v2230_v16 = vpack.c.bf16 %v2221_v60, %v2220_v31 }
 0xc85   :  { %5539 = vmatpush3.bf16.msra.mxu1 %v2250_v15  ;;  %v2231_v8 = vpack.c.bf16 %v2223_v13, %v2222_v9 }
 0xc86   :  { %5517 = vmatpush3.bf16.xpose.msra.mxu0 %v2225_v29  ;;  %5540 = vmatprep.subr.bf16.mxu1 %v6486_v1 }
 0xc87   :  { %5518 = vmatprep.subr.bf16.mxu0 %v6486_v1 }
 0xc89   :  { %5541 = vmatpush3.bf16.msra.mxu1 %v2251_v55 }
 0xc8a   :  { %5542 = vmatprep.subr.bf16.mxu1 %v6486_v1 }
 0xc8d   :  { %5543 = vmatpush3.bf16.msra.mxu1 %v2252_v2 }
 0xc8e   :  { %5519 = vmatpush3.bf16.xpose.msra.mxu0 %v2226_v42  ;;  %5544 = vmatprep.subr.bf16.mxu1 %v6486_v1 }
 0xc8f   :  { %5520 = vmatprep.subr.bf16.mxu0 %v6486_v1 }
 0xc91   :  { %5545 = vmatpush3.bf16.msra.mxu1 %v2253_v27 }
 0xc92   :  { %5546 = vmatprep.subr.bf16.mxu1 %v6486_v1 }
 0xc95   :  { %5547 = vmatpush3.bf16.msra.mxu1 %v2254_v21  ;;  %v5916_v21 = vld [vmem:[#allocation10 + $0x48] sm:$0xff]  }
 0xc96   :  { %5521 = vmatpush3.bf16.xpose.msra.mxu0 %v2227_v39  ;;  %5548 = vmatprep.subr.bf16.mxu1 %v6486_v1  ;;  %v5922_v39 = vld [vmem:[#allocation10 + $0x78] sm:$0xff]  }
 0xc97   :  { %5522 = vmatprep.subr.bf16.mxu0 %v6486_v1 }
 0xc99   :  { %5549 = vmatpush3.bf16.msra.mxu1 %v2255_v23 }
 0xc9a   :  { %5554 = vmatprep.subr.bf16.mxu1 %v6486_v1 }
 0xc9e   :  { %5523 = vmatpush3.bf16.xpose.msra.mxu0 %v2228_v49 }
 0xc9f   :  { %5524 = vmatprep.subr.bf16.mxu0 %v6486_v1 }
 0xca6   :  { %5525 = vmatpush3.bf16.xpose.msra.mxu0 %v2229_v35 }
 0xca7   :  { %5526 = vmatprep.subr.bf16.mxu0 %v6486_v1 }
 0xcae   :  { %5527 = vmatpush3.bf16.xpose.msra.mxu0 %v2230_v16 }
 0xcaf   :  { %5528 = vmatprep.subr.bf16.mxu0 %v6486_v1 }
 0xcb6   :  { %5529 = vmatpush3.bf16.xpose.msra.mxu0 %v2231_v8 }
 0xcb7   :  { %5574 = vmatprep.subr.bf16.mxu0 %v6486_v1 }
 0xcbd   :  { %5531 = vmatmul.mubr.bf16.vlgmr.msra.gmra.mrb[32].mxu0 %v2256_v10 }
 0xcbe   :  { %5590 = vmatprep.mubr.msk.bf16.mxu0 %vm6487_vm0, %v6486_v1  ;;  %5575 = vmatpush3.bf16.msra.mxu0 %v5915_v14  ;;  %v5934_v14 = vld [vmem:[#allocation12 + $0x12c] ss:$16 sps:$4 sm:$0xff]  }
 0xcbf   :  { %5576 = vmatprep.subr.bf16.mxu0 %v6486_v1 }
 0xcc2   :  { %5577 = vmatpush3.bf16.msra.mxu0 %v5916_v21  ;;  %v5937_v21 = vld [vmem:[#allocation12 + $0x144] ss:$16 sps:$4 sm:$0xff]  }
 0xcc3   :  { %5578 = vmatprep.subr.bf16.mxu0 %v6486_v1 }
 0xcc6   :  { %5579 = vmatpush3.bf16.msra.mxu0 %v5917_v4  ;;  %v5935_v4 = vld [vmem:[#allocation12 + $0x140] ss:$16 sps:$4 sm:$0xff]  }
 0xcc7   :  { %5580 = vmatprep.subr.bf16.mxu0 %v6486_v1 }
 0xcca   :  { %5581 = vmatpush3.bf16.msra.mxu0 %v5918_v36  ;;  %v5940_v36 = vld [vmem:[#allocation12 + $0x14c] ss:$16 sps:$4 sm:$0xff]  }
 0xccb   :  { %5582 = vmatprep.subr.bf16.mxu0 %v6486_v1 }
 0xcce   :  { %5583 = vmatpush3.bf16.msra.mxu0 %v5919_v24  ;;  %v5938_v24 = vld [vmem:[#allocation12 + $0x148] ss:$16 sps:$4 sm:$0xff]  }
 0xccf   :  { %5584 = vmatprep.subr.bf16.mxu0 %v6486_v1 }
 0xcd2   :  { %5585 = vmatpush3.bf16.msra.mxu0 %v5920_v30  ;;  %v5943_v30 = vld [vmem:[#allocation12 + $0x164] ss:$16 sps:$4 sm:$0xff]  }
 0xcd3   :  { %5586 = vmatprep.subr.bf16.mxu0 %v6486_v1 }
 0xcd6   :  { %5587 = vmatpush3.bf16.msra.mxu0 %v5921_v6  ;;  %v5946_v6 = vld [vmem:[#allocation12 + $0x16c] ss:$16 sps:$4 sm:$0xff]  }
 0xcd7   :  { %5588 = vmatprep.subr.bf16.mxu0 %v6486_v1 }
 0xcda   :  { %5589 = vmatpush3.bf16.msra.mxu0 %v5922_v39  ;;  %v5941_v39 = vld [vmem:[#allocation12 + $0x160] ss:$16 sps:$4 sm:$0xff]  }
 0xd90   :  { %v2291_v52 = vpop.f32.mrb[32].mxu0 }
 0xd91   :  { %v2298_v53 = vmul.f32 0.25, %v2291_v52  ;;  %v5532_v15 = vpop.f32.mrb[33].mxu0 }
 0xd92   :  { %v2294_v29 = vpop.f32.mrb[34].mxu0 }
 0xd93   :  { %v2299_v55 = vmul.f32 0.25, %v2294_v29  ;;  %v5533_v63 = vpop.f32.mrb[35].mxu0  ;;  %v2300_v46 = vadd.f32 %v6200_v45, %v2298_v53  ;;  %v2422_v29 = vrot.slane %v7090_v12, %v6735_v40 }
 0xd95   :  { %2302 = vmax.xlane.f32.xlu0 %v2300_v46  ;;  %v2301_v58 = vadd.f32 %v6201_v50, %v2299_v55 }
 0xd97   :  { %2304 = vmax.xlane.f32.xlu1 %v2301_v58 }
 0xe22   :  { %v2303_v10 = vpop.xlane.xlu0 %2302 }
 0xe23   :  { %v2306_v2 = vsub.f32 %v2300_v46, %v2303_v10 }
 0xe24   :  { %v2305_v59 = vpop.xlane.xlu1 %2304 }
 0xe25   :  { %v2308_v7 = vmul.f32 1.442695, %v2306_v2  ;;  %v2307_v32 = vsub.f32 %v2301_v58, %v2305_v59 }
 0xe27   :  { %v2310_v37 = vmul.f32 1.442695, %v2307_v32  ;;  %6151 = vpow2.f32 %v2308_v7  ;;  %v5923_v32 = vld [vmem:[#allocation12 + $0x100] ss:$16 sps:$4 sm:$0xff]  }
 0xe29   :  { %6153 = vpow2.f32 %v2310_v37  ;;  %v5926_v37 = vld [vmem:[#allocation12 + $0x108] ss:$16 sps:$4 sm:$0xff]  }
 0xe31   :  { %v6152_v42 = vpop.eup %6151 }
 0xe33   :  { %v6154_v27 = vpop.eup %6153 }
 0xe34   :  { %v2312_v17 = vpack.c.bf16 %v6154_v27, %v6152_v42  ;;  %v5928_v42 = vld [vmem:[#allocation12 + $0x10c] ss:$16 sps:$4 sm:$0xff]   ;;  %v5931_v27 = vld [vmem:[#allocation12 + $0x124] ss:$16 sps:$4 sm:$0xff]  }
 0xe35   :  { %2807 = vmatprep.subr.bf16.mxu0 %v5928_v42 }
 0xe36   :  { %5551 = vmatmul.mubr.bf16.vlgmr.msra.gmra.mrb[28].mxu1 %v2312_v17 }
 0xe37   :  { %5555 = vmatpush3.bf16.msra.mxu1 %v6952_v61  ;;  %5570 = vmatprep.mubr.msk.bf16.mxu1 %vm6487_vm0, %v6486_v1 }
 0xe38   :  { %5556 = vmatprep.subr.bf16.mxu1 %v6486_v1 }
 0xe3b   :  { %5557 = vmatpush3.bf16.msra.mxu1 %v6957_v57 }
 0xe3c   :  { %5558 = vmatprep.subr.bf16.mxu1 %v6486_v1 }
 0xe3f   :  { %5559 = vmatpush3.bf16.msra.mxu1 %v6965_v3 }
 0xe40   :  { %5560 = vmatprep.subr.bf16.mxu1 %v6486_v1 }
 0xe43   :  { %5561 = vmatpush3.bf16.msra.mxu1 %v6971_v19 }
 0xe44   :  { %5562 = vmatprep.subr.bf16.mxu1 %v6486_v1 }
 0xe47   :  { %5563 = vmatpush3.bf16.msra.mxu1 %v6977_v20 }
 0xe48   :  { %5564 = vmatprep.subr.bf16.mxu1 %v6486_v1 }
 0xe4b   :  { %5565 = vmatpush3.bf16.msra.mxu1 %v6983_v28 }
 0xe4c   :  { %5566 = vmatprep.subr.bf16.mxu1 %v6486_v1 }
 0xe4f   :  { %5567 = vmatpush3.bf16.msra.mxu1 %v6989_v33 }
 0xe50   :  { %5568 = vmatprep.subr.bf16.mxu1 %v6486_v1 }
 0xe53   :  { %5569 = vmatpush3.bf16.msra.mxu1 %v6995_v34 }
 0xe56   :  { %5571 = vmatmul.mubr.bf16.vlgmr.msra.gmra.mrb[32].mxu1 %v2312_v17  ;;  %v5932_v17 = vld [vmem:[#allocation12 + $0x128] ss:$16 sps:$4 sm:$0xff]  }
 0xe57   :  { %2796 = vmatprep.mubr.bf16.mxu1 %v6488_v22 }
 0xf09   :  { %v2347_v41 = vpop.f32.mrb[28].mxu1 }
 0xf0a   :  { %v5552_v56 = vpop.f32.mrb[29].mxu1 }
 0xf0b   :  { %v2350_v54 = vpop.f32.mrb[30].mxu1  ;;  %v5949_v56 = vld [vmem:[#allocation12 + $0x184] ss:$16 sps:$4 sm:$0xff]  }
 0xf0c   :  { %v5553_v23 = vpop.f32.mrb[31].mxu1 }
 0xf0d   :  { %v5947_v23 = vld [vmem:[#allocation12 + $0x180] ss:$16 sps:$4 sm:$0xff]  }
 0xf29   :  { %v2388_v31 = vpop.f32.mrb[32].mxu1 }
 0xf2a   :  { %v2395_v60 = vmax.f32 %v2388_v31, 1e-20  ;;  %v5572_v49 = vpop.f32.mrb[33].mxu1  ;;  %v5950_v31 = vld [vmem:[#allocation12 + $0x188] ss:$16 sps:$4 sm:$0xff]  }
 0xf2b   :  { %v2391_v35 = vpop.f32.mrb[34].mxu1  ;;  %v5958_v49 = vld [vmem:[#allocation12 + $0x1ac] ss:$16 sps:$4 sm:$0xff]  }
 0xf2c   :  { %6155 = vrcp.f32 %v2395_v60  ;;  %v2396_v9 = vmax.f32 %v2391_v35, 1e-20  ;;  %v5573_v13 = vpop.f32.mrb[35].mxu1  ;;  %v5955_v60 = vld [vmem:[#allocation12 + $0x1a4] ss:$16 sps:$4 sm:$0xff]  }
 0xf2d   :  { %v5953_v35 = vld [vmem:[#allocation12 + $0x1a0] ss:$16 sps:$4 sm:$0xff]   ;;  %v5961_v13 = vld [vmem:[#allocation12 + $0x1c4] ss:$16 sps:$4 sm:$0xff]  }
 0xf2e   :  { %6157 = vrcp.f32 %v2396_v9  ;;  %v5956_v9 = vld [vmem:[#allocation12 + $0x1a8] ss:$16 sps:$4 sm:$0xff]  }
 0xf36   :  { %v6156_v16 = vpop.eup %6155 }
 0xf37   :  { %v2399_v8 = vmul.f32 %v6156_v16, %v2347_v41  ;;  %v5944_v41 = vld [vmem:[#allocation12 + $0x168] ss:$16 sps:$4 sm:$0xff]   ;;  %v5964_v16 = vld [vmem:[#allocation12 + $0x1cc] ss:$16 sps:$4 sm:$0xff]  }
 0xf38   :  { %v6158_v52 = vpop.eup %6157 }
 0xf39   :  { %v2400_v53 = vmul.f32 %v6158_v52, %v2350_v54  ;;  %v5952_v54 = vld [vmem:[#allocation12 + $0x18c] ss:$16 sps:$4 sm:$0xff]   ;;  %v5962_v52 = vld [vmem:[#allocation12 + $0x1c8] ss:$16 sps:$4 sm:$0xff]  }
 0xf3b   :  { %v2401_v15 = vpack.c.bf16 %v2400_v53, %v2399_v8  ;;  %v5959_v8 = vld [vmem:[#allocation12 + $0x1c0] ss:$16 sps:$4 sm:$0xff]   ;;  %v5967_v53 = vld [vmem:[#allocation12 + $0x1e4] ss:$16 sps:$4 sm:$0xff]  }
 0xf3d   :  { %5591 = vmatmul.mubr.bf16.vlgmr.msra.gmra.mrb[36].mxu0 %v2401_v15  ;;  %v5970_v15 = vld [vmem:[#allocation12 + $0x1ec] ss:$16 sps:$4 sm:$0xff]  }
 0xf3e   :  { %2839 = vmatprep.mubr.bf16.mxu0 %v6488_v22  ;;  %2808 = vmatpush1.bf16.msra.mxu0 %v5926_v37 }
 0xf3f   :  { %2809 = vmatprep.subr.bf16.mxu0 %v5934_v14 }
 0xf42   :  { %2810 = vmatpush1.bf16.msra.mxu0 %v5932_v17 }
 0xf43   :  { %2811 = vmatprep.subr.bf16.mxu0 %v5940_v36 }
 0xf46   :  { %2812 = vmatpush1.bf16.msra.mxu0 %v5938_v24 }
 0xf47   :  { %2813 = vmatprep.subr.bf16.mxu0 %v5946_v6 }
 0xf4a   :  { %2814 = vmatpush1.bf16.msra.mxu0 %v5944_v41 }
 0xf4b   :  { %2815 = vmatprep.subr.bf16.mxu0 %v5952_v54 }
 0xf4e   :  { %2816 = vmatpush1.bf16.msra.mxu0 %v5950_v31  ;;  %v2551_v31 = vrot.slane %v7090_v12, %v6767_v43 }
 0xf4f   :  { %2817 = vmatprep.subr.bf16.mxu0 %v5958_v49 }
 0xf52   :  { %2818 = vmatpush1.bf16.msra.mxu0 %v5956_v9  ;;  %v5973_v9 = vld [vmem:[#allocation13 + $0x100] sm:$0xff]  }
 0xf53   :  { %2819 = vmatprep.subr.bf16.mxu0 %v5964_v16  ;;  %v5975_v16 = vld [vmem:[#allocation13 + $0x148] sm:$0xff]  }
 0xf56   :  { %2820 = vmatpush1.bf16.msra.mxu0 %v5962_v52  ;;  %v5978_v52 = vld [vmem:[#allocation13 + $0x188] sm:$0xff]  }
 0xf57   :  { %2821 = vmatprep.subr.bf16.mxu0 %v5970_v15  ;;  %v5980_v15 = vld [vmem:[#allocation13 + $0x1d0] sm:$0xff]  }
0x1010   :  { %v2505_v55 = vpop.f32.mrb[36].mxu0 }
0x1011   :  { %v2506_v63 = vadd.f32 %v2505_v55, %v2422_v29  ;;  %v5592_v45 = vpop.f32.mrb[37].mxu0  ;;  %v5968_v55 = vld [vmem:[#allocation12 + $0x1e8] ss:$16 sps:$4 sm:$0xff]  }
0x1012   :  { %v2508_v46 = vpop.f32.mrb[38].mxu0  ;;  %v5972_v45 = vld [vmem:[#allocation13 + $0x1c0] sm:$0xff]   ;;  %2822 = vmatpush1.bf16.msra.mxu0 %v5968_v55  ;;  %v5982_v55 = vld [vmem:[#allocation13 + $0x190] sm:$0xff]  }
0x1013   :  { %v7198_v50 = vadd.f32 %v2506_v63, %v7078_v11  ;;  %v2509_v58 = vadd.f32 %v2508_v46, %v2422_v29  ;;  %v5593_v10 = vpop.f32.mrb[39].mxu0  ;;  %v5925_v11 = vld [vmem:[#allocation12 + $0x104] ss:$16 sps:$4 sm:$0xff]   ;;  %v5965_v29 = vld [vmem:[#allocation12 + $0x1e0] ss:$16 sps:$4 sm:$0xff]   ;;  %5214 = vmatprep.subr.bf16.mxu0 %v5972_v45  ;;  %v5984_v45 = vld [vmem:[#allocation13 + $0x1d8] sm:$0xff]  }
0x1014   :  { %2764 = vmatprep.subr.bf16.mxu1 %v5925_v11  ;;  %v5971_v63 = vld [vmem:[#allocation13 + $0x140] sm:$0xff]  }
0x1015   :  { %v7201_v2 = vadd.f32 %v2509_v58, %v7080_v48  ;;  %2514 = vadd.xlane.f32.xlu0 %v7198_v50  ;;  %v2520_v59 = vmul.f32 %v7198_v50, %v7198_v50  ;;  %2765 = vmatpush1.bf16.msra.mxu1 %v5923_v32  ;;  %v5929_v48 = vld [vmem:[#allocation12 + $0x120] ss:$16 sps:$4 sm:$0xff]  }
0x1016   :  { %2766 = vmatprep.subr.bf16.mxu1 %v5931_v27 }
0x1017   :  { %2516 = vadd.xlane.f32.xlu1 %v7201_v2  ;;  %v2521_v7 = vmul.f32 %v7201_v2, %v7201_v2 }
0x1019   :  { %2522 = vadd.xlane.f32.xlu0 %v2520_v59  ;;  %2767 = vmatpush1.bf16.msra.mxu1 %v5929_v48 }
0x101a   :  { %2768 = vmatprep.subr.bf16.mxu1 %v5937_v21 }
0x101b   :  { %2524 = vadd.xlane.f32.xlu1 %v2521_v7 }
0x101d   :  { %2769 = vmatpush1.bf16.msra.mxu1 %v5935_v4 }
0x101e   :  { %2770 = vmatprep.subr.bf16.mxu1 %v5943_v30  ;;  %v2545_v30 = vrot.slane %v7090_v12, %v6742_v51 }
0x1021   :  { %2771 = vmatpush1.bf16.msra.mxu1 %v5941_v39 }
0x1022   :  { %2772 = vmatprep.subr.bf16.mxu1 %v5949_v56 }
0x1025   :  { %2773 = vmatpush1.bf16.msra.mxu1 %v5947_v23 }
0x1026   :  { %2774 = vmatprep.subr.bf16.mxu1 %v5955_v60 }
0x1029   :  { %2775 = vmatpush1.bf16.msra.mxu1 %v5953_v35 }
0x102a   :  { %2776 = vmatprep.subr.bf16.mxu1 %v5961_v13 }
0x102d   :  { %2777 = vmatpush1.bf16.msra.mxu1 %v5959_v8  ;;  %v5976_v8 = vld [vmem:[#allocation13 + $0x1c8] sm:$0xff]  }
0x102e   :  { %2778 = vmatprep.subr.bf16.mxu1 %v5967_v53  ;;  %v5979_v53 = vld [vmem:[#allocation13 + $0x150] sm:$0xff]  }
0x1031   :  { %2779 = vmatpush1.bf16.msra.mxu1 %v5965_v29  ;;  %v5981_v29 = vld [vmem:[#allocation13 + $0x110] sm:$0xff]  }
0x1032   :  { %5192 = vmatprep.subr.bf16.mxu1 %v5971_v63  ;;  %v5983_v63 = vld [vmem:[#allocation13 + $0x158] sm:$0xff]  }
0x10a2   :  { %v2515_v46 = vpop.xlane.xlu0 %2514 }
0x10a3   :  { %v2518_v58 = vmul.f32 0.0078125, %v2515_v46  ;;  %v5985_v46 = vld [vmem:[#allocation13 + $0x118] sm:$0xff]  }
0x10a4   :  { %v2517_v10 = vpop.xlane.xlu1 %2516 }
0x10a5   :  { %v2519_v59 = vmul.f32 0.0078125, %v2517_v10  ;;  %v2528_v32 = vmul.f32 %v2518_v58, %v2518_v58  ;;  %v2534_v24 = vsub.f32 %v7198_v50, %v2518_v58  ;;  %v5974_v50 = vld [vmem:[#allocation13 + $0x180] sm:$0xff]   ;;  %v5986_v58 = vld [vmem:[#allocation13 + $0x198] sm:$0xff]  }
0x10a6   :  { %v2523_v7 = vpop.xlane.xlu0 %2522  ;;  %v5987_v10 = vld [vmem:[#allocation13 + $0x160] sm:$0xff]  }
0x10a7   :  { %v2526_v11 = vmul.f32 0.0078125, %v2523_v7  ;;  %v2529_v42 = vmul.f32 %v2519_v59, %v2519_v59  ;;  %v2535_v39 = vsub.f32 %v7201_v2, %v2519_v59  ;;  %v5977_v2 = vld [vmem:[#allocation13 + $0x108] sm:$0xff]   ;;  %v5988_v59 = vld [vmem:[#allocation13 + $0x1e0] sm:$0xff]  }
0x10a8   :  { %v2525_v37 = vpop.xlane.xlu1 %2524  ;;  %v5989_v7 = vld [vmem:[#allocation13 + $0x120] sm:$0xff]  }
0x10a9   :  { %v2530_v48 = vsub.f32 %v2526_v11, %v2528_v32  ;;  %v2527_v27 = vmul.f32 0.0078125, %v2525_v37  ;;  %v5990_v32 = vld [vmem:[#allocation13 + $0x1a0] sm:$0xff]   ;;  %v5991_v11 = vld [vmem:[#allocation13 + $0x168] sm:$0xff]  }
0x10aa   :  { %v5992_v37 = vld [vmem:[#allocation13 + $0x1e8] sm:$0xff]  }
0x10ab   :  { %v2532_v17 = vmax.f32 %v2530_v48, 0.0  ;;  %v2531_v14 = vsub.f32 %v2527_v27, %v2529_v42  ;;  %v5993_v42 = vld [vmem:[#allocation13 + $0x128] sm:$0xff]   ;;  %v5995_v27 = vld [vmem:[#allocation13 + $0x170] sm:$0xff]  }
0x10ac   :  { %v5994_v48 = vld [vmem:[#allocation13 + $0x1a8] sm:$0xff]  }
0x10ad   :  { %v2536_v21 = vadd.f32 1e-05, %v2532_v17  ;;  %v2533_v4 = vmax.f32 %v2531_v14, 0.0  ;;  %v5996_v17 = vld [vmem:[#allocation13 + $0x1f0] sm:$0xff]  }
0x10ae   :  { %v5997_v14 = vld [vmem:[#allocation13 + $0x130] sm:$0xff]  }
0x10af   :  { %6159 = vrsqrt.f32 %v2536_v21  ;;  %v2537_v36 = vadd.f32 1e-05, %v2533_v4  ;;  %v5998_v21 = vld [vmem:[#allocation13 + $0x1b0] sm:$0xff]   ;;  %v5999_v4 = vld [vmem:[#allocation13 + $0x178] sm:$0xff]  }
0x10b1   :  { %6161 = vrsqrt.f32 %v2537_v36  ;;  %v6000_v36 = vld [vmem:[#allocation13 + $0x1f8] sm:$0xff]  }
0x10b9   :  { %v6160_v6 = vpop.eup %6159 }
0x10ba   :  { %v2540_v41 = vmul.f32 %v6160_v6, %v2534_v24  ;;  %v6001_v24 = vld [vmem:[#allocation13 + $0x138] sm:$0xff]  }
0x10bb   :  { %v6162_v56 = vpop.eup %6161  ;;  %v1949_v6 = vld [vmem:[#allocation15 + $0x38] sm:$0xff] }
0x10bc   :  { %v2541_v54 = vmul.f32 %v6162_v56, %v2535_v39  ;;  %v2546_v23 = vmul.f32 %v2545_v30, %v2540_v41  ;;  %v2591_v39 = vrot.slane %v7090_v12, %v6770_v44  ;;  %v2599_v41 = vrot.slane %v7088_v25, %v6770_v44 }
0x10bd   :  { %v2595_v56 = vrot.slane %v7092_v5, %v6770_v44 }
0x10be   :  { %v2547_v60 = vmul.f32 %v2545_v30, %v2541_v54  ;;  %v7215_v49 = vadd.f32 %v2551_v31, %v2546_v23  ;;  %v6002_v30 = vld [vmem:[#allocation13 + $0x1b8] sm:$0xff]   ;;  %v2603_v54 = vrot.slane %v1949_v6, %v6770_v44 }
0x10c0   :  { %v7217_v35 = vadd.f32 %v2551_v31, %v2547_v60 }
0x10c2   :  { %v2554_v13 = vpack.c.bf16 %v7217_v35, %v7215_v49 }
0x10c4   :  { %2797 = vmatmul.mubr.bf16.vlgmr.msra.gmra.mrb[36].mxu1 %v2554_v13  ;;  %2840 = vmatmul.mubr.bf16.vlgmr.msra.gmra.mrb[40].mxu0 %v2554_v13 }
0x10c5   :  { %5193 = vmatpush3.bf16.msra.mxu1 %v5973_v9  ;;  %5215 = vmatpush3.bf16.msra.mxu0 %v5974_v50 }
0x10c6   :  { %5194 = vmatprep.subr.bf16.mxu1 %v5975_v16  ;;  %5216 = vmatprep.subr.bf16.mxu0 %v5976_v8 }
0x10c9   :  { %5195 = vmatpush3.bf16.msra.mxu1 %v5977_v2  ;;  %5217 = vmatpush3.bf16.msra.mxu0 %v5978_v52 }
0x10ca   :  { %5196 = vmatprep.subr.bf16.mxu1 %v5979_v53  ;;  %5218 = vmatprep.subr.bf16.mxu0 %v5980_v15 }
0x10cd   :  { %5197 = vmatpush3.bf16.msra.mxu1 %v5981_v29  ;;  %5219 = vmatpush3.bf16.msra.mxu0 %v5982_v55 }
0x10ce   :  { %5198 = vmatprep.subr.bf16.mxu1 %v5983_v63  ;;  %5220 = vmatprep.subr.bf16.mxu0 %v5984_v45 }
0x10d1   :  { %5199 = vmatpush3.bf16.msra.mxu1 %v5985_v46  ;;  %5221 = vmatpush3.bf16.msra.mxu0 %v5986_v58 }
0x10d2   :  { %5200 = vmatprep.subr.bf16.mxu1 %v5987_v10  ;;  %5222 = vmatprep.subr.bf16.mxu0 %v5988_v59 }
0x10d5   :  { %5201 = vmatpush3.bf16.msra.mxu1 %v5989_v7  ;;  %5223 = vmatpush3.bf16.msra.mxu0 %v5990_v32 }
0x10d6   :  { %5202 = vmatprep.subr.bf16.mxu1 %v5991_v11  ;;  %5224 = vmatprep.subr.bf16.mxu0 %v5992_v37 }
0x10d9   :  { %5203 = vmatpush3.bf16.msra.mxu1 %v5993_v42  ;;  %5225 = vmatpush3.bf16.msra.mxu0 %v5994_v48 }
0x10da   :  { %5204 = vmatprep.subr.bf16.mxu1 %v5995_v27  ;;  %5226 = vmatprep.subr.bf16.mxu0 %v5996_v17 }
0x10dd   :  { %5205 = vmatpush3.bf16.msra.mxu1 %v5997_v14  ;;  %5227 = vmatpush3.bf16.msra.mxu0 %v5998_v21  ;;  %v2930_v14 = vrot.slane %v7090_v12, %v6776_v47 }
0x10de   :  { %5206 = vmatprep.subr.bf16.mxu1 %v5999_v4  ;;  %5228 = vmatprep.subr.bf16.mxu0 %v6000_v36 }
0x10e1   :  { %5207 = vmatpush3.bf16.msra.mxu1 %v6001_v24  ;;  %5229 = vmatpush3.bf16.msra.mxu0 %v6002_v30 }
0x10e2   :  { %5594 = vmatprep.subr.bf16.mxu0 %v6486_v1 }
0x1197   :  { %v2798_v23 = vpop.f32.mrb[36].mxu1  ;;  %v2841_v31 = vpop.f32.mrb[40].mxu0 }
0x1198   :  { %v2799_v60 = vadd.f32 %v2798_v23, %v2591_v39  ;;  %v2842_v9 = vadd.f32 %v2841_v31, %v2599_v41  ;;  %v2800_v50 = vpop.f32.mrb[37].mxu1  ;;  %v2843_v13 = vpop.f32.mrb[41].mxu0 }
0x1199   :  { %v2801_v16 = vadd.f32 %v2800_v50, %v2595_v56  ;;  %v2844_v8 = vadd.f32 %v2843_v13, %v2603_v54  ;;  %v2802_v2 = vpop.f32.mrb[38].mxu1  ;;  %v2845_v52 = vpop.f32.mrb[42].mxu0 }
0x119a   :  { %v2803_v53 = vadd.f32 %v2802_v2, %v2591_v39  ;;  %v2846_v15 = vadd.f32 %v2845_v52, %v2599_v41  ;;  %v2804_v29 = vpop.f32.mrb[39].mxu1  ;;  %v2847_v55 = vpop.f32.mrb[43].mxu0  ;;  %v2850_v45 = vmax.f32 %v2799_v60, 0.0  ;;  %v2852_v5 = vmax.f32 %v2842_v9, 0.0  ;;  %v6003_v2 = vld [vmem:[#allocation9 + $0x180] ss:$12 sps:$4 sm:$0xff]  }
0x119b   :  { %v2805_v25 = vadd.f32 %v2804_v29, %v2595_v56  ;;  %v2848_v63 = vadd.f32 %v2847_v55, %v2603_v54  ;;  %v2851_v10 = vmax.f32 %v2801_v16, 0.0  ;;  %v2853_v59 = vmax.f32 %v2844_v8, 0.0  ;;  %v6005_v52 = vld [vmem:[#allocation9 + $0x184] ss:$12 sps:$4 sm:$0xff]   ;;  %v6013_v29 = vld [vmem:[#allocation9 + $0x1b4] ss:$12 sps:$4 sm:$0xff]  }
0x119c   :  { %v2854_v46 = vmax.f32 %v2803_v53, 0.0  ;;  %v2856_v58 = vmax.f32 %v2846_v15, 0.0  ;;  %3426 = vmatprep.subr.bf16.mxu1 %v6005_v52  ;;  %v6009_v53 = vld [vmem:[#allocation9 + $0x19c] ss:$12 sps:$4 sm:$0xff]   ;;  %v6010_v15 = vld [vmem:[#allocation9 + $0x1a0] ss:$12 sps:$4 sm:$0xff]  }
0x119d   :  { %v2855_v7 = vmax.f32 %v2805_v25, 0.0  ;;  %v2857_v32 = vmax.f32 %v2848_v63, 0.0  ;;  %v6011_v55 = vld [vmem:[#allocation9 + $0x1b0] ss:$12 sps:$4 sm:$0xff]   ;;  %v6014_v25 = vld [vmem:[#allocation9 + $0x1b8] ss:$12 sps:$4 sm:$0xff]  }
0x119e   :  { %v2858_v11 = vpack.c.bf16 %v2854_v46, %v2850_v45  ;;  %v2860_v37 = vpack.c.bf16 %v2856_v58, %v2852_v5  ;;  %v6017_v63 = vld [vmem:[#allocation9 + $0x1cc] ss:$12 sps:$4 sm:$0xff]   ;;  %v6015_v45 = vld [vmem:[#allocation9 + $0x1c8] ss:$12 sps:$4 sm:$0xff]   ;;  %v6018_v5 = vld [vmem:[#allocation9 + $0x1d0] ss:$12 sps:$4 sm:$0xff]  }
0x119f   :  { %v2859_v42 = vpack.c.bf16 %v2855_v7, %v2851_v10  ;;  %v2861_v48 = vpack.c.bf16 %v2857_v32, %v2853_v59  ;;  %v6021_v46 = vld [vmem:[#allocation9 + $0x1e4] ss:$12 sps:$4 sm:$0xff]   ;;  %v6019_v58 = vld [vmem:[#allocation9 + $0x1e0] ss:$12 sps:$4 sm:$0xff]   ;;  %v6022_v10 = vld [vmem:[#allocation9 + $0x1e8] ss:$12 sps:$4 sm:$0xff]  }
0x11a0   :  { %v6025_v59 = vld [vmem:[#allocation9 + $0x1fc] ss:$12 sps:$4 sm:$0xff]   ;;  %v6023_v7 = vld [vmem:[#allocation9 + $0x1f8] ss:$12 sps:$4 sm:$0xff]   ;;  %v6026_v32 = vld [vmem:[#allocation9 + $0x200] ss:$12 sps:$4 sm:$0xff]  }
0x11a1   :  { %3155 = vmatprep.mubr.bf16.mxu1 %v2859_v42  ;;  %3196 = vmatprep.mubr.bf16.mxu0 %v2861_v48  ;;  %v6030_v42 = vld [vmem:[#allocation9 + $0x218] ss:$12 sps:$4 sm:$0xff]  }
0x11a2   :  { %3156 = vmatmul.mubr.bf16.vlgmr.msra.gmra.mrb[40].mxu1 %v2858_v11  ;;  %3197 = vmatmul.mubr.bf16.vlgmr.msra.gmra.mrb[44].mxu0 %v2860_v37  ;;  %v6029_v11 = vld [vmem:[#allocation9 + $0x214] ss:$12 sps:$4 sm:$0xff]   ;;  %v6027_v37 = vld [vmem:[#allocation9 + $0x210] ss:$12 sps:$4 sm:$0xff]   ;;  %v6033_v48 = vld [vmem:[#allocation9 + $0x22c] ss:$12 sps:$4 sm:$0xff]  }
0x11a3   :  { %3458 = vmatprep.mubr.bf16.mxu1 %v6488_v22  ;;  %5610 = vmatprep.mubr.msk.bf16.mxu0 %vm6487_vm0, %v6486_v1 }
0x11a4   :  { %3427 = vmatpush1.bf16.msra.mxu1 %v6003_v2  ;;  %v3238_v2 = vrot.slane %v7090_v12, %v7069_v38 }
0x11a5   :  { %3428 = vmatprep.subr.bf16.mxu1 %v6009_v53 }
0x1275   :  { %v5208_v27 = vpop.f32.mrb[40].mxu1  ;;  %v5230_v17 = vpop.f32.mrb[44].mxu0 }
0x1276   :  { %v5209_v21 = vpop.f32.mrb[41].mxu1  ;;  %v5231_v4 = vpop.f32.mrb[45].mxu0 }
0x1277   :  { %v5210_v36 = vadd.f32 %v5209_v21, %v5208_v27  ;;  %v5232_v24 = vadd.f32 %v5231_v4, %v5230_v17  ;;  %v5211_v30 = vpop.f32.mrb[42].mxu1  ;;  %v5233_v6 = vpop.f32.mrb[46].mxu0  ;;  %v6031_v27 = vld [vmem:[#allocation9 + $0x228] ss:$12 sps:$4 sm:$0xff]   ;;  %v6034_v17 = vld [vmem:[#allocation9 + $0x230] ss:$12 sps:$4 sm:$0xff]  }
0x1278   :  { %v5212_v39 = vpop.f32.mrb[43].mxu1  ;;  %v5234_v41 = vpop.f32.mrb[47].mxu0 }
0x1279   :  { %v3158_v56 = vadd.f32 %v5210_v36, %v2930_v14  ;;  %v5213_v54 = vadd.f32 %v5212_v39, %v5211_v30  ;;  %v5235_v23 = vadd.f32 %v5234_v41, %v5233_v6 }
0x127b   :  { %v3199_v31 = vadd.f32 %v5232_v24, %v3158_v56  ;;  %v3161_v60 = vadd.f32 %v5213_v54, %v2930_v14 }
0x127d   :  { %v3202_v9 = vadd.f32 %v5235_v23, %v3161_v60  ;;  %v7235_v50 = vadd.f32 %v3199_v31, %v7215_v49  ;;  %v6006_v49 = vld [vmem:[#allocation9 + $0x188] ss:$12 sps:$4 sm:$0xff]  }
0x127e   :  { %5595 = vmatpush3.bf16.msra.mxu0 %v6006_v49 }
0x127f   :  { %3207 = vadd.xlane.f32.xlu0 %v7235_v50  ;;  %v7239_v13 = vadd.f32 %v3202_v9, %v7217_v35  ;;  %v3213_v16 = vmul.f32 %v7235_v50, %v7235_v50  ;;  %5596 = vmatprep.subr.bf16.mxu0 %v6486_v1  ;;  %v6007_v35 = vld [vmem:[#allocation9 + $0x198] ss:$12 sps:$4 sm:$0xff]  }
0x1280   :  { %3429 = vmatpush1.bf16.msra.mxu1 %v6007_v35 }
0x1281   :  { %3209 = vadd.xlane.f32.xlu1 %v7239_v13  ;;  %v3214_v8 = vmul.f32 %v7239_v13, %v7239_v13  ;;  %3430 = vmatprep.subr.bf16.mxu1 %v6013_v29 }
0x1282   :  { %5597 = vmatpush3.bf16.msra.mxu0 %v6010_v15 }
0x1283   :  { %3215 = vadd.xlane.f32.xlu0 %v3213_v16  ;;  %5598 = vmatprep.subr.bf16.mxu0 %v6486_v1 }
0x1284   :  { %3431 = vmatpush1.bf16.msra.mxu1 %v6011_v55  ;;  %v3244_v55 = vrot.slane %v7090_v12, %v7074_v18  ;;  %v7275_v12 = vld [vmem:[#allocation15 + $0x48] sm:$0xff] }
0x1285   :  { %3217 = vadd.xlane.f32.xlu1 %v3214_v8  ;;  %3432 = vmatprep.subr.bf16.mxu1 %v6017_v63 }
0x1286   :  { %5599 = vmatpush3.bf16.msra.mxu0 %v6014_v25 }
0x1287   :  { %5600 = vmatprep.subr.bf16.mxu0 %v6486_v1 }
0x1288   :  { %3433 = vmatpush1.bf16.msra.mxu1 %v6015_v45 }
0x1289   :  { %3434 = vmatprep.subr.bf16.mxu1 %v6021_v46 }
0x128a   :  { %5601 = vmatpush3.bf16.msra.mxu0 %v6018_v5  ;;  %v7273_v5 = vld [vmem:[#allocation15 + $0x40] sm:$0xff] }
0x128b   :  { %5602 = vmatprep.subr.bf16.mxu0 %v6486_v1 }
0x128c   :  { %3435 = vmatpush1.bf16.msra.mxu1 %v6019_v58  ;;  %v3289_v58 = vrot.slane %v7273_v5, %v6723_v26 }
0x128d   :  { %3436 = vmatprep.subr.bf16.mxu1 %v6025_v59 }
0x128e   :  { %5603 = vmatpush3.bf16.msra.mxu0 %v6022_v10  ;;  %v3293_v10 = vrot.slane %v7275_v12, %v6723_v26 }
0x128f   :  { %5604 = vmatprep.subr.bf16.mxu0 %v6486_v1 }
0x1290   :  { %3437 = vmatpush1.bf16.msra.mxu1 %v6023_v7 }
0x1291   :  { %3438 = vmatprep.subr.bf16.mxu1 %v6029_v11 }
0x1292   :  { %5605 = vmatpush3.bf16.msra.mxu0 %v6026_v32 }
0x1293   :  { %5606 = vmatprep.subr.bf16.mxu0 %v6486_v1 }
0x1294   :  { %3439 = vmatpush1.bf16.msra.mxu1 %v6027_v37 }
0x1295   :  { %3440 = vmatprep.subr.bf16.mxu1 %v6033_v48 }
0x1296   :  { %5607 = vmatpush3.bf16.msra.mxu0 %v6030_v42 }
0x1297   :  { %5608 = vmatprep.subr.bf16.mxu0 %v6486_v1 }
0x1298   :  { %3441 = vmatpush1.bf16.msra.mxu1 %v6031_v27 }
0x1299   :  { %5614 = vmatprep.subr.bf16.mxu1 %v6486_v1 }
0x129a   :  { %5609 = vmatpush3.bf16.msra.mxu0 %v6034_v17 }
0x129b   :  { %5634 = vmatprep.subr.bf16.mxu0 %v6486_v1 }
0x130c   :  { %v3208_v14 = vpop.xlane.xlu0 %3207 }
0x130d   :  { %v3211_v21 = vmul.f32 0.0078125, %v3208_v14 }
0x130e   :  { %v3210_v4 = vpop.xlane.xlu1 %3209 }
0x130f   :  { %v3212_v36 = vmul.f32 0.0078125, %v3210_v4  ;;  %v3221_v30 = vmul.f32 %v3211_v21, %v3211_v21  ;;  %v3227_v8 = vsub.f32 %v7235_v50, %v3211_v21 }
0x1310   :  { %v3216_v24 = vpop.xlane.xlu0 %3215 }
0x1311   :  { %v3219_v6 = vmul.f32 0.0078125, %v3216_v24  ;;  %v3222_v41 = vmul.f32 %v3212_v36, %v3212_v36  ;;  %v3228_v49 = vsub.f32 %v7239_v13, %v3212_v36  ;;  %v7271_v13 = vld [vmem:[#allocation15 + $0x50] sm:$0xff]  ;;  %v6202_v24 = vld [vmem:[#allocation6] sm:$0xff] }
0x1312   :  { %v3218_v39 = vpop.xlane.xlu1 %3217  ;;  %v3297_v46 = vrot.slane %v7271_v13, %v6723_v26 }
0x1313   :  { %v3223_v56 = vsub.f32 %v3219_v6, %v3221_v30  ;;  %v3220_v54 = vmul.f32 0.0078125, %v3218_v39  ;;  %v6203_v30 = vld [vmem:[#allocation6 + $0x10] sm:$0xff] }
0x1315   :  { %v3225_v23 = vmax.f32 %v3223_v56, 0.0  ;;  %v3224_v31 = vsub.f32 %v3220_v54, %v3222_v41  ;;  %v6204_v56 = vld [vmem:[#allocation6 + $0x20] sm:$0xff] }
0x1317   :  { %v3229_v60 = vadd.f32 1e-05, %v3225_v23  ;;  %v3226_v9 = vmax.f32 %v3224_v31, 0.0 }
0x1319   :  { %6163 = vrsqrt.f32 %v3229_v60  ;;  %v3230_v16 = vadd.f32 1e-05, %v3226_v9  ;;  %v6205_v60 = vld [vmem:[#allocation6 + $0x8] sm:$0xff] }
0x131b   :  { %6165 = vrsqrt.f32 %v3230_v16  ;;  %v6206_v16 = vld [vmem:[#allocation6 + $0x18] sm:$0xff] }
0x1323   :  { %v6164_v52 = vpop.eup %6163 }
0x1324   :  { %v3233_v35 = vmul.f32 %v6164_v52, %v3227_v8 }
0x1325   :  { %v6166_v53 = vpop.eup %6165 }
0x1326   :  { %v3234_v15 = vmul.f32 %v6166_v53, %v3228_v49  ;;  %v3239_v29 = vmul.f32 %v3238_v2, %v3233_v35  ;;  %v6208_v53 = vld [vmem:[#allocation6 + $0x30] sm:$0xff] }
0x1328   :  { %v3240_v25 = vmul.f32 %v3238_v2, %v3234_v15  ;;  %v7261_v63 = vadd.f32 %v3244_v55, %v3239_v29  ;;  %v6207_v2 = vld [vmem:[#allocation6 + $0x28] sm:$0xff]  ;;  %v6209_v29 = vld [vmem:[#allocation6 + $0x38] sm:$0xff] }
0x132a   :  { %v7263_v45 = vadd.f32 %v3244_v55, %v3240_v25 }
0x132c   :  { %v3252_v50 = vpack.c.bf16 %v7263_v45, %v7261_v63 }
0x132e   :  { %3459 = vmatmul.mubr.bf16.vlgmr.msra.gmra.mrb[44].mxu1 %v3252_v50  ;;  %5611 = vmatmul.mubr.bf16.vlgmr.msra.gmra.mrb[48].mxu0 %v3252_v50 }
0x132f   :  { %5630 = vmatprep.mubr.msk.bf16.mxu1 %vm6487_vm0, %v6486_v1  ;;  %5650 = vmatprep.mubr.msk.bf16.mxu0 %vm6487_vm0, %v6486_v1 }
0x1401   :  { %v3460_v59 = vpop.f32.mrb[44].mxu1  ;;  %v3503_v7 = vpop.f32.mrb[48].mxu0 }
0x1402   :  { %v7283_v32 = vadd.f32 %v3503_v7, %v3297_v46  ;;  %v3462_v11 = vpop.f32.mrb[45].mxu1  ;;  %v5612_v37 = vpop.f32.mrb[49].mxu0  ;;  %v7285_v42 = vadd.f32 %v3460_v59, %v3289_v58 }
0x1403   :  { %v7287_v48 = vadd.f32 %v3462_v11, %v3293_v10  ;;  %v3464_v27 = vpop.f32.mrb[46].mxu1  ;;  %v3506_v17 = vpop.f32.mrb[50].mxu0  ;;  %v6211_v37 = vld [vmem:[#allocation6 + $0x48] sm:$0xff] }
0x1404   :  { %v7289_v14 = vadd.f32 %v3464_v27, %v3289_v58  ;;  %v3507_v21 = vadd.f32 %v3506_v17, %v3297_v46  ;;  %v3466_v4 = vpop.f32.mrb[47].mxu1  ;;  %v5613_v36 = vpop.f32.mrb[51].mxu0  ;;  %v3534_v26 = vmul.f32 %v6202_v24, %v7283_v32  ;;  %v3536_v6 = vmul.f32 %v6203_v30, %v7283_v32  ;;  %v6210_v58 = vld [vmem:[#allocation6 + $0x40] sm:$0xff] }
0x1405   :  { %v7293_v39 = vadd.f32 %v3466_v4, %v3293_v10  ;;  %v3510_v41 = vmul.f32 %v6202_v24, %v7287_v48  ;;  %v7297_v54 = vmul.f32 %v6204_v56, %v7283_v32  ;;  %v7300_v23 = vmul.f32 %v6203_v30, %v7287_v48  ;;  %v6212_v36 = vld [vmem:[#allocation6 + $0x50] sm:$0xff] }
0x1406   :  { %v3558_v31 = vpack.c.bf16 %v7289_v14, %v7285_v42  ;;  %v3535_v9 = vmul.f32 %v6205_v60, %v3507_v21  ;;  %v3537_v8 = vmul.f32 %v6206_v16, %v3507_v21  ;;  %v3539_v52 = vmul.f32 %v6207_v2, %v3507_v21  ;;  %v6219_v42 = vld [vmem:[%s7447_s2 + $0x8] sm:$0xff] }
0x1407   :  { %v3511_v49 = vmul.f32 %v6205_v60, %v7293_v39  ;;  %v3513_v35 = vmul.f32 %v6206_v16, %v7293_v39  ;;  %v3540_v15 = vmul.f32 %v6208_v53, %v7283_v32  ;;  %v3541_v55 = vmul.f32 %v6209_v29, %v3507_v21 }
0x1408   :  { %v3550_v25 = vpack.c.bf16 %v3535_v9, %v3534_v26  ;;  %v3551_v50 = vpack.c.bf16 %v3537_v8, %v3536_v6  ;;  %v3552_v46 = vpack.c.bf16 %v3539_v52, %v7297_v54  ;;  %v3542_v10 = vmul.f32 %v6210_v58, %v7283_v32  ;;  %v6213_v26 = vld [vmem:[#allocation6 + $0x58] sm:$0xff]  ;;  %v6216_v52 = vld [vmem:[#allocation6 + $0x70] sm:$0xff] }
0x1409   :  { %v3526_v59 = vpack.c.bf16 %v3511_v49, %v3510_v41  ;;  %v3527_v7 = vpack.c.bf16 %v3513_v35, %v7300_v23  ;;  %v3553_v11 = vpack.c.bf16 %v3541_v55, %v3540_v15  ;;  %v3543_v27 = vmul.f32 %v6211_v37, %v3507_v21  ;;  %v6214_v41 = vld [vmem:[#allocation6 + $0x60] sm:$0xff]  ;;  %v6215_v23 = vld [vmem:[#allocation6 + $0x68] sm:$0xff]  ;;  %v6217_v35 = vld [vmem:[#allocation6 + $0x78] sm:$0xff] }
0x140a   :  { %5635 = vmatpush3.bf16.msra.mxu0 %v3550_v25  ;;  %v3514_v17 = vmul.f32 %v6204_v56, %v7287_v48  ;;  %v3515_v4 = vmul.f32 %v6207_v2, %v7293_v39  ;;  %v3544_v24 = vmul.f32 %v6212_v36, %v7283_v32  ;;  %v3545_v30 = vmul.f32 %v6213_v26, %v3507_v21 }
0x140b   :  { %5615 = vmatpush3.bf16.xpose.msra.mxu1 %v3526_v59  ;;  %5636 = vmatprep.subr.bf16.mxu0 %v6486_v1  ;;  %v3554_v6 = vpack.c.bf16 %v3543_v27, %v3542_v10  ;;  %v3546_v54 = vmul.f32 %v6214_v41, %v7283_v32  ;;  %v3547_v60 = vmul.f32 %v6215_v23, %v3507_v21 }
0x140c   :  { %5616 = vmatprep.subr.bf16.mxu1 %v6486_v1  ;;  %v3528_v9 = vpack.c.bf16 %v3515_v4, %v3514_v17  ;;  %v3555_v56 = vpack.c.bf16 %v3545_v30, %v3544_v24  ;;  %v3516_v16 = vmul.f32 %v6208_v53, %v7287_v48  ;;  %v3517_v8 = vmul.f32 %v6209_v29, %v7293_v39  ;;  %v6218_v24 = vld [vmem:[%s7447_s2] sm:$0xff]  ;;  %s6489_s2 = smov [#allocation19]  }
0x140d   :  { %v3556_v2 = vpack.c.bf16 %v3547_v60, %v3546_v54  ;;  %v3548_v49 = vmul.f32 %v6216_v52, %v7283_v32  ;;  %v3549_v15 = vmul.f32 %v6217_v35, %v3507_v21  ;;  %v3518_v55 = vmul.f32 %v6210_v58, %v7287_v48  ;;  %s4691_s11 = sshll.u32 %s6489_s2, 4  ;;  %s4692_s11 = int_to_ptr.vmem [resolvable:$true] %s4691_s11 }
0x140e   :  { %5637 = vmatpush3.bf16.msra.mxu0 %v3551_v50  ;;  %v3529_v25 = vpack.c.bf16 %v3517_v8, %v3516_v16  ;;  %v3519_v10 = vmul.f32 %v6211_v37, %v7293_v39  ;;  %v3520_v59 = vmul.f32 %v6212_v36, %v7287_v48  ;;  %v3521_v27 = vmul.f32 %v6213_v26, %v7293_v39  ;;  %s6430_s20 = scalar_lea.vmem %s4692_s11, 32  ;;  %p6435_p8 = scmp.lt.s32.totalorder %s4692_s11, %s4692_s11 }
0x140f   :  { %5638 = vmatprep.subr.bf16.mxu0 %v6486_v1  ;;  %v3557_v53 = vpack.c.bf16 %v3549_v15, %v3548_v49  ;;  %v3522_v29 = vmul.f32 %v6214_v41, %v7287_v48  ;;  %v3523_v17 = vmul.f32 %v6215_v23, %v7293_v39  ;;  %v3524_v21 = vmul.f32 %v6216_v52, %v7287_v48  ;;  %p6431_p7 = scmp.ne.s32.totalorder %s4692_s11, %s6430_s20  ;;  %p6436_p9 = scmp.lt.s32.totalorder %s6430_s20, %s6430_s20 }
0x1410   :  { %v3530_v32 = vpack.c.bf16 %v3519_v10, %v3518_v55  ;;  %v3531_v4 = vpack.c.bf16 %v3521_v27, %v3520_v59  ;;  %v3525_v50 = vmul.f32 %v6217_v35, %v7293_v39 }
0x1411   :  { %v3532_v58 = vpack.c.bf16 %v3523_v17, %v3522_v29  ;;  %p6437_p10 = por %p6436_p9, %p6435_p8 }
0x1412   :  { %5639 = vmatpush3.bf16.msra.mxu0 %v3552_v46  ;;  %v3533_v37 = vpack.c.bf16 %v3525_v50, %v3524_v21 }
0x1413   :  { %5617 = vmatpush3.bf16.xpose.msra.mxu1 %v3527_v7  ;;  %5640 = vmatprep.subr.bf16.mxu0 %v6486_v1  ;;  %p6438_p11 = pnand %p6437_p10, %p6431_p7 }
0x1414   :  { %5618 = vmatprep.subr.bf16.mxu1 %v6486_v1 }
0x1416   :  { %5641 = vmatpush3.bf16.msra.mxu0 %v3553_v11 }
0x1417   :  { %5642 = vmatprep.subr.bf16.mxu0 %v6486_v1 }
0x141a   :  { %5643 = vmatpush3.bf16.msra.mxu0 %v3554_v6 }
0x141b   :  { %5619 = vmatpush3.bf16.xpose.msra.mxu1 %v3528_v9  ;;  %5644 = vmatprep.subr.bf16.mxu0 %v6486_v1 }
0x141c   :  { %5620 = vmatprep.subr.bf16.mxu1 %v6486_v1 }
0x141e   :  { %5645 = vmatpush3.bf16.msra.mxu0 %v3555_v56 }
0x141f   :  { %5646 = vmatprep.subr.bf16.mxu0 %v6486_v1 }
0x1422   :  { %5647 = vmatpush3.bf16.msra.mxu0 %v3556_v2 }
0x1423   :  { %5621 = vmatpush3.bf16.xpose.msra.mxu1 %v3529_v25  ;;  %5648 = vmatprep.subr.bf16.mxu0 %v6486_v1 }
0x1424   :  { %5622 = vmatprep.subr.bf16.mxu1 %v6486_v1 }
0x1426   :  { %5649 = vmatpush3.bf16.msra.mxu0 %v3557_v53 }
0x1427   :  { %5654 = vmatprep.subr.bf16.mxu0 %v6486_v1 }
0x142b   :  { %5623 = vmatpush3.bf16.xpose.msra.mxu1 %v3530_v32  ;;  %v3724_v32 = vrot.slane %v7273_v5, %v6735_v40 }
0x142c   :  { %5624 = vmatprep.subr.bf16.mxu1 %v6486_v1 }
0x1433   :  { %5625 = vmatpush3.bf16.xpose.msra.mxu1 %v3531_v4 }
0x1434   :  { %5626 = vmatprep.subr.bf16.mxu1 %v6486_v1 }
0x143b   :  { %5627 = vmatpush3.bf16.xpose.msra.mxu1 %v3532_v58 }
0x143c   :  { %5628 = vmatprep.subr.bf16.mxu1 %v6486_v1 }
0x1443   :  { %5629 = vmatpush3.bf16.xpose.msra.mxu1 %v3533_v37 }
0x1444   :  { %5674 = vmatprep.subr.bf16.mxu1 %v6486_v1 }
0x144a   :  { %5631 = vmatmul.mubr.bf16.vlgmr.msra.gmra.mrb[48].mxu1 %v3558_v31 }
0x144b   :  { %5690 = vmatprep.mubr.msk.bf16.mxu1 %vm6487_vm0, %v6486_v1 }
0x151d   :  { %v3593_v48 = vpop.f32.mrb[48].mxu1 }
0x151e   :  { %v3600_v39 = vmul.f32 0.25, %v3593_v48  ;;  %v5632_v46 = vpop.f32.mrb[49].mxu1 }
0x151f   :  { %v3596_v7 = vpop.f32.mrb[50].mxu1 }
0x1520   :  { %v3601_v11 = vmul.f32 0.25, %v3596_v7  ;;  %v5633_v36 = vpop.f32.mrb[51].mxu1  ;;  %v3602_v26 = vadd.f32 %v6218_v24, %v3600_v39  ;;  %v6043_v7 = vld [vmem:[#allocation12 + $0x200] ss:$16 sps:$4 sm:$0xff]   ;;  %v6051_v24 = vld [vmem:[#allocation12 + $0x224] ss:$16 sps:$4 sm:$0xff]  }
0x1521   :  { %v6048_v36 = vld [vmem:[#allocation12 + $0x20c] ss:$16 sps:$4 sm:$0xff]  }
0x1522   :  { %3604 = vmax.xlane.f32.xlu0 %v3602_v26  ;;  %v3603_v14 = vadd.f32 %v6219_v42, %v3601_v11  ;;  %v6046_v11 = vld [vmem:[#allocation12 + $0x208] ss:$16 sps:$4 sm:$0xff]   ;;  %v6054_v42 = vld [vmem:[#allocation12 + $0x22c] ss:$16 sps:$4 sm:$0xff]  }
0x1524   :  { %3606 = vmax.xlane.f32.xlu1 %v3603_v14 }
0x15af   :  { %v3605_v31 = vpop.xlane.xlu0 %3604 }
0x15b0   :  { %v3608_v30 = vsub.f32 %v3602_v26, %v3605_v31  ;;  %v6052_v26 = vld [vmem:[#allocation12 + $0x228] ss:$16 sps:$4 sm:$0xff]   ;;  %v6055_v31 = vld [vmem:[#allocation12 + $0x240] ss:$16 sps:$4 sm:$0xff]  }
0x15b1   :  { %v3607_v6 = vpop.xlane.xlu1 %3606 }
0x15b2   :  { %v3610_v41 = vmul.f32 1.442695, %v3608_v30  ;;  %v3609_v54 = vsub.f32 %v3603_v14, %v3607_v6  ;;  %v6057_v14 = vld [vmem:[#allocation12 + $0x244] ss:$16 sps:$4 sm:$0xff]   ;;  %v6060_v30 = vld [vmem:[#allocation12 + $0x24c] ss:$16 sps:$4 sm:$0xff]  }
0x15b3   :  { %v6058_v6 = vld [vmem:[#allocation12 + $0x248] ss:$16 sps:$4 sm:$0xff]  }
0x15b4   :  { %v3612_v23 = vmul.f32 1.442695, %v3609_v54  ;;  %6167 = vpow2.f32 %v3610_v41  ;;  %v6063_v41 = vld [vmem:[#allocation12 + $0x264] ss:$16 sps:$4 sm:$0xff]   ;;  %v6066_v54 = vld [vmem:[#allocation12 + $0x26c] ss:$16 sps:$4 sm:$0xff]  }
0x15b6   :  { %6169 = vpow2.f32 %v3612_v23  ;;  %v6061_v23 = vld [vmem:[#allocation12 + $0x260] ss:$16 sps:$4 sm:$0xff]  }
0x15be   :  { %v6168_v60 = vpop.eup %6167 }
0x15c0   :  { %v6170_v9 = vpop.eup %6169 }
0x15c1   :  { %v3614_v56 = vpack.c.bf16 %v6170_v9, %v6168_v60  ;;  %v6064_v60 = vld [vmem:[#allocation12 + $0x268] ss:$16 sps:$4 sm:$0xff]   ;;  %v6069_v9 = vld [vmem:[#allocation12 + $0x284] ss:$16 sps:$4 sm:$0xff]  }
0x15c3   :  { %5651 = vmatmul.mubr.bf16.vlgmr.msra.gmra.mrb[52].mxu0 %v3614_v56 }
0x15c4   :  { %5655 = vmatpush3.bf16.msra.mxu0 %v6952_v61  ;;  %5670 = vmatprep.mubr.msk.bf16.mxu0 %vm6487_vm0, %v6486_v1  ;;  %v6035_v61 = vld [vmem:[#allocation10 + $0x80] sm:$0xff]  }
0x15c5   :  { %5656 = vmatprep.subr.bf16.mxu0 %v6486_v1  ;;  %5675 = vmatpush3.bf16.msra.mxu1 %v6035_v61  ;;  %v6067_v61 = vld [vmem:[#allocation12 + $0x280] ss:$16 sps:$4 sm:$0xff]  }
0x15c6   :  { %5676 = vmatprep.subr.bf16.mxu1 %v6486_v1 }
0x15c8   :  { %5657 = vmatpush3.bf16.msra.mxu0 %v6957_v57  ;;  %v6036_v57 = vld [vmem:[#allocation10 + $0x88] sm:$0xff]  }
0x15c9   :  { %5658 = vmatprep.subr.bf16.mxu0 %v6486_v1  ;;  %5677 = vmatpush3.bf16.msra.mxu1 %v6036_v57  ;;  %v6070_v57 = vld [vmem:[#allocation12 + $0x288] ss:$16 sps:$4 sm:$0xff]  }
0x15ca   :  { %5678 = vmatprep.subr.bf16.mxu1 %v6486_v1 }
0x15cc   :  { %5659 = vmatpush3.bf16.msra.mxu0 %v6965_v3  ;;  %v6037_v3 = vld [vmem:[#allocation10 + $0x90] sm:$0xff]  }
0x15cd   :  { %5660 = vmatprep.subr.bf16.mxu0 %v6486_v1  ;;  %5679 = vmatpush3.bf16.msra.mxu1 %v6037_v3  ;;  %v6075_v3 = vld [vmem:[#allocation12 + $0x2a4] ss:$16 sps:$4 sm:$0xff]  }
0x15ce   :  { %5680 = vmatprep.subr.bf16.mxu1 %v6486_v1 }
0x15d0   :  { %5661 = vmatpush3.bf16.msra.mxu0 %v6971_v19  ;;  %v6038_v19 = vld [vmem:[#allocation10 + $0x98] sm:$0xff]  }
0x15d1   :  { %5662 = vmatprep.subr.bf16.mxu0 %v6486_v1  ;;  %5681 = vmatpush3.bf16.msra.mxu1 %v6038_v19  ;;  %v6078_v19 = vld [vmem:[#allocation12 + $0x2ac] ss:$16 sps:$4 sm:$0xff]  }
0x15d2   :  { %5682 = vmatprep.subr.bf16.mxu1 %v6486_v1 }
0x15d4   :  { %5663 = vmatpush3.bf16.msra.mxu0 %v6977_v20  ;;  %v6039_v20 = vld [vmem:[#allocation10 + $0xa0] sm:$0xff]  }
0x15d5   :  { %5664 = vmatprep.subr.bf16.mxu0 %v6486_v1  ;;  %5683 = vmatpush3.bf16.msra.mxu1 %v6039_v20  ;;  %v6073_v20 = vld [vmem:[#allocation12 + $0x2a0] ss:$16 sps:$4 sm:$0xff]  }
0x15d6   :  { %5684 = vmatprep.subr.bf16.mxu1 %v6486_v1 }
0x15d8   :  { %5665 = vmatpush3.bf16.msra.mxu0 %v6983_v28  ;;  %v6040_v28 = vld [vmem:[#allocation10 + $0xa8] sm:$0xff]  }
0x15d9   :  { %5666 = vmatprep.subr.bf16.mxu0 %v6486_v1  ;;  %5685 = vmatpush3.bf16.msra.mxu1 %v6040_v28  ;;  %v6076_v28 = vld [vmem:[#allocation12 + $0x2a8] ss:$16 sps:$4 sm:$0xff]  }
0x15da   :  { %5686 = vmatprep.subr.bf16.mxu1 %v6486_v1 }
0x15dc   :  { %5667 = vmatpush3.bf16.msra.mxu0 %v6989_v33  ;;  %v6041_v33 = vld [vmem:[#allocation10 + $0xb0] sm:$0xff]  }
0x15dd   :  { %5668 = vmatprep.subr.bf16.mxu0 %v6486_v1  ;;  %5687 = vmatpush3.bf16.msra.mxu1 %v6041_v33  ;;  %v6081_v33 = vld [vmem:[#allocation12 + $0x2c4] ss:$16 sps:$4 sm:$0xff]  }
0x15de   :  { %5688 = vmatprep.subr.bf16.mxu1 %v6486_v1 }
0x15e0   :  { %5669 = vmatpush3.bf16.msra.mxu0 %v6995_v34  ;;  %v6042_v34 = vld [vmem:[#allocation10 + $0xb8] sm:$0xff]  }
0x15e1   :  { %5689 = vmatpush3.bf16.msra.mxu1 %v6042_v34  ;;  %v6084_v34 = vld [vmem:[#allocation12 + $0x2cc] ss:$16 sps:$4 sm:$0xff]  }
0x15e2   :  { %4109 = vmatprep.subr.bf16.mxu1 %v6048_v36 }
0x15e3   :  { %5671 = vmatmul.mubr.bf16.vlgmr.msra.gmra.mrb[56].mxu0 %v3614_v56  ;;  %v6072_v56 = vld [vmem:[#allocation12 + $0x28c] ss:$16 sps:$4 sm:$0xff]  }
0x15e4   :  { %4098 = vmatprep.mubr.bf16.mxu0 %v6488_v22 }
0x1696   :  { %v3649_v16 = vpop.f32.mrb[52].mxu0 }
0x1697   :  { %v5652_v8 = vpop.f32.mrb[53].mxu0 }
0x1698   :  { %v3652_v2 = vpop.f32.mrb[54].mxu0  ;;  %v6082_v8 = vld [vmem:[#allocation12 + $0x2c8] ss:$16 sps:$4 sm:$0xff]  }
0x1699   :  { %v5653_v52 = vpop.f32.mrb[55].mxu0 }
0x169a   :  { %v6090_v52 = vld [vmem:[#allocation12 + $0x2ec] ss:$16 sps:$4 sm:$0xff]  }
0x16b6   :  { %v3690_v49 = vpop.f32.mrb[56].mxu0 }
0x16b7   :  { %v3697_v35 = vmax.f32 %v3690_v49, 1e-20  ;;  %v5672_v15 = vpop.f32.mrb[57].mxu0  ;;  %v6085_v49 = vld [vmem:[#allocation12 + $0x2e0] ss:$16 sps:$4 sm:$0xff]  }
0x16b8   :  { %v3693_v55 = vpop.f32.mrb[58].mxu0  ;;  %v6091_v15 = vld [vmem:[#allocation13 + $0x240] sm:$0xff]  }
0x16b9   :  { %6171 = vrcp.f32 %v3697_v35  ;;  %v3698_v25 = vmax.f32 %v3693_v55, 1e-20  ;;  %v5673_v10 = vpop.f32.mrb[59].mxu0  ;;  %v6088_v35 = vld [vmem:[#allocation12 + $0x2e8] ss:$16 sps:$4 sm:$0xff]   ;;  %v6092_v55 = vld [vmem:[#allocation13 + $0x2c0] sm:$0xff]  }
0x16bb   :  { %6173 = vrcp.f32 %v3698_v25 }
0x16c3   :  { %v6172_v59 = vpop.eup %6171 }
0x16c4   :  { %v3701_v27 = vmul.f32 %v6172_v59, %v3649_v16  ;;  %v6079_v16 = vld [vmem:[#allocation12 + $0x2c0] ss:$16 sps:$4 sm:$0xff]  }
0x16c5   :  { %v6174_v53 = vpop.eup %6173 }
0x16c6   :  { %v3702_v29 = vmul.f32 %v6174_v53, %v3652_v2  ;;  %v6087_v2 = vld [vmem:[#allocation12 + $0x2e4] ss:$16 sps:$4 sm:$0xff]  }
0x16c8   :  { %v3703_v17 = vpack.c.bf16 %v3702_v29, %v3701_v27 }
0x16ca   :  { %5691 = vmatmul.mubr.bf16.vlgmr.msra.gmra.mrb[52].mxu1 %v3703_v17 }
0x16cb   :  { %4141 = vmatprep.mubr.bf16.mxu1 %v6488_v22  ;;  %4110 = vmatpush1.bf16.msra.mxu1 %v6046_v11 }
0x16cc   :  { %4111 = vmatprep.subr.bf16.mxu1 %v6054_v42 }
0x16cf   :  { %4112 = vmatpush1.bf16.msra.mxu1 %v6052_v26 }
0x16d0   :  { %4113 = vmatprep.subr.bf16.mxu1 %v6060_v30 }
0x16d3   :  { %4114 = vmatpush1.bf16.msra.mxu1 %v6058_v6 }
0x16d4   :  { %4115 = vmatprep.subr.bf16.mxu1 %v6066_v54  ;;  %v6095_v54 = vld [vmem:[#allocation13 + $0x248] sm:$0xff]  }
0x16d7   :  { %4116 = vmatpush1.bf16.msra.mxu1 %v6064_v60  ;;  %v6098_v60 = vld [vmem:[#allocation13 + $0x288] sm:$0xff]  }
0x16d8   :  { %4117 = vmatprep.subr.bf16.mxu1 %v6072_v56  ;;  %v6101_v56 = vld [vmem:[#allocation13 + $0x210] sm:$0xff]  }
0x16db   :  { %4118 = vmatpush1.bf16.msra.mxu1 %v6070_v57  ;;  %v6103_v57 = vld [vmem:[#allocation13 + $0x258] sm:$0xff]  }
0x16dc   :  { %4119 = vmatprep.subr.bf16.mxu1 %v6078_v19  ;;  %v6105_v19 = vld [vmem:[#allocation13 + $0x218] sm:$0xff]  }
0x16df   :  { %4120 = vmatpush1.bf16.msra.mxu1 %v6076_v28  ;;  %v6107_v28 = vld [vmem:[#allocation13 + $0x260] sm:$0xff]  }
0x16e0   :  { %4121 = vmatprep.subr.bf16.mxu1 %v6084_v34  ;;  %v6109_v34 = vld [vmem:[#allocation13 + $0x220] sm:$0xff]  }
0x16e3   :  { %4122 = vmatpush1.bf16.msra.mxu1 %v6082_v8  ;;  %v6111_v8 = vld [vmem:[#allocation13 + $0x268] sm:$0xff]  }
0x16e4   :  { %4123 = vmatprep.subr.bf16.mxu1 %v6090_v52  ;;  %v6113_v52 = vld [vmem:[#allocation13 + $0x228] sm:$0xff]  }
0x16e7   :  { %4124 = vmatpush1.bf16.msra.mxu1 %v6088_v35  ;;  %v6115_v35 = vld [vmem:[#allocation13 + $0x270] sm:$0xff]  }
0x16e8   :  { %5303 = vmatprep.subr.bf16.mxu1 %v6092_v55  ;;  %v6117_v55 = vld [vmem:[#allocation13 + $0x230] sm:$0xff]  }
0x179d   :  { %v3807_v4 = vpop.f32.mrb[52].mxu1 }
0x179e   :  { %v3808_v21 = vadd.f32 %v3807_v4, %v3724_v32  ;;  %v5692_v50 = vpop.f32.mrb[53].mxu1 }
0x179f   :  { %v3810_v58 = vpop.f32.mrb[54].mxu1 }
0x17a0   :  { %v7381_v37 = vadd.f32 %v3808_v21, %v7261_v63  ;;  %v3811_v48 = vadd.f32 %v3810_v58, %v3724_v32  ;;  %v5693_v39 = vpop.f32.mrb[55].mxu1  ;;  %v6045_v63 = vld [vmem:[#allocation12 + $0x204] ss:$16 sps:$4 sm:$0xff]  }
0x17a1   :  { %4066 = vmatprep.subr.bf16.mxu0 %v6045_v63  ;;  %v3847_v63 = vrot.slane %v7273_v5, %v6742_v51 }
0x17a2   :  { %v7384_v46 = vadd.f32 %v3811_v48, %v7263_v45  ;;  %3816 = vadd.xlane.f32.xlu0 %v7381_v37  ;;  %v3822_v22 = vmul.f32 %v7381_v37, %v7381_v37  ;;  %4067 = vmatpush1.bf16.msra.mxu0 %v6043_v7  ;;  %v6049_v45 = vld [vmem:[#allocation12 + $0x220] ss:$16 sps:$4 sm:$0xff]  }
0x17a3   :  { %4068 = vmatprep.subr.bf16.mxu0 %v6051_v24 }
0x17a4   :  { %3818 = vadd.xlane.f32.xlu1 %v7384_v46  ;;  %v3823_v40 = vmul.f32 %v7384_v46, %v7384_v46 }
0x17a6   :  { %3824 = vadd.xlane.f32.xlu0 %v3822_v22  ;;  %4069 = vmatpush1.bf16.msra.mxu0 %v6049_v45 }
0x17a7   :  { %4070 = vmatprep.subr.bf16.mxu0 %v6057_v14  ;;  %v3853_v14 = vrot.slane %v7273_v5, %v6767_v43  ;;  %v6099_v43 = vld [vmem:[#allocation13 + $0x250] sm:$0xff]  }
0x17a8   :  { %3826 = vadd.xlane.f32.xlu1 %v3823_v40 }
0x17aa   :  { %4071 = vmatpush1.bf16.msra.mxu0 %v6055_v31 }
0x17ab   :  { %4072 = vmatprep.subr.bf16.mxu0 %v6063_v41  ;;  %v6093_v41 = vld [vmem:[#allocation13 + $0x200] sm:$0xff]  }
0x17ae   :  { %4073 = vmatpush1.bf16.msra.mxu0 %v6061_v23  ;;  %v6096_v23 = vld [vmem:[#allocation13 + $0x2c8] sm:$0xff]  }
0x17af   :  { %4074 = vmatprep.subr.bf16.mxu0 %v6069_v9  ;;  %v6100_v9 = vld [vmem:[#allocation13 + $0x2d0] sm:$0xff]  }
0x17b2   :  { %4075 = vmatpush1.bf16.msra.mxu0 %v6067_v61  ;;  %v6102_v61 = vld [vmem:[#allocation13 + $0x290] sm:$0xff]  }
0x17b3   :  { %4076 = vmatprep.subr.bf16.mxu0 %v6075_v3  ;;  %v6104_v3 = vld [vmem:[#allocation13 + $0x2d8] sm:$0xff]  }
0x17b6   :  { %4077 = vmatpush1.bf16.msra.mxu0 %v6073_v20  ;;  %v6106_v20 = vld [vmem:[#allocation13 + $0x298] sm:$0xff]  }
0x17b7   :  { %4078 = vmatprep.subr.bf16.mxu0 %v6081_v33  ;;  %v6108_v33 = vld [vmem:[#allocation13 + $0x2e0] sm:$0xff]  }
0x17ba   :  { %4079 = vmatpush1.bf16.msra.mxu0 %v6079_v16  ;;  %v6110_v16 = vld [vmem:[#allocation13 + $0x2a0] sm:$0xff]  }
0x17bb   :  { %4080 = vmatprep.subr.bf16.mxu0 %v6087_v2  ;;  %v6112_v2 = vld [vmem:[#allocation13 + $0x2e8] sm:$0xff]  }
0x17be   :  { %4081 = vmatpush1.bf16.msra.mxu0 %v6085_v49  ;;  %v6114_v49 = vld [vmem:[#allocation13 + $0x2a8] sm:$0xff]  }
0x17bf   :  { %5281 = vmatprep.subr.bf16.mxu0 %v6091_v15  ;;  %v6116_v15 = vld [vmem:[#allocation13 + $0x2f0] sm:$0xff]  }
0x182f   :  { %v3817_v25 = vpop.xlane.xlu0 %3816 }
0x1830   :  { %v3820_v10 = vmul.f32 0.0078125, %v3817_v25  ;;  %v6118_v25 = vld [vmem:[#allocation13 + $0x2b0] sm:$0xff]  }
0x1831   :  { %v3819_v59 = vpop.xlane.xlu1 %3818 }
0x1832   :  { %v3821_v27 = vmul.f32 0.0078125, %v3819_v59  ;;  %v3830_v29 = vmul.f32 %v3820_v10, %v3820_v10  ;;  %v3836_v7 = vsub.f32 %v7381_v37, %v3820_v10  ;;  %v6094_v37 = vld [vmem:[#allocation13 + $0x280] sm:$0xff]   ;;  %v6119_v10 = vld [vmem:[#allocation13 + $0x278] sm:$0xff]  }
0x1833   :  { %v3825_v53 = vpop.xlane.xlu0 %3824  ;;  %v6120_v59 = vld [vmem:[#allocation13 + $0x2f8] sm:$0xff]  }
0x1834   :  { %v3828_v17 = vmul.f32 0.0078125, %v3825_v53  ;;  %v3831_v4 = vmul.f32 %v3821_v27, %v3821_v27  ;;  %v3837_v36 = vsub.f32 %v7384_v46, %v3821_v27  ;;  %v6097_v46 = vld [vmem:[#allocation13 + $0x208] sm:$0xff]   ;;  %v6121_v27 = vld [vmem:[#allocation13 + $0x238] sm:$0xff]  }
0x1835   :  { %v3827_v32 = vpop.xlane.xlu1 %3826  ;;  %v6122_v53 = vld [vmem:[#allocation13 + $0x2b8] sm:$0xff]  }
0x1836   :  { %v3832_v21 = vsub.f32 %v3828_v17, %v3830_v29  ;;  %v3829_v50 = vmul.f32 0.0078125, %v3827_v32  ;;  %v3251_v29 = vld [vmem:[#allocation15 + $0x58] sm:$0xff]  ;;  %v3893_v17 = vrot.slane %v7273_v5, %v6770_v44  ;;  %v3901_v32 = vrot.slane %v7271_v13, %v6770_v44 }
0x1838   :  { %v3834_v58 = vmax.f32 %v3832_v21, 0.0  ;;  %v3833_v48 = vsub.f32 %v3829_v50, %v3831_v4  ;;  %v3897_v4 = vrot.slane %v7275_v12, %v6770_v44  ;;  %v3905_v21 = vrot.slane %v3251_v29, %v6770_v44  ;;  %v6125_v29 = vld [vmem:[#allocation16 + $0x10] sm:$0xff]  }
0x183a   :  { %v3838_v39 = vadd.f32 1e-05, %v3834_v58  ;;  %v3835_v22 = vmax.f32 %v3833_v48, 0.0 }
0x183c   :  { %6175 = vrsqrt.f32 %v3838_v39  ;;  %v3839_v40 = vadd.f32 1e-05, %v3835_v22 }
0x183e   :  { %6177 = vrsqrt.f32 %v3839_v40 }
0x1846   :  { %v6176_v11 = vpop.eup %6175 }
0x1847   :  { %v3842_v45 = vmul.f32 %v6176_v11, %v3836_v7 }
0x1848   :  { %v6178_v24 = vpop.eup %6177 }
0x1849   :  { %v3843_v26 = vmul.f32 %v6178_v24, %v3837_v36  ;;  %v3848_v42 = vmul.f32 %v3847_v63, %v3842_v45 }
0x184b   :  { %v3849_v31 = vmul.f32 %v3847_v63, %v3843_v26  ;;  %v7398_v30 = vadd.f32 %v3853_v14, %v3848_v42 }
0x184d   :  { %v7400_v6 = vadd.f32 %v3853_v14, %v3849_v31 }
0x184f   :  { %v3856_v51 = vpack.c.bf16 %v7400_v6, %v7398_v30 }
0x1851   :  { %4099 = vmatmul.mubr.bf16.vlgmr.msra.gmra.mrb[60].mxu0 %v3856_v51  ;;  %4142 = vmatmul.mubr.bf16.vlgmr.msra.gmra.mrb[56].mxu1 %v3856_v51 }
0x1852   :  { %5282 = vmatpush3.bf16.msra.mxu0 %v6093_v41  ;;  %5304 = vmatpush3.bf16.msra.mxu1 %v6094_v37 }
0x1853   :  { %5283 = vmatprep.subr.bf16.mxu0 %v6095_v54  ;;  %5305 = vmatprep.subr.bf16.mxu1 %v6096_v23 }
0x1856   :  { %5284 = vmatpush3.bf16.msra.mxu0 %v6097_v46  ;;  %5306 = vmatpush3.bf16.msra.mxu1 %v6098_v60 }
0x1857   :  { %5285 = vmatprep.subr.bf16.mxu0 %v6099_v43  ;;  %5307 = vmatprep.subr.bf16.mxu1 %v6100_v9 }
0x185a   :  { %5286 = vmatpush3.bf16.msra.mxu0 %v6101_v56  ;;  %5308 = vmatpush3.bf16.msra.mxu1 %v6102_v61 }
0x185b   :  { %5287 = vmatprep.subr.bf16.mxu0 %v6103_v57  ;;  %5309 = vmatprep.subr.bf16.mxu1 %v6104_v3  ;;  %v4232_v57 = vrot.slane %v7273_v5, %v6776_v47 }
0x185e   :  { %5288 = vmatpush3.bf16.msra.mxu0 %v6105_v19  ;;  %5310 = vmatpush3.bf16.msra.mxu1 %v6106_v20 }
0x185f   :  { %5289 = vmatprep.subr.bf16.mxu0 %v6107_v28  ;;  %5311 = vmatprep.subr.bf16.mxu1 %v6108_v33 }
0x1862   :  { %5290 = vmatpush3.bf16.msra.mxu0 %v6109_v34  ;;  %5312 = vmatpush3.bf16.msra.mxu1 %v6110_v16 }
0x1863   :  { %5291 = vmatprep.subr.bf16.mxu0 %v6111_v8  ;;  %5313 = vmatprep.subr.bf16.mxu1 %v6112_v2 }
0x1866   :  { %5292 = vmatpush3.bf16.msra.mxu0 %v6113_v52  ;;  %5314 = vmatpush3.bf16.msra.mxu1 %v6114_v49 }
0x1867   :  { %5293 = vmatprep.subr.bf16.mxu0 %v6115_v35  ;;  %5315 = vmatprep.subr.bf16.mxu1 %v6116_v15 }
0x186a   :  { %5294 = vmatpush3.bf16.msra.mxu0 %v6117_v55  ;;  %5316 = vmatpush3.bf16.msra.mxu1 %v6118_v25 }
0x186b   :  { %5295 = vmatprep.subr.bf16.mxu0 %v6119_v10  ;;  %5317 = vmatprep.subr.bf16.mxu1 %v6120_v59 }
0x186e   :  { %5296 = vmatpush3.bf16.msra.mxu0 %v6121_v27  ;;  %5318 = vmatpush3.bf16.msra.mxu1 %v6122_v53  ;;  %v6123_v27 = vld [vmem:[#allocation16] sm:$0xff]   ;;  %v6124_v53 = vld [vmem:[#allocation16 + $0x8] sm:$0xff]  }
0x186f   :  { %5694 = vmatprep.subr.bf16.mxu0 %v6486_v1 }
0x1924   :  { %v4100_v50 = vpop.f32.mrb[60].mxu0  ;;  %v4143_v58 = vpop.f32.mrb[56].mxu1 }
0x1925   :  { %v4101_v48 = vadd.f32 %v4100_v50, %v3893_v17  ;;  %v4144_v39 = vadd.f32 %v4143_v58, %v3901_v32  ;;  %v4102_v22 = vpop.f32.mrb[61].mxu0  ;;  %v4145_v40 = vpop.f32.mrb[57].mxu1 }
0x1926   :  { %v4103_v7 = vadd.f32 %v4102_v22, %v3897_v4  ;;  %v4146_v63 = vadd.f32 %v4145_v40, %v3905_v21  ;;  %v4104_v11 = vpop.f32.mrb[62].mxu0  ;;  %v4147_v36 = vpop.f32.mrb[58].mxu1 }
0x1927   :  { %v4105_v45 = vadd.f32 %v4104_v11, %v3893_v17  ;;  %v4148_v24 = vadd.f32 %v4147_v36, %v3901_v32  ;;  %v4106_v26 = vpop.f32.mrb[63].mxu0  ;;  %v4149_v42 = vpop.f32.mrb[59].mxu1  ;;  %v4152_v31 = vmax.f32 %v4101_v48, 0.0  ;;  %v4154_v12 = vmax.f32 %v4144_v39, 0.0  ;;  %v6126_v17 = vld [vmem:[#allocation16 + $0x18] sm:$0xff]   ;;  %v6129_v32 = vld [vmem:[#allocation16 + $0x30] sm:$0xff]  }
0x1928   :  { %v4107_v13 = vadd.f32 %v4106_v26, %v3897_v4  ;;  %v4150_v14 = vadd.f32 %v4149_v42, %v3905_v21  ;;  %v4153_v37 = vmax.f32 %v4103_v7, 0.0  ;;  %v4155_v51 = vmax.f32 %v4146_v63, 0.0  ;;  %v6130_v4 = vld [vmem:[#allocation16 + $0x38] sm:$0xff]  }
0x1929   :  { %v4156_v41 = vmax.f32 %v4105_v45, 0.0  ;;  %v4158_v44 = vmax.f32 %v4148_v24, 0.0 }
0x192a   :  { %v4157_v54 = vmax.f32 %v4107_v13, 0.0  ;;  %v4159_v23 = vmax.f32 %v4150_v14, 0.0  ;;  %v4540_v14 = vrot.slane %v7273_v5, %v7069_v38 }
0x192b   :  { %v4160_v46 = vpack.c.bf16 %v4156_v41, %v4152_v31  ;;  %v4162_v60 = vpack.c.bf16 %v4158_v44, %v4154_v12  ;;  %v4546_v41 = vrot.slane %v7273_v5, %v7074_v18 }
0x192c   :  { %v4161_v43 = vpack.c.bf16 %v4157_v54, %v4153_v37  ;;  %v4163_v9 = vpack.c.bf16 %v4159_v23, %v4155_v51 }
0x192e   :  { %4457 = vmatprep.mubr.bf16.mxu0 %v4161_v43  ;;  %4498 = vmatprep.mubr.bf16.mxu1 %v4163_v9 }
0x192f   :  { %4458 = vmatmul.mubr.bf16.vlgmr.msra.gmra.mrb[64].mxu0 %v4160_v46  ;;  %4499 = vmatmul.mubr.bf16.vlgmr.msra.gmra.mrb[60].mxu1 %v4162_v60 }
0x1930   :  { %5710 = vmatprep.mubr.msk.bf16.mxu0 %vm6487_vm0, %v6486_v1  ;;  %5695 = vmatpush3.bf16.msra.mxu0 %v6123_v27 }
0x1931   :  { %5696 = vmatprep.subr.bf16.mxu0 %v6486_v1 }
0x1934   :  { %5697 = vmatpush3.bf16.msra.mxu0 %v6124_v53 }
0x1935   :  { %5698 = vmatprep.subr.bf16.mxu0 %v6486_v1 }
0x1938   :  { %5699 = vmatpush3.bf16.msra.mxu0 %v6125_v29 }
0x1939   :  { %5700 = vmatprep.subr.bf16.mxu0 %v6486_v1 }
0x193c   :  { %5701 = vmatpush3.bf16.msra.mxu0 %v6126_v17 }
0x193d   :  { %5702 = vmatprep.subr.bf16.mxu0 %v6486_v1 }
0x1a02   :  { %v5297_v56 = vpop.f32.mrb[64].mxu0  ;;  %v5319_v61 = vpop.f32.mrb[60].mxu1 }
0x1a03   :  { %v5298_v3 = vpop.f32.mrb[65].mxu0  ;;  %v5320_v19 = vpop.f32.mrb[61].mxu1 }
0x1a04   :  { %v5299_v20 = vadd.f32 %v5298_v3, %v5297_v56  ;;  %v5321_v28 = vadd.f32 %v5320_v19, %v5319_v61  ;;  %v5300_v33 = vpop.f32.mrb[66].mxu0  ;;  %v5322_v34 = vpop.f32.mrb[62].mxu1 }
0x1a05   :  { %v5301_v16 = vpop.f32.mrb[67].mxu0  ;;  %v5323_v8 = vpop.f32.mrb[63].mxu1 }
0x1a06   :  { %v4460_v2 = vadd.f32 %v5299_v20, %v4232_v57  ;;  %v5302_v52 = vadd.f32 %v5301_v16, %v5300_v33  ;;  %v5324_v49 = vadd.f32 %v5323_v8, %v5322_v34 }
0x1a08   :  { %v4501_v35 = vadd.f32 %v5321_v28, %v4460_v2  ;;  %v4463_v15 = vadd.f32 %v5302_v52, %v4232_v57 }
0x1a0a   :  { %v4504_v55 = vadd.f32 %v5324_v49, %v4463_v15  ;;  %v4507_v25 = vadd.f32 %v4501_v35, %v7398_v30  ;;  %v6127_v30 = vld [vmem:[#allocation16 + $0x20] sm:$0xff]  }
0x1a0b   :  { %5703 = vmatpush3.bf16.msra.mxu0 %v6127_v30 }
0x1a0c   :  { %4509 = vadd.xlane.f32.xlu0 %v4507_v25  ;;  %v4508_v10 = vadd.f32 %v4504_v55, %v7400_v6  ;;  %v4515_v47 = vmul.f32 %v4507_v25, %v4507_v25  ;;  %v6128_v6 = vld [vmem:[#allocation16 + $0x28] sm:$0xff]   ;;  %5704 = vmatprep.subr.bf16.mxu0 %v6486_v1 }
0x1a0e   :  { %4511 = vadd.xlane.f32.xlu1 %v4508_v10  ;;  %v4516_v59 = vmul.f32 %v4508_v10, %v4508_v10 }
0x1a0f   :  { %5705 = vmatpush3.bf16.msra.mxu0 %v6128_v6 }
0x1a10   :  { %4517 = vadd.xlane.f32.xlu0 %v4515_v47  ;;  %5706 = vmatprep.subr.bf16.mxu0 %v6486_v1 }
0x1a12   :  { %4519 = vadd.xlane.f32.xlu1 %v4516_v59 }
0x1a13   :  { %5707 = vmatpush3.bf16.msra.mxu0 %v6129_v32 }
0x1a14   :  { %5708 = vmatprep.subr.bf16.mxu0 %v6486_v1 }
0x1a17   :  { %5709 = vmatpush3.bf16.msra.mxu0 %v6130_v4 }
0x1a99   :  { %v4510_v21 = vpop.xlane.xlu0 %4509 }
0x1a9a   :  { %v4513_v50 = vmul.f32 0.0078125, %v4510_v21 }
0x1a9b   :  { %v4512_v58 = vpop.xlane.xlu1 %4511 }
0x1a9c   :  { %v4514_v48 = vmul.f32 0.0078125, %v4512_v58  ;;  %v4523_v22 = vmul.f32 %v4513_v50, %v4513_v50  ;;  %v4529_v1 = vsub.f32 %v4507_v25, %v4513_v50 }
0x1a9d   :  { %v4518_v39 = vpop.xlane.xlu0 %4517 }
0x1a9e   :  { %v4521_v40 = vmul.f32 0.0078125, %v4518_v39  ;;  %v4524_v63 = vmul.f32 %v4514_v48, %v4514_v48  ;;  %v4530_v12 = vsub.f32 %v4508_v10, %v4514_v48 }
0x1a9f   :  { %v4520_v7 = vpop.xlane.xlu1 %4519 }
0x1aa0   :  { %v4525_v11 = vsub.f32 %v4521_v40, %v4523_v22  ;;  %v4522_v36 = vmul.f32 0.0078125, %v4520_v7 }
0x1aa2   :  { %v4527_v45 = vmax.f32 %v4525_v11, 0.0  ;;  %v4526_v24 = vsub.f32 %v4522_v36, %v4524_v63 }
0x1aa4   :  { %v4531_v26 = vadd.f32 1e-05, %v4527_v45  ;;  %v4528_v42 = vmax.f32 %v4526_v24, 0.0 }
0x1aa6   :  { %6179 = vrsqrt.f32 %v4531_v26  ;;  %v4532_v13 = vadd.f32 1e-05, %v4528_v42 }
0x1aa8   :  { %6181 = vrsqrt.f32 %v4532_v13 }
0x1ab0   :  { %v6180_v31 = vpop.eup %6179 }
0x1ab1   :  { %v4535_v44 = vmul.f32 %v6180_v31, %v4529_v1 }
0x1ab2   :  { %v6182_v37 = vpop.eup %6181 }
0x1ab3   :  { %v4541_v51 = vmul.f32 %v4540_v14, %v4535_v44  ;;  %v4536_v54 = vmul.f32 %v6182_v37, %v4530_v12 }
0x1ab5   :  { %v4547_v23 = vadd.f32 %v4546_v41, %v4541_v51  ;;  %v4542_v46 = vmul.f32 %v4540_v14, %v4536_v54 }
0x1ab7   :  { %v4548_v60 = vadd.f32 %v4546_v41, %v4542_v46  ;;  %v4549_v43 = vsel %vm6785_vm2, %v4547_v23, 0.0 }
0x1ab8   :  { %v4551_v9 = vrot.slane %v4549_v43, 4 }
0x1ab9   :  { %v4550_v56 = vsel %vm6794_vm4, %v4548_v60, 0.0 }
0x1aba   :  { %v4552_v38 = vadd.f32 %v4551_v9, %v4549_v43  ;;  %v4557_v61 = vrot.slane %v4550_v56, 4 }
0x1abc   :  { %v4553_v57 = vrot.slane %v4552_v38, 2  ;;  %v4558_v3 = vadd.f32 %v4557_v61, %v4550_v56 }
0x1abe   :  { %v4554_v19 = vadd.f32 %v4553_v57, %v4552_v38  ;;  %v4559_v18 = vrot.slane %v4558_v3, 2 }
0x1ac0   :  { %v4555_v5 = vrot.slane %v4554_v19, 1  ;;  %v4560_v20 = vadd.f32 %v4559_v18, %v4558_v3 }
0x1ac2   :  { %v4556_v28 = vadd.f32 %v4555_v5, %v4554_v19  ;;  %v4561_v33 = vrot.slane %v4560_v20, 1 }
0x1ac4   :  { %v4562_v34 = vadd.f32 %v4561_v33, %v4560_v20  ;;  %v4563_v16 = vpack.c.bf16 %v4556_v28, %v4556_v28 }
0x1ac6   :  { %v4564_v8 = vpack.c.bf16 %v4562_v34, %v4562_v34  ;;  %v4590_v62 = vunpack.c.l.b16 %v4563_v16 }
0x1ac8   :  { %v4591_v2 = vunpack.c.l.b16 %v4564_v8 }
0x1aca   :  { %v4593_v52 = vsel %vm4592_vm5, %v4591_v2, %v4590_v62 }
0x1acb   :  { %v4594_v49 = vpack.c.b16 %v4593_v52, %v4593_v52 }
0x1acd   :  { %5711 = vmatmul.mubr.bf16.vlgmr.msra.gmra.mrb[68].mxu0 %v4594_v49 }
0x1ba0   :  { %v4678_v35 = vpop.f32.mrb[68].mxu0 }
0x1ba1   :  { %v4679_v15 = vadd.f32 %v5022_v0, %v4678_v35  ;;  %v5712_v55 = vpop.f32.mrb[69].mxu0 }
0x1ba2   :  { %v4681_v25 = vpop.f32.mrb[70].mxu0 }
0x1ba3   :  { %4684 = vst [vmem:[#allocation19] sm:$0x3] %v4679_v15  ;;  %v5713_v10 = vpop.f32.mrb[71].mxu0 }
0x1ba4   :  { %6441 = shalt.err (!%p6438_p11)
}
0x1ba5   :  { %s6442_s28 = scalar_lea.hbm %s7459_s14, 32 }
0x1ba6   :  { %p6443_p12 = scmp.ne.s32.totalorder %s7459_s14, %s6442_s28  ;;  %p6446_p13 = scmp.lt.u32.totalorder %s6442_s28, %s7459_s14 }
0x1ba8   :  { %p6448_p0 = pnand %p6446_p13, %p6443_p12 }
0x1baa   :  { %6451 = shalt.err (!%p6448_p0)
}
0x1bab   :  { %4694 = dma.vmem_to_hbm [thread:$0]  %s4692_s11, 32, %s7459_s14, [#allocation4]  }
0x1bac   :  { %6464 = dma.done.wait [#allocation4], 32  }
0x1bad   :  { %6465 = vsyncadd [#allocation4], 4294967264 }
0x1bae   :  { %4698 = vsyncpa [#allocation3], 1 }
0x1baf   :  { %4699 = vsyncpa [#allocation8], 1 }
0x1bb0   :  { %4700 = vsyncpa [#allocation11], 1 }
0x1bb1   :  { %4701 = vsyncpa [#allocation14], 1 }
0x1bb2   :  { %4702 = vsyncpa [#allocation17], 1 }
0x1bb3   :  { %4703 = vsyncpa [#allocation4], 1 }
0x1bb4   :  { %4704 = vsyncpa [#allocation5], 1 }

</bundles_post_ra>
